<compile_context>
chip_gen: v5e
topology: v5e:2x2
jax: 0.10.0
libtpu: 0.0.40
codegen_flags: <defaults>
</compile_context>

<pallas_src>
import functools

import jax
import jax.numpy as jnp
from jax.experimental import pallas as pl
from jax.experimental.pallas import tpu as pltpu

LANE = 128  # TPU lane width


# ----------------------------------------------------------------------------- helpers
def _round_up(x, m):
    return ((x + m - 1) // m) * m


def _pad2d(x, rows, cols):
    return jnp.pad(x, ((0, rows - x.shape[0]), (0, cols - x.shape[1])))


# ----------------------------------------------------------------------------- kernel
def _actor_fused_kernel(*refs, W1, HL, WL, n_extra, n_trunk, feat_dim, act_dim,
                        log_std_min, log_std_max):
    """One sample per grid step: conv stack -> head -> LayerNorm/tanh -> trunk -> (mu,std)."""
    p1_ref, w1_ref, b1_ref = refs[0], refs[1], refs[2]
    pos = 3
    conv_params = []
    for _ in range(n_extra):
        conv_params.append((refs[pos], refs[pos + 1]))
        pos += 2
    wh_ref, bh_ref, g_ref, be_ref = refs[pos], refs[pos + 1], refs[pos + 2], refs[pos + 3]
    pos += 4
    trunk_params = []
    for _ in range(n_trunk):
        trunk_params.append((refs[pos], refs[pos + 1]))
        pos += 2
    o_ref = refs[pos]
    a_scr = refs[pos + 1]          # VMEM scratch holding the current conv activation

    # ---- conv1: im2col patches (P1pad, K1p) @ (K1p, CP) on the MXU -------------------
    a = jnp.dot(p1_ref[...], w1_ref[...], preferred_element_type=jnp.float32)
    a_scr[...] = jnp.maximum(a + b1_ref[...], 0.0)   # row i = spatial pos (i//W1, i%W1)
    rows = a_scr.shape[0]

    # ---- remaining 3x3 stride-1 convs: 9 shifted matmuls, activation stays in VMEM ---
    # Result row i is the conv output at (i // W1, i % W1); rows whose column index
    # exceeds the valid output width are wrap-around junk and are never read downstream.
    for w_ref, b_ref in conv_params:
        L = rows - (2 * W1 + 2)
        r = None
        for kh in range(3):
            for kw in range(3):
                s = kh * W1 + kw
                part = jnp.dot(a_scr[s:s + L, :], w_ref[kh * 3 + kw],
                               preferred_element_type=jnp.float32)
                r = part if r is None else r + part
        a_scr[0:L, :] = jnp.maximum(r + b_ref[...], 0.0)
        rows = L

    # ---- head Linear: contract (position, channel) against the permutation-folded
    #      head weight; one (1,CP) x (CP,Fp) matmul per valid spatial position ----------
    h = None
    for oh in range(HL):
        for ow in range(WL):
            i = oh * W1 + ow          # row in the W1-strided conv activation layout
            j = oh * WL + ow          # row block in the head weight
            part = jnp.dot(a_scr[i:i + 1, :], wh_ref[j],
                           preferred_element_type=jnp.float32)
            h = part if h is None else h + part
    y = h + bh_ref[...]               # (1, Fp); lanes >= feat_dim are exactly zero

    # ---- LayerNorm(eps=1e-5) over the real feature_dim columns, then tanh ------------
    fp = y.shape[-1]
    lane = jax.lax.broadcasted_iota(jnp.int32, (1, fp), 1)
    fmask = (lane < feat_dim).astype(jnp.float32)
    mean = jnp.sum(y, axis=-1, keepdims=True) * (1.0 / feat_dim)   # pad cols are zero
    d = (y - mean) * fmask
    var = jnp.sum(d * d, axis=-1, keepdims=True) * (1.0 / feat_dim)
    z = jnp.tanh(d * jax.lax.rsqrt(var + 1e-5) * g_ref[...] + be_ref[...])

    # ---- trunk MLP (ReLU on all but the last layer); padded lanes stay exactly zero --
    x = z
    for li, (wt_ref, bt_ref) in enumerate(trunk_params):
        x = jnp.dot(x, wt_ref[...], preferred_element_type=jnp.float32) + bt_ref[...]
        if li < n_trunk - 1:
            x = jnp.maximum(x, 0.0)
    t = x                              # lanes [0,A) = mu, [A,2A) = log_std, rest = 0

    ls = jnp.tanh(t)
    ls = log_std_min + 0.5 * (log_std_max - log_std_min) * (ls + 1.0)
    std = jnp.exp(ls)
    lane_t = jax.lax.broadcasted_iota(jnp.int32, t.shape, 1)
    o_ref[...] = jnp.where(lane_t < act_dim, t,
                           jnp.where(lane_t < 2 * act_dim, std, 0.0))


# ----------------------------------------------------------------------------- actor
class Actor:
    """JAX/Pallas port of the PyTorch Actor forward pass (returns mu, std)."""

    def __init__(self, obs_shape, action_dim, *, num_conv_layers=2, num_filters=8,
                 feature_dim=32, hidden_dim=32, hidden_depth=2,
                 log_std_min=-10.0, log_std_max=2.0, key=None):
        C, H, W = obs_shape
        self.in_channels = C
        self.num_layers = num_conv_layers
        self.num_filters = num_filters
        self.feature_dim = feature_dim
        self.action_dim = action_dim
        self.log_std_min = float(log_std_min)
        self.log_std_max = float(log_std_max)

        n_trunk = hidden_depth + 1 if hidden_depth > 0 else 1
        keys = jax.random.split(key, 2 * num_conv_layers + 2 + 2 * n_trunk)
        kidx = 0

        CP = _round_up(num_filters, LANE)           # padded channel lanes
        self.CP = CP

        # conv geometry: conv1 stride 2, the rest stride 1 (all 3x3 VALID)
        self.strides = [2] + [1] * (num_conv_layers - 1)
        self.H1 = (H - 3) // 2 + 1
        self.W1 = (W - 3) // 2 + 1
        self.HL = self.H1 - 2 * (num_conv_layers - 1)
        self.WL = self.W1 - 2 * (num_conv_layers - 1)
        self.P1pad = _round_up(self.H1 * self.W1, 8)
        self.K1 = 9 * C
        self.K1p = _round_up(self.K1, LANE)
        self.output_shape = num_filters * self.HL * self.WL  # torch __init__ probe value

        # ---- conv stack (deterministic synthetic init, PyTorch OIHW layout) ----------
        self.ref_conv_w, self.ref_conv_b = [], []   # HWIO / raw (reference)
        conv_w_pad, conv_b_pad = [], []             # padded kernel params
        cin = C
        for i in range(num_conv_layers):
            w_oihw = 0.05 * jax.random.normal(keys[kidx], (num_filters, cin, 3, 3),
                                              jnp.float32); kidx += 1
            b = 0.05 * jax.random.normal(keys[kidx], (num_filters,), jnp.float32); kidx += 1
            w_hwio = jnp.transpose(w_oihw, (2, 3, 1, 0))            # (3,3,cin,cout)
            self.ref_conv_w.append(w_hwio)
            self.ref_conv_b.append(b)
            if i == 0:
                # fold obs/255 into conv1; rows ordered (kh,kw,cin) to match the patches
                w2d = w_hwio.reshape(9 * cin, num_filters) * (1.0 / 255.0)
                conv_w_pad.append(_pad2d(w2d, self.K1p, CP))
            else:
                # per-tap (cin, cout) weights, both padded to 128 lanes
                w_taps = w_hwio.reshape(9, cin, num_filters)
                conv_w_pad.append(jnp.pad(w_taps, ((0, 0), (0, CP - cin),
                                                   (0, CP - num_filters))))
            conv_b_pad.append(_pad2d(b.reshape(1, num_filters), 1, CP))
            cin = num_filters
        self.conv_w_pad, self.conv_b_pad = conv_w_pad, conv_b_pad

        # ---- head: Linear -> LayerNorm (tanh applied in-kernel) ----------------------
        Fp = _round_up(feature_dim, LANE)
        self.Fp = Fp
        w_lin = 0.05 * jax.random.normal(keys[kidx], (feature_dim, self.output_shape),
                                         jnp.float32); kidx += 1
        b_lin = 0.05 * jax.random.normal(keys[kidx], (feature_dim,), jnp.float32); kidx += 1
        # Fold torch's NCHW flatten permutation into the weight: wh[j, c, f] is the weight
        # for conv output spatial position j = oh*WL + ow, channel c, output feature f.
        wh = jnp.transpose(w_lin.reshape(feature_dim, num_filters, self.HL * self.WL),
                           (2, 1, 0))                               # (HL*WL, nf, feat)
        self.head_w_pad = jnp.pad(wh, ((0, 0), (0, CP - num_filters),
                                       (0, Fp - feature_dim)))
        self.head_b_pad = _pad2d(b_lin.reshape(1, feature_dim), 1, Fp)
        self.gamma_pad = _pad2d(jnp.ones((1, feature_dim), jnp.float32), 1, Fp)
        self.beta_pad = jnp.zeros((1, Fp), jnp.float32)
        self.ref_head_w, self.ref_head_b = w_lin, b_lin
        self.ref_gamma = jnp.ones((feature_dim,), jnp.float32)
        self.ref_beta = jnp.zeros((feature_dim,), jnp.float32)

        # ---- trunk MLP: feature_dim -> hidden^depth -> 2*action_dim ------------------
        if hidden_depth > 0:
            dims = [feature_dim] + [hidden_dim] * hidden_depth + [2 * action_dim]
        else:
            dims = [feature_dim, 2 * action_dim]
        self.trunk_w, self.trunk_b = [], []          # padded (kernel)
        self.ref_trunk_w, self.ref_trunk_b = [], []  # torch (out,in) layout (reference)
        for li in range(len(dims) - 1):
            din, dout = dims[li], dims[li + 1]
            wt = 0.05 * jax.random.normal(keys[kidx], (dout, din), jnp.float32); kidx += 1
            bt = 0.05 * jax.random.normal(keys[kidx], (dout,), jnp.float32); kidx += 1
            self.trunk_w.append(_pad2d(wt.T, _round_up(din, LANE), _round_up(dout, LANE)))
            self.trunk_b.append(_pad2d(bt.reshape(1, dout), 1, _round_up(dout, LANE)))
            self.ref_trunk_w.append(wt)
            self.ref_trunk_b.append(bt)
        self.OutP = self.trunk_w[-1].shape[1]

        self._jit_forward = jax.jit(self._forward_impl)

    # ---------------------------------------------------------------- fused forward
    def _forward_impl(self, obs_nchw):
        # TODO(synk): svea_cmid stack_representations path (frame-stack reshape) omitted.
        x = jnp.transpose(obs_nchw.astype(jnp.float32), (0, 2, 3, 1))   # NCHW -> NHWC
        B = x.shape[0]
        H1, W1 = self.H1, self.W1

        # conv1 im2col on the tiny raw input (XLA glue; /255 is folded into conv1's
        # weights).  Column order (kh, kw, cin) matches the padded weight rows.
        cols = []
        for kh in range(3):
            for kw in range(3):
                cols.append(x[:, kh:kh + 2 * (H1 - 1) + 1:2,
                               kw:kw + 2 * (W1 - 1) + 1:2, :])
        p1 = jnp.stack(cols, axis=3).reshape(B, H1 * W1, self.K1)
        p1 = jnp.pad(p1, ((0, 0), (0, self.P1pad - H1 * W1), (0, self.K1p - self.K1)))

        n_extra = self.num_layers - 1
        n_trunk = len(self.trunk_w)
        kernel = functools.partial(
            _actor_fused_kernel, W1=W1, HL=self.HL, WL=self.WL,
            n_extra=n_extra, n_trunk=n_trunk, feat_dim=self.feature_dim,
            act_dim=self.action_dim, log_std_min=self.log_std_min,
            log_std_max=self.log_std_max)

        args = [p1, self.conv_w_pad[0], self.conv_b_pad[0]]
        in_specs = [
            pl.BlockSpec((None, self.P1pad, self.K1p), lambda b: (b, 0, 0)),
            pl.BlockSpec(self.conv_w_pad[0].shape, lambda b: (0, 0)),
            pl.BlockSpec(self.conv_b_pad[0].shape, lambda b: (0, 0)),
        ]
        for i in range(1, self.num_layers):
            args.extend([self.conv_w_pad[i], self.conv_b_pad[i]])
            in_specs.append(pl.BlockSpec(self.conv_w_pad[i].shape, lambda b: (0, 0, 0)))
            in_specs.append(pl.BlockSpec(self.conv_b_pad[i].shape, lambda b: (0, 0)))
        args.extend([self.head_w_pad, self.head_b_pad, self.gamma_pad, self.beta_pad])
        in_specs.append(pl.BlockSpec(self.head_w_pad.shape, lambda b: (0, 0, 0)))
        for arr in (self.head_b_pad, self.gamma_pad, self.beta_pad):
            in_specs.append(pl.BlockSpec(arr.shape, lambda b: (0, 0)))
        for w, bb in zip(self.trunk_w, self.trunk_b):
            args.extend([w, bb])
            in_specs.append(pl.BlockSpec(w.shape, lambda b: (0, 0)))
            in_specs.append(pl.BlockSpec(bb.shape, lambda b: (0, 0)))

        out = pl.pallas_call(
            kernel,
            out_shape=jax.ShapeDtypeStruct((B, 1, self.OutP), jnp.float32),
            grid=(B,),
            in_specs=in_specs,
            out_specs=pl.BlockSpec((None, 1, self.OutP), lambda b: (b, 0, 0)),
            scratch_shapes=[pltpu.VMEM((self.P1pad, self.CP), jnp.float32)],
            compiler_params=pltpu.CompilerParams(dimension_semantics=("parallel",)),
        )(*args)

        A = self.action_dim
        out = out[:, 0, :]
        # TODO(synk): SquashedNormal distribution object (sampling / log_prob) has no
        # Pallas equivalent; we return its parameters (mu, std).
        return out[:, :A], out[:, A:2 * A]

    def forward(self, obs_nchw):
        return self._jit_forward(obs_nchw)


# ----------------------------------------------------------------------------- reference
def reference_forward(actor, obs_nchw):
    x = jnp.transpose(obs_nchw.astype(jnp.float32) / 255.0, (0, 2, 3, 1))
    for i in range(actor.num_layers):
        x = jax.lax.conv_general_dilated(
            x, actor.ref_conv_w[i], (actor.strides[i], actor.strides[i]), "VALID",
            dimension_numbers=("NHWC", "HWIO", "NHWC")) + actor.ref_conv_b[i]
        x = jnp.maximum(x, 0.0)
    h = jnp.transpose(x, (0, 3, 1, 2)).reshape(x.shape[0], -1)   # torch NCHW flatten
    y = h @ actor.ref_head_w.T + actor.ref_head_b
    mean = jnp.mean(y, axis=-1, keepdims=True)
    var = jnp.mean(jnp.square(y - mean), axis=-1, keepdims=True)
    z = jnp.tanh((y - mean) / jnp.sqrt(var + 1e-5) * actor.ref_gamma + actor.ref_beta)
    t = z
    for li, (w, b) in enumerate(zip(actor.ref_trunk_w, actor.ref_trunk_b)):
        t = t @ w.T + b
        if li < len(actor.ref_trunk_w) - 1:
            t = jnp.maximum(t, 0.0)
    A = actor.action_dim
    mu, log_std = t[:, :A], t[:, A:]
    log_std = jnp.tanh(log_std)
    log_std = actor.log_std_min + 0.5 * (actor.log_std_max - actor.log_std_min) * (log_std + 1)
    return mu, jnp.exp(log_std)


# ----------------------------------------------------------------------------- main
if __name__ == "__main__":
    key = jax.random.PRNGKey(0)
    k_obs, k_params = jax.random.split(key)

    # small shapes consistent with the module: (B, C, H, W) image observations
    B, C, H, W = 2, 4, 16, 16
    action_dim = 4
    obs = jax.random.randint(k_obs, (B, C, H, W), 0, 256).astype(jnp.float32)

    actor = Actor((C, H, W), action_dim, num_conv_layers=2, num_filters=8,
                  feature_dim=32, hidden_dim=32, hidden_depth=2,
                  log_std_min=-10.0, log_std_max=2.0, key=k_params)

    mu, std = actor.forward(obs)
    mu = jax.block_until_ready(mu)
    std = jax.block_until_ready(std)

    mu_ref, std_ref = reference_forward(actor, obs)
    mu_ref = jax.block_until_ready(mu_ref)
    std_ref = jax.block_until_ready(std_ref)

    assert mu.shape == (B, action_dim) and std.shape == (B, action_dim), (mu.shape, std.shape)
    assert jnp.allclose(mu, mu_ref, rtol=2e-4, atol=2e-4), \
        f"mu max abs err {jnp.max(jnp.abs(mu - mu_ref))}"
    assert jnp.allclose(std, std_ref, rtol=2e-4, atol=2e-4), \
        f"std max abs err {jnp.max(jnp.abs(std - std_ref))}"

    print("KERNEL_OK")
</pallas_src>

<mosaic_0001>
module attributes {stable_mosaic.version = 11 : i64} {
  func.func @_actor_fused_kernel(%arg0: i32, %arg1: memref<1x56x128xf32, #tpu.memory_space<vmem>>, %arg2: memref<128x128xf32, #tpu.memory_space<vmem>>, %arg3: memref<1x128xf32, #tpu.memory_space<vmem>>, %arg4: memref<9x128x128xf32, #tpu.memory_space<vmem>>, %arg5: memref<1x128xf32, #tpu.memory_space<vmem>>, %arg6: memref<25x128x128xf32, #tpu.memory_space<vmem>>, %arg7: memref<1x128xf32, #tpu.memory_space<vmem>>, %arg8: memref<1x128xf32, #tpu.memory_space<vmem>>, %arg9: memref<1x128xf32, #tpu.memory_space<vmem>>, %arg10: memref<128x128xf32, #tpu.memory_space<vmem>>, %arg11: memref<1x128xf32, #tpu.memory_space<vmem>>, %arg12: memref<128x128xf32, #tpu.memory_space<vmem>>, %arg13: memref<1x128xf32, #tpu.memory_space<vmem>>, %arg14: memref<128x128xf32, #tpu.memory_space<vmem>>, %arg15: memref<1x128xf32, #tpu.memory_space<vmem>>, %arg16: memref<1x1x128xf32, #tpu.memory_space<vmem>>, %arg17: memref<56x128xf32, #tpu.memory_space<vmem>>) attributes {dimension_semantics = [#tpu.dimension_semantics<parallel>], iteration_bounds = array<i64: 2>, scalar_prefetch = 0 : i64, scratch_operands = 1 : i64, tpu.core_type = #tpu.core_type<tc>, window_params = [{transform_indices = @transform_0, window_bounds = array<i64: 1, 56, 128>}, {pipeline_mode = #tpu.pipeline_mode<synchronous>, transform_indices = @transform_1, window_bounds = array<i64: 128, 128>}, {pipeline_mode = #tpu.pipeline_mode<synchronous>, transform_indices = @transform_2, window_bounds = array<i64: 1, 128>}, {pipeline_mode = #tpu.pipeline_mode<synchronous>, transform_indices = @transform_3, window_bounds = array<i64: 9, 128, 128>}, {pipeline_mode = #tpu.pipeline_mode<synchronous>, transform_indices = @transform_4, window_bounds = array<i64: 1, 128>}, {pipeline_mode = #tpu.pipeline_mode<synchronous>, transform_indices = @transform_5, window_bounds = array<i64: 25, 128, 128>}, {pipeline_mode = #tpu.pipeline_mode<synchronous>, transform_indices = @transform_6, window_bounds = array<i64: 1, 128>}, {pipeline_mode = #tpu.pipeline_mode<synchronous>, transform_indices = @transform_7, window_bounds = array<i64: 1, 128>}, {pipeline_mode = #tpu.pipeline_mode<synchronous>, transform_indices = @transform_8, window_bounds = array<i64: 1, 128>}, {pipeline_mode = #tpu.pipeline_mode<synchronous>, transform_indices = @transform_9, window_bounds = array<i64: 128, 128>}, {pipeline_mode = #tpu.pipeline_mode<synchronous>, transform_indices = @transform_10, window_bounds = array<i64: 1, 128>}, {pipeline_mode = #tpu.pipeline_mode<synchronous>, transform_indices = @transform_11, window_bounds = array<i64: 128, 128>}, {pipeline_mode = #tpu.pipeline_mode<synchronous>, transform_indices = @transform_12, window_bounds = array<i64: 1, 128>}, {pipeline_mode = #tpu.pipeline_mode<synchronous>, transform_indices = @transform_13, window_bounds = array<i64: 128, 128>}, {pipeline_mode = #tpu.pipeline_mode<synchronous>, transform_indices = @transform_14, window_bounds = array<i64: 1, 128>}, {transform_indices = @transform_15, window_bounds = array<i64: 1, 1, 128>}]} {
    %c0 = arith.constant 0 : index
    %c0_0 = arith.constant 0 : index
    %c0_1 = arith.constant 0 : index
    %0 = vector.load %arg1[%c0, %c0_0, %c0_1] : memref<1x56x128xf32, #tpu.memory_space<vmem>>, vector<1x56x128xf32>
    %1 = vector.shape_cast %0 : vector<1x56x128xf32> to vector<56x128xf32>
    %c0_2 = arith.constant 0 : index
    %c0_3 = arith.constant 0 : index
    %2 = vector.load %arg2[%c0_2, %c0_3] : memref<128x128xf32, #tpu.memory_space<vmem>>, vector<128x128xf32>
    %cst = arith.constant dense<0.000000e+00> : vector<56x128xf32>
    %3 = tpu.matmul %1, %2, %cst {dimension_numbers = #tpu.dot_dimension_numbers<[1], [0], [0], [1], [0, 0, 1, 1], [], []>} : vector<56x128xf32>, vector<128x128xf32>, vector<56x128xf32> -> vector<56x128xf32>
    %c0_4 = arith.constant 0 : index
    %c0_5 = arith.constant 0 : index
    %4 = vector.load %arg3[%c0_4, %c0_5] : memref<1x128xf32, #tpu.memory_space<vmem>>, vector<1x128xf32>
    %5 = vector.broadcast %4 : vector<1x128xf32> to vector<56x128xf32>
    %6 = arith.addf %3, %5 : vector<56x128xf32>
    %cst_6 = arith.constant 0.000000e+00 : f32
    %7 = vector.broadcast %cst_6 : f32 to vector<56x128xf32>
    %8 = arith.maximumf %6, %7 : vector<56x128xf32>
    %c0_7 = arith.constant 0 : index
    %c0_8 = arith.constant 0 : index
    %9 = vector.load %arg17[%c0_7, %c0_8] : memref<56x128xf32, #tpu.memory_space<vmem>>, vector<56x128xf32>
    tpu.vector_store %arg17[%c0_7, %c0_8], %8 {strides = array<i32>} : memref<56x128xf32, #tpu.memory_space<vmem>>, vector<56x128xf32>,
    %c0_9 = arith.constant 0 : index
    %c0_10 = arith.constant 0 : index
    %10 = vector.load %arg17[%c0_9, %c0_10] : memref<56x128xf32, #tpu.memory_space<vmem>>, vector<40x128xf32>
    %c0_11 = arith.constant 0 : index
    %c0_12 = arith.constant 0 : index
    %c0_13 = arith.constant 0 : index
    %11 = vector.load %arg4[%c0_11, %c0_12, %c0_13] : memref<9x128x128xf32, #tpu.memory_space<vmem>>, vector<1x128x128xf32>
    %12 = vector.shape_cast %11 : vector<1x128x128xf32> to vector<128x128xf32>
    %cst_14 = arith.constant dense<0.000000e+00> : vector<40x128xf32>
    %13 = tpu.matmul %10, %12, %cst_14 {dimension_numbers = #tpu.dot_dimension_numbers<[1], [0], [0], [1], [0, 0, 1, 1], [], []>} : vector<40x128xf32>, vector<128x128xf32>, vector<40x128xf32> -> vector<40x128xf32>
    %c1 = arith.constant 1 : index
    %c0_15 = arith.constant 0 : index
    %14 = vector.load %arg17[%c1, %c0_15] : memref<56x128xf32, #tpu.memory_space<vmem>>, vector<40x128xf32>
    %c1_16 = arith.constant 1 : index
    %c0_17 = arith.constant 0 : index
    %c0_18 = arith.constant 0 : index
    %15 = vector.load %arg4[%c1_16, %c0_17, %c0_18] : memref<9x128x128xf32, #tpu.memory_space<vmem>>, vector<1x128x128xf32>
    %16 = vector.shape_cast %15 : vector<1x128x128xf32> to vector<128x128xf32>
    %cst_19 = arith.constant dense<0.000000e+00> : vector<40x128xf32>
    %17 = tpu.matmul %14, %16, %cst_19 {dimension_numbers = #tpu.dot_dimension_numbers<[1], [0], [0], [1], [0, 0, 1, 1], [], []>} : vector<40x128xf32>, vector<128x128xf32>, vector<40x128xf32> -> vector<40x128xf32>
    %18 = arith.addf %13, %17 : vector<40x128xf32>
    %c2 = arith.constant 2 : index
    %c0_20 = arith.constant 0 : index
    %19 = vector.load %arg17[%c2, %c0_20] : memref<56x128xf32, #tpu.memory_space<vmem>>, vector<40x128xf32>
    %c2_21 = arith.constant 2 : index
    %c0_22 = arith.constant 0 : index
    %c0_23 = arith.constant 0 : index
    %20 = vector.load %arg4[%c2_21, %c0_22, %c0_23] : memref<9x128x128xf32, #tpu.memory_space<vmem>>, vector<1x128x128xf32>
    %21 = vector.shape_cast %20 : vector<1x128x128xf32> to vector<128x128xf32>
    %cst_24 = arith.constant dense<0.000000e+00> : vector<40x128xf32>
    %22 = tpu.matmul %19, %21, %cst_24 {dimension_numbers = #tpu.dot_dimension_numbers<[1], [0], [0], [1], [0, 0, 1, 1], [], []>} : vector<40x128xf32>, vector<128x128xf32>, vector<40x128xf32> -> vector<40x128xf32>
    %23 = arith.addf %18, %22 : vector<40x128xf32>
    %c7 = arith.constant 7 : index
    %c0_25 = arith.constant 0 : index
    %24 = vector.load %arg17[%c7, %c0_25] : memref<56x128xf32, #tpu.memory_space<vmem>>, vector<40x128xf32>
    %c3 = arith.constant 3 : index
    %c0_26 = arith.constant 0 : index
    %c0_27 = arith.constant 0 : index
    %25 = vector.load %arg4[%c3, %c0_26, %c0_27] : memref<9x128x128xf32, #tpu.memory_space<vmem>>, vector<1x128x128xf32>
    %26 = vector.shape_cast %25 : vector<1x128x128xf32> to vector<128x128xf32>
    %cst_28 = arith.constant dense<0.000000e+00> : vector<40x128xf32>
    %27 = tpu.matmul %24, %26, %cst_28 {dimension_numbers = #tpu.dot_dimension_numbers<[1], [0], [0], [1], [0, 0, 1, 1], [], []>} : vector<40x128xf32>, vector<128x128xf32>, vector<40x128xf32> -> vector<40x128xf32>
    %28 = arith.addf %23, %27 : vector<40x128xf32>
    %c8 = arith.constant 8 : index
    %c0_29 = arith.constant 0 : index
    %29 = vector.load %arg17[%c8, %c0_29] : memref<56x128xf32, #tpu.memory_space<vmem>>, vector<40x128xf32>
    %c4 = arith.constant 4 : index
    %c0_30 = arith.constant 0 : index
    %c0_31 = arith.constant 0 : index
    %30 = vector.load %arg4[%c4, %c0_30, %c0_31] : memref<9x128x128xf32, #tpu.memory_space<vmem>>, vector<1x128x128xf32>
    %31 = vector.shape_cast %30 : vector<1x128x128xf32> to vector<128x128xf32>
    %cst_32 = arith.constant dense<0.000000e+00> : vector<40x128xf32>
    %32 = tpu.matmul %29, %31, %cst_32 {dimension_numbers = #tpu.dot_dimension_numbers<[1], [0], [0], [1], [0, 0, 1, 1], [], []>} : vector<40x128xf32>, vector<128x128xf32>, vector<40x128xf32> -> vector<40x128xf32>
    %33 = arith.addf %28, %32 : vector<40x128xf32>
    %c9 = arith.constant 9 : index
    %c0_33 = arith.constant 0 : index
    %34 = vector.load %arg17[%c9, %c0_33] : memref<56x128xf32, #tpu.memory_space<vmem>>, vector<40x128xf32>
    %c5 = arith.constant 5 : index
    %c0_34 = arith.constant 0 : index
    %c0_35 = arith.constant 0 : index
    %35 = vector.load %arg4[%c5, %c0_34, %c0_35] : memref<9x128x128xf32, #tpu.memory_space<vmem>>, vector<1x128x128xf32>
    %36 = vector.shape_cast %35 : vector<1x128x128xf32> to vector<128x128xf32>
    %cst_36 = arith.constant dense<0.000000e+00> : vector<40x128xf32>
    %37 = tpu.matmul %34, %36, %cst_36 {dimension_numbers = #tpu.dot_dimension_numbers<[1], [0], [0], [1], [0, 0, 1, 1], [], []>} : vector<40x128xf32>, vector<128x128xf32>, vector<40x128xf32> -> vector<40x128xf32>
    %38 = arith.addf %33, %37 : vector<40x128xf32>
    %c14 = arith.constant 14 : index
    %c0_37 = arith.constant 0 : index
    %39 = vector.load %arg17[%c14, %c0_37] : memref<56x128xf32, #tpu.memory_space<vmem>>, vector<40x128xf32>
    %c6 = arith.constant 6 : index
    %c0_38 = arith.constant 0 : index
    %c0_39 = arith.constant 0 : index
    %40 = vector.load %arg4[%c6, %c0_38, %c0_39] : memref<9x128x128xf32, #tpu.memory_space<vmem>>, vector<1x128x128xf32>
    %41 = vector.shape_cast %40 : vector<1x128x128xf32> to vector<128x128xf32>
    %cst_40 = arith.constant dense<0.000000e+00> : vector<40x128xf32>
    %42 = tpu.matmul %39, %41, %cst_40 {dimension_numbers = #tpu.dot_dimension_numbers<[1], [0], [0], [1], [0, 0, 1, 1], [], []>} : vector<40x128xf32>, vector<128x128xf32>, vector<40x128xf32> -> vector<40x128xf32>
    %43 = arith.addf %38, %42 : vector<40x128xf32>
    %c15 = arith.constant 15 : index
    %c0_41 = arith.constant 0 : index
    %44 = vector.load %arg17[%c15, %c0_41] : memref<56x128xf32, #tpu.memory_space<vmem>>, vector<40x128xf32>
    %c7_42 = arith.constant 7 : index
    %c0_43 = arith.constant 0 : index
    %c0_44 = arith.constant 0 : index
    %45 = vector.load %arg4[%c7_42, %c0_43, %c0_44] : memref<9x128x128xf32, #tpu.memory_space<vmem>>, vector<1x128x128xf32>
    %46 = vector.shape_cast %45 : vector<1x128x128xf32> to vector<128x128xf32>
    %cst_45 = arith.constant dense<0.000000e+00> : vector<40x128xf32>
    %47 = tpu.matmul %44, %46, %cst_45 {dimension_numbers = #tpu.dot_dimension_numbers<[1], [0], [0], [1], [0, 0, 1, 1], [], []>} : vector<40x128xf32>, vector<128x128xf32>, vector<40x128xf32> -> vector<40x128xf32>
    %48 = arith.addf %43, %47 : vector<40x128xf32>
    %c16 = arith.constant 16 : index
    %c0_46 = arith.constant 0 : index
    %49 = vector.load %arg17[%c16, %c0_46] : memref<56x128xf32, #tpu.memory_space<vmem>>, vector<40x128xf32>
    %c8_47 = arith.constant 8 : index
    %c0_48 = arith.constant 0 : index
    %c0_49 = arith.constant 0 : index
    %50 = vector.load %arg4[%c8_47, %c0_48, %c0_49] : memref<9x128x128xf32, #tpu.memory_space<vmem>>, vector<1x128x128xf32>
    %51 = vector.shape_cast %50 : vector<1x128x128xf32> to vector<128x128xf32>
    %cst_50 = arith.constant dense<0.000000e+00> : vector<40x128xf32>
    %52 = tpu.matmul %49, %51, %cst_50 {dimension_numbers = #tpu.dot_dimension_numbers<[1], [0], [0], [1], [0, 0, 1, 1], [], []>} : vector<40x128xf32>, vector<128x128xf32>, vector<40x128xf32> -> vector<40x128xf32>
    %53 = arith.addf %48, %52 : vector<40x128xf32>
    %c0_51 = arith.constant 0 : index
    %c0_52 = arith.constant 0 : index
    %54 = vector.load %arg5[%c0_51, %c0_52] : memref<1x128xf32, #tpu.memory_space<vmem>>, vector<1x128xf32>
    %55 = vector.broadcast %54 : vector<1x128xf32> to vector<40x128xf32>
    %56 = arith.addf %53, %55 : vector<40x128xf32>
    %cst_53 = arith.constant 0.000000e+00 : f32
    %57 = vector.broadcast %cst_53 : f32 to vector<40x128xf32>
    %58 = arith.maximumf %56, %57 : vector<40x128xf32>
    %c0_54 = arith.constant 0 : index
    %c0_55 = arith.constant 0 : index
    %59 = vector.load %arg17[%c0_54, %c0_55] : memref<56x128xf32, #tpu.memory_space<vmem>>, vector<40x128xf32>
    tpu.vector_store %arg17[%c0_54, %c0_55], %58 {strides = array<i32>} : memref<56x128xf32, #tpu.memory_space<vmem>>, vector<40x128xf32>,
    %c0_56 = arith.constant 0 : index
    %c0_57 = arith.constant 0 : index
    %60 = vector.load %arg17[%c0_56, %c0_57] : memref<56x128xf32, #tpu.memory_space<vmem>>, vector<1x128xf32>
    %c0_58 = arith.constant 0 : index
    %c0_59 = arith.constant 0 : index
    %c0_60 = arith.constant 0 : index
    %61 = vector.load %arg6[%c0_58, %c0_59, %c0_60] : memref<25x128x128xf32, #tpu.memory_space<vmem>>, vector<1x128x128xf32>
    %62 = vector.shape_cast %61 : vector<1x128x128xf32> to vector<128x128xf32>
    %cst_61 = arith.constant dense<0.000000e+00> : vector<1x128xf32>
    %63 = tpu.matmul %60, %62, %cst_61 {dimension_numbers = #tpu.dot_dimension_numbers<[1], [0], [0], [1], [0, 0, 1, 1], [], []>} : vector<1x128xf32>, vector<128x128xf32>, vector<1x128xf32> -> vector<1x128xf32>
    %c1_62 = arith.constant 1 : index
    %c0_63 = arith.constant 0 : index
    %64 = vector.load %arg17[%c1_62, %c0_63] : memref<56x128xf32, #tpu.memory_space<vmem>>, vector<1x128xf32>
    %c1_64 = arith.constant 1 : index
    %c0_65 = arith.constant 0 : index
    %c0_66 = arith.constant 0 : index
    %65 = vector.load %arg6[%c1_64, %c0_65, %c0_66] : memref<25x128x128xf32, #tpu.memory_space<vmem>>, vector<1x128x128xf32>
    %66 = vector.shape_cast %65 : vector<1x128x128xf32> to vector<128x128xf32>
    %cst_67 = arith.constant dense<0.000000e+00> : vector<1x128xf32>
    %67 = tpu.matmul %64, %66, %cst_67 {dimension_numbers = #tpu.dot_dimension_numbers<[1], [0], [0], [1], [0, 0, 1, 1], [], []>} : vector<1x128xf32>, vector<128x128xf32>, vector<1x128xf32> -> vector<1x128xf32>
    %68 = arith.addf %63, %67 : vector<1x128xf32>
    %c2_68 = arith.constant 2 : index
    %c0_69 = arith.constant 0 : index
    %69 = vector.load %arg17[%c2_68, %c0_69] : memref<56x128xf32, #tpu.memory_space<vmem>>, vector<1x128xf32>
    %c2_70 = arith.constant 2 : index
    %c0_71 = arith.constant 0 : index
    %c0_72 = arith.constant 0 : index
    %70 = vector.load %arg6[%c2_70, %c0_71, %c0_72] : memref<25x128x128xf32, #tpu.memory_space<vmem>>, vector<1x128x128xf32>
    %71 = vector.shape_cast %70 : vector<1x128x128xf32> to vector<128x128xf32>
    %cst_73 = arith.constant dense<0.000000e+00> : vector<1x128xf32>
    %72 = tpu.matmul %69, %71, %cst_73 {dimension_numbers = #tpu.dot_dimension_numbers<[1], [0], [0], [1], [0, 0, 1, 1], [], []>} : vector<1x128xf32>, vector<128x128xf32>, vector<1x128xf32> -> vector<1x128xf32>
    %73 = arith.addf %68, %72 : vector<1x128xf32>
    %c3_74 = arith.constant 3 : index
    %c0_75 = arith.constant 0 : index
    %74 = vector.load %arg17[%c3_74, %c0_75] : memref<56x128xf32, #tpu.memory_space<vmem>>, vector<1x128xf32>
    %c3_76 = arith.constant 3 : index
    %c0_77 = arith.constant 0 : index
    %c0_78 = arith.constant 0 : index
    %75 = vector.load %arg6[%c3_76, %c0_77, %c0_78] : memref<25x128x128xf32, #tpu.memory_space<vmem>>, vector<1x128x128xf32>
    %76 = vector.shape_cast %75 : vector<1x128x128xf32> to vector<128x128xf32>
    %cst_79 = arith.constant dense<0.000000e+00> : vector<1x128xf32>
    %77 = tpu.matmul %74, %76, %cst_79 {dimension_numbers = #tpu.dot_dimension_numbers<[1], [0], [0], [1], [0, 0, 1, 1], [], []>} : vector<1x128xf32>, vector<128x128xf32>, vector<1x128xf32> -> vector<1x128xf32>
    %78 = arith.addf %73, %77 : vector<1x128xf32>
    %c4_80 = arith.constant 4 : index
    %c0_81 = arith.constant 0 : index
    %79 = vector.load %arg17[%c4_80, %c0_81] : memref<56x128xf32, #tpu.memory_space<vmem>>, vector<1x128xf32>
    %c4_82 = arith.constant 4 : index
    %c0_83 = arith.constant 0 : index
    %c0_84 = arith.constant 0 : index
    %80 = vector.load %arg6[%c4_82, %c0_83, %c0_84] : memref<25x128x128xf32, #tpu.memory_space<vmem>>, vector<1x128x128xf32>
    %81 = vector.shape_cast %80 : vector<1x128x128xf32> to vector<128x128xf32>
    %cst_85 = arith.constant dense<0.000000e+00> : vector<1x128xf32>
    %82 = tpu.matmul %79, %81, %cst_85 {dimension_numbers = #tpu.dot_dimension_numbers<[1], [0], [0], [1], [0, 0, 1, 1], [], []>} : vector<1x128xf32>, vector<128x128xf32>, vector<1x128xf32> -> vector<1x128xf32>
    %83 = arith.addf %78, %82 : vector<1x128xf32>
    %c7_86 = arith.constant 7 : index
    %c0_87 = arith.constant 0 : index
    %84 = vector.load %arg17[%c7_86, %c0_87] : memref<56x128xf32, #tpu.memory_space<vmem>>, vector<1x128xf32>
    %c5_88 = arith.constant 5 : index
    %c0_89 = arith.constant 0 : index
    %c0_90 = arith.constant 0 : index
    %85 = vector.load %arg6[%c5_88, %c0_89, %c0_90] : memref<25x128x128xf32, #tpu.memory_space<vmem>>, vector<1x128x128xf32>
    %86 = vector.shape_cast %85 : vector<1x128x128xf32> to vector<128x128xf32>
    %cst_91 = arith.constant dense<0.000000e+00> : vector<1x128xf32>
    %87 = tpu.matmul %84, %86, %cst_91 {dimension_numbers = #tpu.dot_dimension_numbers<[1], [0], [0], [1], [0, 0, 1, 1], [], []>} : vector<1x128xf32>, vector<128x128xf32>, vector<1x128xf32> -> vector<1x128xf32>
    %88 = arith.addf %83, %87 : vector<1x128xf32>
    %c8_92 = arith.constant 8 : index
    %c0_93 = arith.constant 0 : index
    %89 = vector.load %arg17[%c8_92, %c0_93] : memref<56x128xf32, #tpu.memory_space<vmem>>, vector<1x128xf32>
    %c6_94 = arith.constant 6 : index
    %c0_95 = arith.constant 0 : index
    %c0_96 = arith.constant 0 : index
    %90 = vector.load %arg6[%c6_94, %c0_95, %c0_96] : memref<25x128x128xf32, #tpu.memory_space<vmem>>, vector<1x128x128xf32>
    %91 = vector.shape_cast %90 : vector<1x128x128xf32> to vector<128x128xf32>
    %cst_97 = arith.constant dense<0.000000e+00> : vector<1x128xf32>
    %92 = tpu.matmul %89, %91, %cst_97 {dimension_numbers = #tpu.dot_dimension_numbers<[1], [0], [0], [1], [0, 0, 1, 1], [], []>} : vector<1x128xf32>, vector<128x128xf32>, vector<1x128xf32> -> vector<1x128xf32>
    %93 = arith.addf %88, %92 : vector<1x128xf32>
    %c9_98 = arith.constant 9 : index
    %c0_99 = arith.constant 0 : index
    %94 = vector.load %arg17[%c9_98, %c0_99] : memref<56x128xf32, #tpu.memory_space<vmem>>, vector<1x128xf32>
    %c7_100 = arith.constant 7 : index
    %c0_101 = arith.constant 0 : index
    %c0_102 = arith.constant 0 : index
    %95 = vector.load %arg6[%c7_100, %c0_101, %c0_102] : memref<25x128x128xf32, #tpu.memory_space<vmem>>, vector<1x128x128xf32>
    %96 = vector.shape_cast %95 : vector<1x128x128xf32> to vector<128x128xf32>
    %cst_103 = arith.constant dense<0.000000e+00> : vector<1x128xf32>
    %97 = tpu.matmul %94, %96, %cst_103 {dimension_numbers = #tpu.dot_dimension_numbers<[1], [0], [0], [1], [0, 0, 1, 1], [], []>} : vector<1x128xf32>, vector<128x128xf32>, vector<1x128xf32> -> vector<1x128xf32>
    %98 = arith.addf %93, %97 : vector<1x128xf32>
    %c10 = arith.constant 10 : index
    %c0_104 = arith.constant 0 : index
    %99 = vector.load %arg17[%c10, %c0_104] : memref<56x128xf32, #tpu.memory_space<vmem>>, vector<1x128xf32>
    %c8_105 = arith.constant 8 : index
    %c0_106 = arith.constant 0 : index
    %c0_107 = arith.constant 0 : index
    %100 = vector.load %arg6[%c8_105, %c0_106, %c0_107] : memref<25x128x128xf32, #tpu.memory_space<vmem>>, vector<1x128x128xf32>
    %101 = vector.shape_cast %100 : vector<1x128x128xf32> to vector<128x128xf32>
    %cst_108 = arith.constant dense<0.000000e+00> : vector<1x128xf32>
    %102 = tpu.matmul %99, %101, %cst_108 {dimension_numbers = #tpu.dot_dimension_numbers<[1], [0], [0], [1], [0, 0, 1, 1], [], []>} : vector<1x128xf32>, vector<128x128xf32>, vector<1x128xf32> -> vector<1x128xf32>
    %103 = arith.addf %98, %102 : vector<1x128xf32>
    %c11 = arith.constant 11 : index
    %c0_109 = arith.constant 0 : index
    %104 = vector.load %arg17[%c11, %c0_109] : memref<56x128xf32, #tpu.memory_space<vmem>>, vector<1x128xf32>
    %c9_110 = arith.constant 9 : index
    %c0_111 = arith.constant 0 : index
    %c0_112 = arith.constant 0 : index
    %105 = vector.load %arg6[%c9_110, %c0_111, %c0_112] : memref<25x128x128xf32, #tpu.memory_space<vmem>>, vector<1x128x128xf32>
    %106 = vector.shape_cast %105 : vector<1x128x128xf32> to vector<128x128xf32>
    %cst_113 = arith.constant dense<0.000000e+00> : vector<1x128xf32>
    %107 = tpu.matmul %104, %106, %cst_113 {dimension_numbers = #tpu.dot_dimension_numbers<[1], [0], [0], [1], [0, 0, 1, 1], [], []>} : vector<1x128xf32>, vector<128x128xf32>, vector<1x128xf32> -> vector<1x128xf32>
    %108 = arith.addf %103, %107 : vector<1x128xf32>
    %c14_114 = arith.constant 14 : index
    %c0_115 = arith.constant 0 : index
    %109 = vector.load %arg17[%c14_114, %c0_115] : memref<56x128xf32, #tpu.memory_space<vmem>>, vector<1x128xf32>
    %c10_116 = arith.constant 10 : index
    %c0_117 = arith.constant 0 : index
    %c0_118 = arith.constant 0 : index
    %110 = vector.load %arg6[%c10_116, %c0_117, %c0_118] : memref<25x128x128xf32, #tpu.memory_space<vmem>>, vector<1x128x128xf32>
    %111 = vector.shape_cast %110 : vector<1x128x128xf32> to vector<128x128xf32>
    %cst_119 = arith.constant dense<0.000000e+00> : vector<1x128xf32>
    %112 = tpu.matmul %109, %111, %cst_119 {dimension_numbers = #tpu.dot_dimension_numbers<[1], [0], [0], [1], [0, 0, 1, 1], [], []>} : vector<1x128xf32>, vector<128x128xf32>, vector<1x128xf32> -> vector<1x128xf32>
    %113 = arith.addf %108, %112 : vector<1x128xf32>
    %c15_120 = arith.constant 15 : index
    %c0_121 = arith.constant 0 : index
    %114 = vector.load %arg17[%c15_120, %c0_121] : memref<56x128xf32, #tpu.memory_space<vmem>>, vector<1x128xf32>
    %c11_122 = arith.constant 11 : index
    %c0_123 = arith.constant 0 : index
    %c0_124 = arith.constant 0 : index
    %115 = vector.load %arg6[%c11_122, %c0_123, %c0_124] : memref<25x128x128xf32, #tpu.memory_space<vmem>>, vector<1x128x128xf32>
    %116 = vector.shape_cast %115 : vector<1x128x128xf32> to vector<128x128xf32>
    %cst_125 = arith.constant dense<0.000000e+00> : vector<1x128xf32>
    %117 = tpu.matmul %114, %116, %cst_125 {dimension_numbers = #tpu.dot_dimension_numbers<[1], [0], [0], [1], [0, 0, 1, 1], [], []>} : vector<1x128xf32>, vector<128x128xf32>, vector<1x128xf32> -> vector<1x128xf32>
    %118 = arith.addf %113, %117 : vector<1x128xf32>
    %c16_126 = arith.constant 16 : index
    %c0_127 = arith.constant 0 : index
    %119 = vector.load %arg17[%c16_126, %c0_127] : memref<56x128xf32, #tpu.memory_space<vmem>>, vector<1x128xf32>
    %c12 = arith.constant 12 : index
    %c0_128 = arith.constant 0 : index
    %c0_129 = arith.constant 0 : index
    %120 = vector.load %arg6[%c12, %c0_128, %c0_129] : memref<25x128x128xf32, #tpu.memory_space<vmem>>, vector<1x128x128xf32>
    %121 = vector.shape_cast %120 : vector<1x128x128xf32> to vector<128x128xf32>
    %cst_130 = arith.constant dense<0.000000e+00> : vector<1x128xf32>
    %122 = tpu.matmul %119, %121, %cst_130 {dimension_numbers = #tpu.dot_dimension_numbers<[1], [0], [0], [1], [0, 0, 1, 1], [], []>} : vector<1x128xf32>, vector<128x128xf32>, vector<1x128xf32> -> vector<1x128xf32>
    %123 = arith.addf %118, %122 : vector<1x128xf32>
    %c17 = arith.constant 17 : index
    %c0_131 = arith.constant 0 : index
    %124 = vector.load %arg17[%c17, %c0_131] : memref<56x128xf32, #tpu.memory_space<vmem>>, vector<1x128xf32>
    %c13 = arith.constant 13 : index
    %c0_132 = arith.constant 0 : index
    %c0_133 = arith.constant 0 : index
    %125 = vector.load %arg6[%c13, %c0_132, %c0_133] : memref<25x128x128xf32, #tpu.memory_space<vmem>>, vector<1x128x128xf32>
    %126 = vector.shape_cast %125 : vector<1x128x128xf32> to vector<128x128xf32>
    %cst_134 = arith.constant dense<0.000000e+00> : vector<1x128xf32>
    %127 = tpu.matmul %124, %126, %cst_134 {dimension_numbers = #tpu.dot_dimension_numbers<[1], [0], [0], [1], [0, 0, 1, 1], [], []>} : vector<1x128xf32>, vector<128x128xf32>, vector<1x128xf32> -> vector<1x128xf32>
    %128 = arith.addf %123, %127 : vector<1x128xf32>
    %c18 = arith.constant 18 : index
    %c0_135 = arith.constant 0 : index
    %129 = vector.load %arg17[%c18, %c0_135] : memref<56x128xf32, #tpu.memory_space<vmem>>, vector<1x128xf32>
    %c14_136 = arith.constant 14 : index
    %c0_137 = arith.constant 0 : index
    %c0_138 = arith.constant 0 : index
    %130 = vector.load %arg6[%c14_136, %c0_137, %c0_138] : memref<25x128x128xf32, #tpu.memory_space<vmem>>, vector<1x128x128xf32>
    %131 = vector.shape_cast %130 : vector<1x128x128xf32> to vector<128x128xf32>
    %cst_139 = arith.constant dense<0.000000e+00> : vector<1x128xf32>
    %132 = tpu.matmul %129, %131, %cst_139 {dimension_numbers = #tpu.dot_dimension_numbers<[1], [0], [0], [1], [0, 0, 1, 1], [], []>} : vector<1x128xf32>, vector<128x128xf32>, vector<1x128xf32> -> vector<1x128xf32>
    %133 = arith.addf %128, %132 : vector<1x128xf32>
    %c21 = arith.constant 21 : index
    %c0_140 = arith.constant 0 : index
    %134 = vector.load %arg17[%c21, %c0_140] : memref<56x128xf32, #tpu.memory_space<vmem>>, vector<1x128xf32>
    %c15_141 = arith.constant 15 : index
    %c0_142 = arith.constant 0 : index
    %c0_143 = arith.constant 0 : index
    %135 = vector.load %arg6[%c15_141, %c0_142, %c0_143] : memref<25x128x128xf32, #tpu.memory_space<vmem>>, vector<1x128x128xf32>
    %136 = vector.shape_cast %135 : vector<1x128x128xf32> to vector<128x128xf32>
    %cst_144 = arith.constant dense<0.000000e+00> : vector<1x128xf32>
    %137 = tpu.matmul %134, %136, %cst_144 {dimension_numbers = #tpu.dot_dimension_numbers<[1], [0], [0], [1], [0, 0, 1, 1], [], []>} : vector<1x128xf32>, vector<128x128xf32>, vector<1x128xf32> -> vector<1x128xf32>
    %138 = arith.addf %133, %137 : vector<1x128xf32>
    %c22 = arith.constant 22 : index
    %c0_145 = arith.constant 0 : index
    %139 = vector.load %arg17[%c22, %c0_145] : memref<56x128xf32, #tpu.memory_space<vmem>>, vector<1x128xf32>
    %c16_146 = arith.constant 16 : index
    %c0_147 = arith.constant 0 : index
    %c0_148 = arith.constant 0 : index
    %140 = vector.load %arg6[%c16_146, %c0_147, %c0_148] : memref<25x128x128xf32, #tpu.memory_space<vmem>>, vector<1x128x128xf32>
    %141 = vector.shape_cast %140 : vector<1x128x128xf32> to vector<128x128xf32>
    %cst_149 = arith.constant dense<0.000000e+00> : vector<1x128xf32>
    %142 = tpu.matmul %139, %141, %cst_149 {dimension_numbers = #tpu.dot_dimension_numbers<[1], [0], [0], [1], [0, 0, 1, 1], [], []>} : vector<1x128xf32>, vector<128x128xf32>, vector<1x128xf32> -> vector<1x128xf32>
    %143 = arith.addf %138, %142 : vector<1x128xf32>
    %c23 = arith.constant 23 : index
    %c0_150 = arith.constant 0 : index
    %144 = vector.load %arg17[%c23, %c0_150] : memref<56x128xf32, #tpu.memory_space<vmem>>, vector<1x128xf32>
    %c17_151 = arith.constant 17 : index
    %c0_152 = arith.constant 0 : index
    %c0_153 = arith.constant 0 : index
    %145 = vector.load %arg6[%c17_151, %c0_152, %c0_153] : memref<25x128x128xf32, #tpu.memory_space<vmem>>, vector<1x128x128xf32>
    %146 = vector.shape_cast %145 : vector<1x128x128xf32> to vector<128x128xf32>
    %cst_154 = arith.constant dense<0.000000e+00> : vector<1x128xf32>
    %147 = tpu.matmul %144, %146, %cst_154 {dimension_numbers = #tpu.dot_dimension_numbers<[1], [0], [0], [1], [0, 0, 1, 1], [], []>} : vector<1x128xf32>, vector<128x128xf32>, vector<1x128xf32> -> vector<1x128xf32>
    %148 = arith.addf %143, %147 : vector<1x128xf32>
    %c24 = arith.constant 24 : index
    %c0_155 = arith.constant 0 : index
    %149 = vector.load %arg17[%c24, %c0_155] : memref<56x128xf32, #tpu.memory_space<vmem>>, vector<1x128xf32>
    %c18_156 = arith.constant 18 : index
    %c0_157 = arith.constant 0 : index
    %c0_158 = arith.constant 0 : index
    %150 = vector.load %arg6[%c18_156, %c0_157, %c0_158] : memref<25x128x128xf32, #tpu.memory_space<vmem>>, vector<1x128x128xf32>
    %151 = vector.shape_cast %150 : vector<1x128x128xf32> to vector<128x128xf32>
    %cst_159 = arith.constant dense<0.000000e+00> : vector<1x128xf32>
    %152 = tpu.matmul %149, %151, %cst_159 {dimension_numbers = #tpu.dot_dimension_numbers<[1], [0], [0], [1], [0, 0, 1, 1], [], []>} : vector<1x128xf32>, vector<128x128xf32>, vector<1x128xf32> -> vector<1x128xf32>
    %153 = arith.addf %148, %152 : vector<1x128xf32>
    %c25 = arith.constant 25 : index
    %c0_160 = arith.constant 0 : index
    %154 = vector.load %arg17[%c25, %c0_160] : memref<56x128xf32, #tpu.memory_space<vmem>>, vector<1x128xf32>
    %c19 = arith.constant 19 : index
    %c0_161 = arith.constant 0 : index
    %c0_162 = arith.constant 0 : index
    %155 = vector.load %arg6[%c19, %c0_161, %c0_162] : memref<25x128x128xf32, #tpu.memory_space<vmem>>, vector<1x128x128xf32>
    %156 = vector.shape_cast %155 : vector<1x128x128xf32> to vector<128x128xf32>
    %cst_163 = arith.constant dense<0.000000e+00> : vector<1x128xf32>
    %157 = tpu.matmul %154, %156, %cst_163 {dimension_numbers = #tpu.dot_dimension_numbers<[1], [0], [0], [1], [0, 0, 1, 1], [], []>} : vector<1x128xf32>, vector<128x128xf32>, vector<1x128xf32> -> vector<1x128xf32>
    %158 = arith.addf %153, %157 : vector<1x128xf32>
    %c28 = arith.constant 28 : index
    %c0_164 = arith.constant 0 : index
    %159 = vector.load %arg17[%c28, %c0_164] : memref<56x128xf32, #tpu.memory_space<vmem>>, vector<1x128xf32>
    %c20 = arith.constant 20 : index
    %c0_165 = arith.constant 0 : index
    %c0_166 = arith.constant 0 : index
    %160 = vector.load %arg6[%c20, %c0_165, %c0_166] : memref<25x128x128xf32, #tpu.memory_space<vmem>>, vector<1x128x128xf32>
    %161 = vector.shape_cast %160 : vector<1x128x128xf32> to vector<128x128xf32>
    %cst_167 = arith.constant dense<0.000000e+00> : vector<1x128xf32>
    %162 = tpu.matmul %159, %161, %cst_167 {dimension_numbers = #tpu.dot_dimension_numbers<[1], [0], [0], [1], [0, 0, 1, 1], [], []>} : vector<1x128xf32>, vector<128x128xf32>, vector<1x128xf32> -> vector<1x128xf32>
    %163 = arith.addf %158, %162 : vector<1x128xf32>
    %c29 = arith.constant 29 : index
    %c0_168 = arith.constant 0 : index
    %164 = vector.load %arg17[%c29, %c0_168] : memref<56x128xf32, #tpu.memory_space<vmem>>, vector<1x128xf32>
    %c21_169 = arith.constant 21 : index
    %c0_170 = arith.constant 0 : index
    %c0_171 = arith.constant 0 : index
    %165 = vector.load %arg6[%c21_169, %c0_170, %c0_171] : memref<25x128x128xf32, #tpu.memory_space<vmem>>, vector<1x128x128xf32>
    %166 = vector.shape_cast %165 : vector<1x128x128xf32> to vector<128x128xf32>
    %cst_172 = arith.constant dense<0.000000e+00> : vector<1x128xf32>
    %167 = tpu.matmul %164, %166, %cst_172 {dimension_numbers = #tpu.dot_dimension_numbers<[1], [0], [0], [1], [0, 0, 1, 1], [], []>} : vector<1x128xf32>, vector<128x128xf32>, vector<1x128xf32> -> vector<1x128xf32>
    %168 = arith.addf %163, %167 : vector<1x128xf32>
    %c30 = arith.constant 30 : index
    %c0_173 = arith.constant 0 : index
    %169 = vector.load %arg17[%c30, %c0_173] : memref<56x128xf32, #tpu.memory_space<vmem>>, vector<1x128xf32>
    %c22_174 = arith.constant 22 : index
    %c0_175 = arith.constant 0 : index
    %c0_176 = arith.constant 0 : index
    %170 = vector.load %arg6[%c22_174, %c0_175, %c0_176] : memref<25x128x128xf32, #tpu.memory_space<vmem>>, vector<1x128x128xf32>
    %171 = vector.shape_cast %170 : vector<1x128x128xf32> to vector<128x128xf32>
    %cst_177 = arith.constant dense<0.000000e+00> : vector<1x128xf32>
    %172 = tpu.matmul %169, %171, %cst_177 {dimension_numbers = #tpu.dot_dimension_numbers<[1], [0], [0], [1], [0, 0, 1, 1], [], []>} : vector<1x128xf32>, vector<128x128xf32>, vector<1x128xf32> -> vector<1x128xf32>
    %173 = arith.addf %168, %172 : vector<1x128xf32>
    %c31 = arith.constant 31 : index
    %c0_178 = arith.constant 0 : index
    %174 = vector.load %arg17[%c31, %c0_178] : memref<56x128xf32, #tpu.memory_space<vmem>>, vector<1x128xf32>
    %c23_179 = arith.constant 23 : index
    %c0_180 = arith.constant 0 : index
    %c0_181 = arith.constant 0 : index
    %175 = vector.load %arg6[%c23_179, %c0_180, %c0_181] : memref<25x128x128xf32, #tpu.memory_space<vmem>>, vector<1x128x128xf32>
    %176 = vector.shape_cast %175 : vector<1x128x128xf32> to vector<128x128xf32>
    %cst_182 = arith.constant dense<0.000000e+00> : vector<1x128xf32>
    %177 = tpu.matmul %174, %176, %cst_182 {dimension_numbers = #tpu.dot_dimension_numbers<[1], [0], [0], [1], [0, 0, 1, 1], [], []>} : vector<1x128xf32>, vector<128x128xf32>, vector<1x128xf32> -> vector<1x128xf32>
    %178 = arith.addf %173, %177 : vector<1x128xf32>
    %c32 = arith.constant 32 : index
    %c0_183 = arith.constant 0 : index
    %179 = vector.load %arg17[%c32, %c0_183] : memref<56x128xf32, #tpu.memory_space<vmem>>, vector<1x128xf32>
    %c24_184 = arith.constant 24 : index
    %c0_185 = arith.constant 0 : index
    %c0_186 = arith.constant 0 : index
    %180 = vector.load %arg6[%c24_184, %c0_185, %c0_186] : memref<25x128x128xf32, #tpu.memory_space<vmem>>, vector<1x128x128xf32>
    %181 = vector.shape_cast %180 : vector<1x128x128xf32> to vector<128x128xf32>
    %cst_187 = arith.constant dense<0.000000e+00> : vector<1x128xf32>
    %182 = tpu.matmul %179, %181, %cst_187 {dimension_numbers = #tpu.dot_dimension_numbers<[1], [0], [0], [1], [0, 0, 1, 1], [], []>} : vector<1x128xf32>, vector<128x128xf32>, vector<1x128xf32> -> vector<1x128xf32>
    %183 = arith.addf %178, %182 : vector<1x128xf32>
    %c0_188 = arith.constant 0 : index
    %c0_189 = arith.constant 0 : index
    %184 = vector.load %arg7[%c0_188, %c0_189] : memref<1x128xf32, #tpu.memory_space<vmem>>, vector<1x128xf32>
    %185 = arith.addf %183, %184 : vector<1x128xf32>
    %186 = tpu.iota {dimensions = array<i32: 1>} : vector<1x128xi32>
    %c32_i32 = arith.constant 32 : i32
    %187 = vector.broadcast %c32_i32 : i32 to vector<1x128xi32>
    %188 = arith.cmpi slt, %186, %187 : vector<1x128xi32>
    %189 = arith.extui %188 : vector<1x128xi1> to vector<1x128xi32>
    %190 = arith.sitofp %189 : vector<1x128xi32> to vector<1x128xf32>
    %cst_190 = arith.constant dense<0.000000e+00> : vector<1xf32>
    %191 = vector.multi_reduction <add>, %185, %cst_190 [1] : vector<1x128xf32> to vector<1xf32>
    %192 = vector.shape_cast %191 : vector<1xf32> to vector<1x1xf32>
    %cst_191 = arith.constant 3.125000e-02 : f32
    %193 = vector.broadcast %cst_191 : f32 to vector<1x1xf32>
    %194 = arith.mulf %192, %193 : vector<1x1xf32>
    %195 = vector.broadcast %194 : vector<1x1xf32> to vector<1x128xf32>
    %196 = arith.subf %185, %195 : vector<1x128xf32>
    %197 = arith.mulf %196, %190 : vector<1x128xf32>
    %198 = arith.mulf %197, %197 : vector<1x128xf32>
    %cst_192 = arith.constant dense<0.000000e+00> : vector<1xf32>
    %199 = vector.multi_reduction <add>, %198, %cst_192 [1] : vector<1x128xf32> to vector<1xf32>
    %200 = vector.shape_cast %199 : vector<1xf32> to vector<1x1xf32>
    %cst_193 = arith.constant 3.125000e-02 : f32
    %201 = vector.broadcast %cst_193 : f32 to vector<1x1xf32>
    %202 = arith.mulf %200, %201 : vector<1x1xf32>
    %cst_194 = arith.constant 9.99999974E-6 : f32
    %203 = vector.broadcast %cst_194 : f32 to vector<1x1xf32>
    %204 = arith.addf %202, %203 : vector<1x1xf32>
    %205 = math.rsqrt %204 : vector<1x1xf32>
    %206 = vector.broadcast %205 : vector<1x1xf32> to vector<1x128xf32>
    %207 = arith.mulf %197, %206 : vector<1x128xf32>
    %c0_195 = arith.constant 0 : index
    %c0_196 = arith.constant 0 : index
    %208 = vector.load %arg8[%c0_195, %c0_196] : memref<1x128xf32, #tpu.memory_space<vmem>>, vector<1x128xf32>
    %209 = arith.mulf %207, %208 : vector<1x128xf32>
    %c0_197 = arith.constant 0 : index
    %c0_198 = arith.constant 0 : index
    %210 = vector.load %arg9[%c0_197, %c0_198] : memref<1x128xf32, #tpu.memory_space<vmem>>, vector<1x128xf32>
    %211 = arith.addf %209, %210 : vector<1x128xf32>
    %212 = math.tanh %211 : vector<1x128xf32>
    %c0_199 = arith.constant 0 : index
    %c0_200 = arith.constant 0 : index
    %213 = vector.load %arg10[%c0_199, %c0_200] : memref<128x128xf32, #tpu.memory_space<vmem>>, vector<128x128xf32>
    %cst_201 = arith.constant dense<0.000000e+00> : vector<1x128xf32>
    %214 = tpu.matmul %212, %213, %cst_201 {dimension_numbers = #tpu.dot_dimension_numbers<[1], [0], [0], [1], [0, 0, 1, 1], [], []>} : vector<1x128xf32>, vector<128x128xf32>, vector<1x128xf32> -> vector<1x128xf32>
    %c0_202 = arith.constant 0 : index
    %c0_203 = arith.constant 0 : index
    %215 = vector.load %arg11[%c0_202, %c0_203] : memref<1x128xf32, #tpu.memory_space<vmem>>, vector<1x128xf32>
    %216 = arith.addf %214, %215 : vector<1x128xf32>
    %cst_204 = arith.constant 0.000000e+00 : f32
    %217 = vector.broadcast %cst_204 : f32 to vector<1x128xf32>
    %218 = arith.maximumf %216, %217 : vector<1x128xf32>
    %c0_205 = arith.constant 0 : index
    %c0_206 = arith.constant 0 : index
    %219 = vector.load %arg12[%c0_205, %c0_206] : memref<128x128xf32, #tpu.memory_space<vmem>>, vector<128x128xf32>
    %cst_207 = arith.constant dense<0.000000e+00> : vector<1x128xf32>
    %220 = tpu.matmul %218, %219, %cst_207 {dimension_numbers = #tpu.dot_dimension_numbers<[1], [0], [0], [1], [0, 0, 1, 1], [], []>} : vector<1x128xf32>, vector<128x128xf32>, vector<1x128xf32> -> vector<1x128xf32>
    %c0_208 = arith.constant 0 : index
    %c0_209 = arith.constant 0 : index
    %221 = vector.load %arg13[%c0_208, %c0_209] : memref<1x128xf32, #tpu.memory_space<vmem>>, vector<1x128xf32>
    %222 = arith.addf %220, %221 : vector<1x128xf32>
    %cst_210 = arith.constant 0.000000e+00 : f32
    %223 = vector.broadcast %cst_210 : f32 to vector<1x128xf32>
    %224 = arith.maximumf %222, %223 : vector<1x128xf32>
    %c0_211 = arith.constant 0 : index
    %c0_212 = arith.constant 0 : index
    %225 = vector.load %arg14[%c0_211, %c0_212] : memref<128x128xf32, #tpu.memory_space<vmem>>, vector<128x128xf32>
    %cst_213 = arith.constant dense<0.000000e+00> : vector<1x128xf32>
    %226 = tpu.matmul %224, %225, %cst_213 {dimension_numbers = #tpu.dot_dimension_numbers<[1], [0], [0], [1], [0, 0, 1, 1], [], []>} : vector<1x128xf32>, vector<128x128xf32>, vector<1x128xf32> -> vector<1x128xf32>
    %c0_214 = arith.constant 0 : index
    %c0_215 = arith.constant 0 : index
    %227 = vector.load %arg15[%c0_214, %c0_215] : memref<1x128xf32, #tpu.memory_space<vmem>>, vector<1x128xf32>
    %228 = arith.addf %226, %227 : vector<1x128xf32>
    %229 = math.tanh %228 : vector<1x128xf32>
    %cst_216 = arith.constant 1.000000e+00 : f32
    %230 = vector.broadcast %cst_216 : f32 to vector<1x128xf32>
    %231 = arith.addf %229, %230 : vector<1x128xf32>
    %cst_217 = arith.constant 6.000000e+00 : f32
    %232 = vector.broadcast %cst_217 : f32 to vector<1x128xf32>
    %233 = arith.mulf %232, %231 : vector<1x128xf32>
    %cst_218 = arith.constant -1.000000e+01 : f32
    %234 = vector.broadcast %cst_218 : f32 to vector<1x128xf32>
    %235 = arith.addf %234, %233 : vector<1x128xf32>
    %236 = math.exp %235 : vector<1x128xf32>
    %237 = tpu.iota {dimensions = array<i32: 1>} : vector<1x128xi32>
    %c4_i32 = arith.constant 4 : i32
    %238 = vector.broadcast %c4_i32 : i32 to vector<1x128xi32>
    %239 = arith.cmpi slt, %237, %238 : vector<1x128xi32>
    %c8_i32 = arith.constant 8 : i32
    %240 = vector.broadcast %c8_i32 : i32 to vector<1x128xi32>
    %241 = arith.cmpi slt, %237, %240 : vector<1x128xi32>
    %cst_219 = arith.constant 0.000000e+00 : f32
    %242 = vector.broadcast %cst_219 : f32 to vector<1x128xf32>
    %243 = arith.select %241, %236, %242 : vector<1x128xi1>, vector<1x128xf32>
    %244 = arith.select %239, %228, %243 : vector<1x128xi1>, vector<1x128xf32>
    %c0_220 = arith.constant 0 : index
    %c0_221 = arith.constant 0 : index
    %c0_222 = arith.constant 0 : index
    %245 = vector.load %arg16[%c0_220, %c0_221, %c0_222] : memref<1x1x128xf32, #tpu.memory_space<vmem>>, vector<1x1x128xf32>
    %246 = vector.shape_cast %245 : vector<1x1x128xf32> to vector<1x128xf32>
    %247 = vector.shape_cast %244 : vector<1x128xf32> to vector<1x1x128xf32>
    tpu.vector_store %arg16[%c0_220, %c0_221, %c0_222], %247 {strides = array<i32>} : memref<1x1x128xf32, #tpu.memory_space<vmem>>, vector<1x1x128xf32>,
    return
  }
  func.func @transform_0(%arg0: i32) -> (i32, i32, i32) {
    %c0_i32 = arith.constant 0 : i32
    %c0_i32_0 = arith.constant 0 : i32
    %c0_i32_1 = arith.constant 0 : i32
    return %arg0, %c0_i32, %c0_i32_0 : i32, i32, i32
  }
  func.func @transform_1(%arg0: i32) -> (i32, i32) {
    %c0_i32 = arith.constant 0 : i32
    %c0_i32_0 = arith.constant 0 : i32
    %c0_i32_1 = arith.constant 0 : i32
    return %c0_i32, %c0_i32_0 : i32, i32
  }
  func.func @transform_2(%arg0: i32) -> (i32, i32) {
    %c0_i32 = arith.constant 0 : i32
    %c0_i32_0 = arith.constant 0 : i32
    %c0_i32_1 = arith.constant 0 : i32
    return %c0_i32, %c0_i32_0 : i32, i32
  }
  func.func @transform_3(%arg0: i32) -> (i32, i32, i32) {
    %c0_i32 = arith.constant 0 : i32
    %c0_i32_0 = arith.constant 0 : i32
    %c0_i32_1 = arith.constant 0 : i32
    %c0_i32_2 = arith.constant 0 : i32
    return %c0_i32, %c0_i32_0, %c0_i32_1 : i32, i32, i32
  }
  func.func @transform_4(%arg0: i32) -> (i32, i32) {
    %c0_i32 = arith.constant 0 : i32
    %c0_i32_0 = arith.constant 0 : i32
    %c0_i32_1 = arith.constant 0 : i32
    return %c0_i32, %c0_i32_0 : i32, i32
  }
  func.func @transform_5(%arg0: i32) -> (i32, i32, i32) {
    %c0_i32 = arith.constant 0 : i32
    %c0_i32_0 = arith.constant 0 : i32
    %c0_i32_1 = arith.constant 0 : i32
    %c0_i32_2 = arith.constant 0 : i32
    return %c0_i32, %c0_i32_0, %c0_i32_1 : i32, i32, i32
  }
  func.func @transform_6(%arg0: i32) -> (i32, i32) {
    %c0_i32 = arith.constant 0 : i32
    %c0_i32_0 = arith.constant 0 : i32
    %c0_i32_1 = arith.constant 0 : i32
    return %c0_i32, %c0_i32_0 : i32, i32
  }
  func.func @transform_7(%arg0: i32) -> (i32, i32) {
    %c0_i32 = arith.constant 0 : i32
    %c0_i32_0 = arith.constant 0 : i32
    %c0_i32_1 = arith.constant 0 : i32
    return %c0_i32, %c0_i32_0 : i32, i32
  }
  func.func @transform_8(%arg0: i32) -> (i32, i32) {
    %c0_i32 = arith.constant 0 : i32
    %c0_i32_0 = arith.constant 0 : i32
    %c0_i32_1 = arith.constant 0 : i32
    return %c0_i32, %c0_i32_0 : i32, i32
  }
  func.func @transform_9(%arg0: i32) -> (i32, i32) {
    %c0_i32 = arith.constant 0 : i32
    %c0_i32_0 = arith.constant 0 : i32
    %c0_i32_1 = arith.constant 0 : i32
    return %c0_i32, %c0_i32_0 : i32, i32
  }
  func.func @transform_10(%arg0: i32) -> (i32, i32) {
    %c0_i32 = arith.constant 0 : i32
    %c0_i32_0 = arith.constant 0 : i32
    %c0_i32_1 = arith.constant 0 : i32
    return %c0_i32, %c0_i32_0 : i32, i32
  }
  func.func @transform_11(%arg0: i32) -> (i32, i32) {
    %c0_i32 = arith.constant 0 : i32
    %c0_i32_0 = arith.constant 0 : i32
    %c0_i32_1 = arith.constant 0 : i32
    return %c0_i32, %c0_i32_0 : i32, i32
  }
  func.func @transform_12(%arg0: i32) -> (i32, i32) {
    %c0_i32 = arith.constant 0 : i32
    %c0_i32_0 = arith.constant 0 : i32
    %c0_i32_1 = arith.constant 0 : i32
    return %c0_i32, %c0_i32_0 : i32, i32
  }
  func.func @transform_13(%arg0: i32) -> (i32, i32) {
    %c0_i32 = arith.constant 0 : i32
    %c0_i32_0 = arith.constant 0 : i32
    %c0_i32_1 = arith.constant 0 : i32
    return %c0_i32, %c0_i32_0 : i32, i32
  }
  func.func @transform_14(%arg0: i32) -> (i32, i32) {
    %c0_i32 = arith.constant 0 : i32
    %c0_i32_0 = arith.constant 0 : i32
    %c0_i32_1 = arith.constant 0 : i32
    return %c0_i32, %c0_i32_0 : i32, i32
  }
  func.func @transform_15(%arg0: i32) -> (i32, i32, i32) {
    %c0_i32 = arith.constant 0 : i32
    %c0_i32_0 = arith.constant 0 : i32
    %c0_i32_1 = arith.constant 0 : i32
    return %arg0, %c0_i32, %c0_i32_0 : i32, i32, i32
  }
}

</mosaic_0001>

<bundles_post_ra>
// kernel: _forward_impl.1
= control target key start
LH: loop header
LB: loop body
LE: loop exit
PB: predicated region body
PF: predicated region fallthrough
CT: control target
= control target key end

     0   :  { %s5037_s0 = inlined_call_operand.vmem [shape: f32[2,56,128], index: 0, kind: input, shape index: {}]   ;;  %s5038_s1 = inlined_call_operand.vmem [shape: f32[128,128], index: 1, kind: input, shape index: {}]   ;;  %s5039_s2 = inlined_call_operand.vmem [shape: f32[1,128], index: 2, kind: input, shape index: {}]   ;;  %s5040_s3 = inlined_call_operand.vmem [shape: f32[9,128,128], index: 3, kind: input, shape index: {}]   ;;  %s5041_s4 = inlined_call_operand.vmem [shape: f32[1,128], index: 4, kind: input, shape index: {}]   ;;  %s5042_s5 = inlined_call_operand.vmem [shape: f32[25,128,128], index: 5, kind: input, shape index: {}]   ;;  %s5043_s6 = inlined_call_operand.vmem [shape: f32[1,128], index: 6, kind: input, shape index: {}]   ;;  %s5044_s7 = inlined_call_operand.vmem [shape: f32[1,128], index: 7, kind: input, shape index: {}]   ;;  %s5045_s8 = inlined_call_operand.vmem [shape: f32[1,128], index: 8, kind: input, shape index: {}]   ;;  %s5046_s9 = inlined_call_operand.hbm [shape: f32[128,128], index: 9, kind: input, shape index: {}]   ;;  %s5047_s10 = inlined_call_operand.vmem [shape: f32[1,128], index: 10, kind: input, shape index: {}]   ;;  %s5048_s11 = inlined_call_operand.hbm [shape: f32[128,128], index: 11, kind: input, shape index: {}]   ;;  %s5049_s12 = inlined_call_operand.vmem [shape: f32[1,128], index: 12, kind: input, shape index: {}]   ;;  %s5050_s13 = inlined_call_operand.hbm [shape: f32[128,128], index: 13, kind: input, shape index: {}]   ;;  %s5051_s14 = inlined_call_operand.vmem [shape: f32[1,128], index: 14, kind: input, shape index: {}]   ;;  %s5052_s15 = inlined_call_operand.vmem [shape: f32[2,1,128], index: 15, kind: output, shape index: {}]  }
   0x1   :  { %5053 = sst [smem:[#allocation10_spill]] %s5048_s11 }
   0x2   :  { %20 = vsyncpa [#allocation4], 0 }
   0x3   :  { %21 = vsyncpa [#allocation6], 0  ;;  %s3141_s18 = smov 0  }
   0x4 LB: > { %s3147_s19 = sadd.s32 4294967295, %s3053_s18   ;;  %p2371_p0 = scmp.ge.s32.totalorder %s3053_s18, 1  ;;  %s3053_s18 = sphi %s3141_s18, %s27_s18  }
   0x5   : > { %p378_p1 = scmp.lt.s32.totalorder %s3053_s18, 3  ;;  %p2919_p2 = scmp.eq.s32.totalorder %s3147_s19, 0 }
   0x6   : > { %s5054_s11 = sld [smem:[#allocation10_spill]]  ;;  %s413_s26 = sshll.u32 %s5046_s9, 4  ;;  %s414_s26 = int_to_ptr.hbm [resolvable:$true] %s413_s26 }
   0x7   : > { %p3155_p3 = pnand %p2371_p0, %p378_p1  ;;  %s3055_s27 = smov [#allocation5]  }
   0x8   : > { %s432_s28 = sshll.u32 %s3055_s27, 4  ;;  %s3056_s29 = smov [#allocation3]   ;;  %s433_s28 = int_to_ptr.vmem [resolvable:$true] %s432_s28 }
   0x9   : > { %p2909_p4 = pneg %p3155_p3  ;;  %s415_s30 = sshll.u32 %s3056_s29, 4  ;;  %s416_s30 = int_to_ptr.vmem [resolvable:$true] %s415_s30 }
   0xa   : > { %s447_s20 = sshll.u32 %s5050_s13, 4  ;;  %s3057_s21 = smov 128   ;;  %s448_s20 = int_to_ptr.hbm [resolvable:$true] %s447_s20 }
   0xb   : > { %p2910_p5 = pnand %p2919_p2, %p2909_p4  ;;  %s3059_s24 = smov [#allocation7]  }
   0xc   : > { %s430_s22 = sshll.u32 %s5054_s11, 4  ;;  %s3058_s11 = smov 8   ;;  %s431_s22 = int_to_ptr.hbm [resolvable:$true] %s430_s22 }
   0xd   : > { %2915 = dma.hbm_to_vmem [thread:$0]  (!%p2910_p5), %s431_s22, 2048, %s433_s28, [#allocation6], %s3057_s21, %s3057_s21, %s3058_s11  }
   0xe   : > { %2912 = dma.hbm_to_vmem [thread:$0]  (!%p2910_p5), %s414_s26, 2048, %s416_s30, [#allocation4], %s3057_s21, %s3057_s21, %s3058_s11  }
   0xf   : > { %s449_s25 = sshll.u32 %s3059_s24, 4  ;;  %476 = sbr.rel (%p3155_p3) target bundleno = 1429 (0x595), region = 80  ;;  %s450_s25 = int_to_ptr.vmem [resolvable:$true] %s449_s25 }
  0x10   : > { %2918 = dma.hbm_to_vmem [thread:$0]  (!%p2910_p5), %s448_s20, 2048, %s450_s25, [#allocation6], %s3057_s21, %s3057_s21, %s3058_s11  }
  0x14   : > { %3044 = dma.done.wait (%p2919_p2), [#allocation4], 2048  }
  0x15   : > { %3046 = vsyncadd (%p2919_p2), [#allocation4], 4294965248 }
  0x16   : > { %3048 = dma.done.wait (%p2919_p2), [#allocation6], 4096  }
  0x17   : > { %3050 = vsyncadd (%p2919_p2), [#allocation6], 4294963200  ;;  %v563_v0 = vld [vmem:[%s5038_s1 + $0x78] sm:$0xff]  ;;  %v562_v1 = vld [vmem:[%s5038_s1 + $0x70] sm:$0xff]  ;;  %p533_p6 = scmp.lt.s32.totalorder %s3147_s19, 1  ;;  %vm2138_vm0 = vcmask 1040384  }
  0x18   : > { %568 = vmatpush.msra.mxu0 %v563_v0  ;;  %v561_v2 = vld [vmem:[%s5038_s1 + $0x68] sm:$0xff]  ;;  %v560_v3 = vld [vmem:[%s5038_s1 + $0x60] sm:$0xff]  ;;  %v559_v4 = vld [vmem:[%s5038_s1 + $0x58] sm:$0xff] }
  0x19   : > { %v558_v5 = vld [vmem:[%s5038_s1 + $0x50] sm:$0xff]  ;;  %v557_v6 = vld [vmem:[%s5038_s1 + $0x48] sm:$0xff]  ;;  %v556_v7 = vld [vmem:[%s5038_s1 + $0x40] sm:$0xff]  ;;  %s5057_s19 = smov (!%p533_p6, %s3147_s19), 1 }
  0x1a   : > { %569 = vmatpush.msra.mxu0 %v562_v1  ;;  %v555_v8 = vld [vmem:[%s5038_s1 + $0x38] sm:$0xff]  ;;  %v554_v9 = vld [vmem:[%s5038_s1 + $0x30] sm:$0xff]  ;;  %v553_v10 = vld [vmem:[%s5038_s1 + $0x28] sm:$0xff]  ;;  %s2896_s24 = smul.u32 56, %s5057_s19  ;;  %s540_s21 = scalar_lea.vmem %s5052_s15, %s5057_s19 }
  0x1b   : > { %v552_v11 = vld [vmem:[%s5038_s1 + $0x20] sm:$0xff]  ;;  %v551_v12 = vld [vmem:[%s5038_s1 + $0x18] sm:$0xff]  ;;  %v550_v13 = vld [vmem:[%s5038_s1 + $0x10] sm:$0xff] }
  0x1c   : > { %570 = vmatpush.msra.mxu0 %v561_v2  ;;  %v549_v14 = vld [vmem:[%s5038_s1 + $0x8] sm:$0xff]  ;;  %s3232_s28 = scalar_lea.vmem %s5037_s0, %s2896_s24  ;;  %v548_v15 = vld [vmem:[%s5038_s1] sm:$0xff]  ;;  %v640_v19 = vld [vmem:[%s5040_s3 + $0x78] sm:$0xff] }
  0x1d   : > { %v541_v16 = vld [vmem:[%s3232_s28] sm:$0xff]  ;;  %v542_v17 = vld [vmem:[%s3232_s28 + $0x8] sm:$0xff]  ;;  %v543_v18 = vld [vmem:[%s3232_s28 + $0x10] sm:$0xff]  ;;  %695 = vmatpush.msra.mxu2 %v640_v19 }
  0x1e   : > { %571 = vmatpush.msra.mxu0 %v560_v3  ;;  %v639_v20 = vld [vmem:[%s5040_s3 + $0x70] sm:$0xff]  ;;  %v2396_v21 = vld [vmem:[%s5040_s3 + $0xf8] sm:$0xff]  ;;  %v638_v22 = vld [vmem:[%s5040_s3 + $0x68] sm:$0xff] }
  0x1f   : > { %663 = vmatpush.msra.mxu1 %v2396_v21  ;;  %v2412_v23 = vld [vmem:[%s5040_s3 + $0x178] sm:$0xff]  ;;  %v2395_v24 = vld [vmem:[%s5040_s3 + $0xf0] sm:$0xff]  ;;  %696 = vmatpush.msra.mxu2 %v639_v20  ;;  %v2394_v26 = vld [vmem:[%s5040_s3 + $0xe8] sm:$0xff] }
  0x20   : > { %572 = vmatpush.msra.mxu0 %v559_v4  ;;  %749 = vmatpush.msra.mxu3 %v2412_v23  ;;  %v2411_v25 = vld [vmem:[%s5040_s3 + $0x170] sm:$0xff]  ;;  %v637_v27 = vld [vmem:[%s5040_s3 + $0x60] sm:$0xff]  ;;  %v2410_v28 = vld [vmem:[%s5040_s3 + $0x168] sm:$0xff] }
  0x21   : > { %664 = vmatpush.msra.mxu1 %v2395_v24  ;;  %v544_v29 = vld [vmem:[%s3232_s28 + $0x18] sm:$0xff]  ;;  %697 = vmatpush.msra.mxu2 %v638_v22  ;;  %v2393_v30 = vld [vmem:[%s5040_s3 + $0xe0] sm:$0xff]  ;;  %v635_v35 = vld [vmem:[%s5040_s3 + $0x50] sm:$0xff] }
  0x22   : > { %573 = vmatpush.msra.mxu0 %v558_v5  ;;  %750 = vmatpush.msra.mxu3 %v2411_v25  ;;  %v636_v31 = vld [vmem:[%s5040_s3 + $0x58] sm:$0xff]  ;;  %v2409_v32 = vld [vmem:[%s5040_s3 + $0x160] sm:$0xff]  ;;  %v634_v37 = vld [vmem:[%s5040_s3 + $0x48] sm:$0xff] }
  0x23   : > { %665 = vmatpush.msra.mxu1 %v2394_v26  ;;  %698 = vmatpush.msra.mxu2 %v637_v27  ;;  %v2392_v33 = vld [vmem:[%s5040_s3 + $0xd8] sm:$0xff]  ;;  %v633_v38 = vld [vmem:[%s5040_s3 + $0x40] sm:$0xff]  ;;  %v546_v41 = vld [vmem:[%s3232_s28 + $0x28] sm:$0xff] }
  0x24   : > { %574 = vmatpush.msra.mxu0 %v557_v6  ;;  %751 = vmatpush.msra.mxu3 %v2410_v28  ;;  %v2476_v34 = vld [vmem:[%s5040_s3 + $0x378] sm:$0xff]  ;;  %v545_v39 = vld [vmem:[%s3232_s28 + $0x20] sm:$0xff]  ;;  %v547_v42 = vld [vmem:[%s3232_s28 + $0x30] sm:$0xff] }
  0x25   : > { %666 = vmatpush.msra.mxu1 %v2393_v30  ;;  %v2408_v36 = vld [vmem:[%s5040_s3 + $0x158] sm:$0xff]  ;;  %699 = vmatpush.msra.mxu2 %v636_v31  ;;  %v631_v43 = vld [vmem:[%s5040_s3 + $0x30] sm:$0xff]  ;;  %v630_v44 = vld [vmem:[%s5040_s3 + $0x28] sm:$0xff] }
  0x26   : > { %575 = vmatpush.msra.mxu0 %v556_v7  ;;  %752 = vmatpush.msra.mxu3 %v2409_v32  ;;  %v632_v40 = vld [vmem:[%s5040_s3 + $0x38] sm:$0xff]  ;;  %v629_v45 = vld [vmem:[%s5040_s3 + $0x20] sm:$0xff]  ;;  %v2391_v47 = vld [vmem:[%s5040_s3 + $0xd0] sm:$0xff] }
  0x27   : > { %667 = vmatpush.msra.mxu1 %v2392_v33  ;;  %700 = vmatpush.msra.mxu2 %v635_v35  ;;  %v628_v46 = vld [vmem:[%s5040_s3 + $0x18] sm:$0xff]  ;;  %v2407_v48 = vld [vmem:[%s5040_s3 + $0x150] sm:$0xff]  ;;  %v2390_v51 = vld [vmem:[%s5040_s3 + $0xc8] sm:$0xff] }
  0x28   : > { %576 = vmatpush.msra.mxu0 %v555_v8  ;;  %753 = vmatpush.msra.mxu3 %v2408_v36  ;;  %v2475_v49 = vld [vmem:[%s5040_s3 + $0x370] sm:$0xff]  ;;  %v2406_v52 = vld [vmem:[%s5040_s3 + $0x148] sm:$0xff]  ;;  %v2389_v55 = vld [vmem:[%s5040_s3 + $0xc0] sm:$0xff] }
  0x29   : > { %701 = vmatpush.msra.mxu2 %v634_v37  ;;  %668 = vmatpush.msra.mxu1 %v2391_v47  ;;  %v627_v50 = vld [vmem:[%s5040_s3 + $0x10] sm:$0xff]  ;;  %v2474_v53 = vld [vmem:[%s5040_s3 + $0x368] sm:$0xff]  ;;  %v2405_v56 = vld [vmem:[%s5040_s3 + $0x140] sm:$0xff] }
  0x2a   : > { %577 = vmatpush.msra.mxu0 %v554_v9  ;;  %754 = vmatpush.msra.mxu3 %v2407_v48  ;;  %v626_v54 = vld [vmem:[%s5040_s3 + $0x8] sm:$0xff]  ;;  %v2473_v57 = vld [vmem:[%s5040_s3 + $0x360] sm:$0xff]  ;;  %v2388_v59 = vld [vmem:[%s5040_s3 + $0xb8] sm:$0xff] }
  0x2b   : > { %702 = vmatpush.msra.mxu2 %v633_v38  ;;  %669 = vmatpush.msra.mxu1 %v2390_v51  ;;  %v625_v58 = vld [vmem:[%s5040_s3] sm:$0xff]  ;;  %v2404_v60 = vld [vmem:[%s5040_s3 + $0x138] sm:$0xff]  ;;  %v2387_v62 = vld [vmem:[%s5040_s3 + $0xb0] sm:$0xff] }
  0x2c   : > { %578 = vmatpush.msra.mxu0 %v553_v10  ;;  %755 = vmatpush.msra.mxu3 %v2406_v52  ;;  %v2472_v61 = vld [vmem:[%s5040_s3 + $0x358] sm:$0xff]  ;;  %v2403_v63 = vld [vmem:[%s5040_s3 + $0x130] sm:$0xff]  ;;  %v2386_v1 = vld [vmem:[%s5040_s3 + $0xa8] sm:$0xff] }
  0x2d   : > { %703 = vmatpush.msra.mxu2 %v632_v40  ;;  %670 = vmatpush.msra.mxu1 %v2389_v55  ;;  %v2471_v0 = vld [vmem:[%s5040_s3 + $0x350] sm:$0xff]  ;;  %v2402_v2 = vld [vmem:[%s5040_s3 + $0x128] sm:$0xff]  ;;  %v2385_v4 = vld [vmem:[%s5040_s3 + $0xa0] sm:$0xff] }
  0x2e   : > { %579 = vmatpush.msra.mxu0 %v552_v11  ;;  %756 = vmatpush.msra.mxu3 %v2405_v56  ;;  %v2470_v3 = vld [vmem:[%s5040_s3 + $0x348] sm:$0xff]  ;;  %v2401_v5 = vld [vmem:[%s5040_s3 + $0x120] sm:$0xff]  ;;  %v2384_v7 = vld [vmem:[%s5040_s3 + $0x98] sm:$0xff] }
  0x2f   : > { %704 = vmatpush.msra.mxu2 %v631_v43  ;;  %671 = vmatpush.msra.mxu1 %v2388_v59  ;;  %v2469_v6 = vld [vmem:[%s5040_s3 + $0x340] sm:$0xff]  ;;  %v2400_v8 = vld [vmem:[%s5040_s3 + $0x118] sm:$0xff]  ;;  %v2383_v11 = vld [vmem:[%s5040_s3 + $0x90] sm:$0xff] }
  0x30   : > { %580 = vmatpush.msra.mxu0 %v551_v12  ;;  %757 = vmatpush.msra.mxu3 %v2404_v60  ;;  %v2468_v9 = vld [vmem:[%s5040_s3 + $0x338] sm:$0xff]  ;;  %v2399_v12 = vld [vmem:[%s5040_s3 + $0x110] sm:$0xff]  ;;  %v2381_v19 = vld [vmem:[%s5040_s3 + $0x80] sm:$0xff] }
  0x31   : > { %705 = vmatpush.msra.mxu2 %v630_v44  ;;  %672 = vmatpush.msra.mxu1 %v2387_v62  ;;  %v2444_v10 = vld [vmem:[%s5040_s3 + $0x278] sm:$0xff]  ;;  %v2397_v20 = vld [vmem:[%s5040_s3 + $0x100] sm:$0xff]  ;;  %v2463_v25 = vld [vmem:[%s5040_s3 + $0x310] sm:$0xff] }
  0x32   : > { %581 = vmatpush.msra.mxu0 %v550_v13  ;;  %758 = vmatpush.msra.mxu3 %v2403_v63  ;;  %v2467_v13 = vld [vmem:[%s5040_s3 + $0x330] sm:$0xff]  ;;  %v2465_v21 = vld [vmem:[%s5040_s3 + $0x320] sm:$0xff]  ;;  %v2464_v23 = vld [vmem:[%s5040_s3 + $0x318] sm:$0xff] }
  0x33   : > { %706 = vmatpush.msra.mxu2 %v629_v45  ;;  %673 = vmatpush.msra.mxu1 %v2386_v1  ;;  %v2441_v22 = vld [vmem:[%s5040_s3 + $0x260] sm:$0xff]  ;;  %v2440_v24 = vld [vmem:[%s5040_s3 + $0x258] sm:$0xff]  ;;  %v2439_v26 = vld [vmem:[%s5040_s3 + $0x250] sm:$0xff] }
  0x34   : > { %582 = vmatpush.msra.mxu0 %v549_v14  ;;  %759 = vmatpush.msra.mxu3 %v2402_v2  ;;  %v2443_v14 = vld [vmem:[%s5040_s3 + $0x270] sm:$0xff]  ;;  %v2462_v27 = vld [vmem:[%s5040_s3 + $0x308] sm:$0xff]  ;;  %v2437_v30 = vld [vmem:[%s5040_s3 + $0x240] sm:$0xff] }
  0x35   : > { %707 = vmatpush.msra.mxu2 %v628_v46  ;;  %674 = vmatpush.msra.mxu1 %v2385_v4  ;;  %v2438_v28 = vld [vmem:[%s5040_s3 + $0x248] sm:$0xff]  ;;  %v3463_v31 = vld [vmem:[%s5039_s2] ss:$0 sm:$0xff]  ;;  %v2428_v32 = vld [vmem:[%s5040_s3 + $0x1f8] sm:$0xff] }
  0x36   : > { %583 = vmatpush.msra.mxu0 %v548_v15  ;;  %760 = vmatpush.msra.mxu3 %v2401_v5  ;;  %v2382_v15 = vld [vmem:[%s5040_s3 + $0x88] sm:$0xff]  ;;  %v2460_v33 = vld [vmem:[%s5040_s3 + $0x2f8] sm:$0xff]  ;;  %v2427_v36 = vld [vmem:[%s5040_s3 + $0x1f0] sm:$0xff] }
  0x37   : > { %584 = vmatmul.f32.vlgmr.msra.gmra.mxu0 %v541_v16  ;;  %708 = vmatpush.msra.mxu2 %v627_v50  ;;  %v2398_v16 = vld [vmem:[%s5040_s3 + $0x108] sm:$0xff]  ;;  %v2459_v37 = vld [vmem:[%s5040_s3 + $0x2f0] sm:$0xff]  ;;  %v2425_v44 = vld [vmem:[%s5040_s3 + $0x1e0] sm:$0xff] }
  0x38   : > { %985 = vmatpush.msrb.mxu0 %v2476_v34  ;;  %675 = vmatpush.msra.mxu1 %v2384_v7  ;;  %v2436_v34 = vld [vmem:[%s5040_s3 + $0x238] sm:$0xff]  ;;  %v2435_v38 = vld [vmem:[%s5040_s3 + $0x230] sm:$0xff]  ;;  %v2426_v40 = vld [vmem:[%s5040_s3 + $0x1e8] sm:$0xff] }
  0x39   : > { %709 = vmatpush.msra.mxu2 %v626_v54  ;;  %761 = vmatpush.msra.mxu3 %v2400_v8  ;;  %v2457_v45 = vld [vmem:[%s5040_s3 + $0x2e0] sm:$0xff]  ;;  %v2424_v47 = vld [vmem:[%s5040_s3 + $0x1d8] sm:$0xff]  ;;  %v2423_v51 = vld [vmem:[%s5040_s3 + $0x1d0] sm:$0xff] }
  0x3a   : > { %986 = vmatpush.msrb.mxu0 %v2475_v49  ;;  %676 = vmatpush.msra.mxu1 %v2383_v11  ;;  %v2433_v46 = vld [vmem:[%s5040_s3 + $0x220] sm:$0xff]  ;;  %v2456_v48 = vld [vmem:[%s5040_s3 + $0x2d8] sm:$0xff]  ;;  %v2455_v52 = vld [vmem:[%s5040_s3 + $0x2d0] sm:$0xff] }
  0x3b   : > { %710 = vmatpush.msra.mxu2 %v625_v58  ;;  %762 = vmatpush.msra.mxu3 %v2399_v12  ;;  %v2432_v49 = vld [vmem:[%s5040_s3 + $0x218] sm:$0xff]  ;;  %v2422_v55 = vld [vmem:[%s5040_s3 + $0x1c8] sm:$0xff]  ;;  %v2421_v59 = vld [vmem:[%s5040_s3 + $0x1c0] sm:$0xff] }
  0x3c   : > { %987 = vmatpush.msrb.mxu0 %v2474_v53  ;;  %677 = vmatpush.msra.mxu1 %v2382_v15  ;;  %v2431_v53 = vld [vmem:[%s5040_s3 + $0x210] sm:$0xff]  ;;  %v2454_v56 = vld [vmem:[%s5040_s3 + $0x2c8] sm:$0xff]  ;;  %v2453_v60 = vld [vmem:[%s5040_s3 + $0x2c0] sm:$0xff] }
  0x3d   : > { %867 = vmatpush.msrb.mxu2 %v2444_v10  ;;  %763 = vmatpush.msra.mxu3 %v2398_v16  ;;  %v2420_v62 = vld [vmem:[%s5040_s3 + $0x1b8] sm:$0xff]  ;;  %v2419_v1 = vld [vmem:[%s5040_s3 + $0x1b0] sm:$0xff]  ;;  %v2418_v4 = vld [vmem:[%s5040_s3 + $0x1a8] sm:$0xff] }
  0x3e   : > { %988 = vmatpush.msrb.mxu0 %v2473_v57  ;;  %678 = vmatpush.msra.mxu1 %v2381_v19  ;;  %v2430_v57 = vld [vmem:[%s5040_s3 + $0x208] sm:$0xff]  ;;  %v2452_v63 = vld [vmem:[%s5040_s3 + $0x2b8] sm:$0xff]  ;;  %v2451_v2 = vld [vmem:[%s5040_s3 + $0x2b0] sm:$0xff] }
  0x3f   : > { %587 = vmatmul.f32.gmra.mxu0 %v542_v17  ;;  %v2466_v17 = vld [vmem:[%s5040_s3 + $0x328] sm:$0xff]  ;;  %868 = vmatpush.msrb.mxu2 %v2443_v14  ;;  %v2449_v10 = vld [vmem:[%s5040_s3 + $0x2a0] sm:$0xff]  ;;  %v2416_v11 = vld [vmem:[%s5040_s3 + $0x198] sm:$0xff] }
  0x40   : > { %989 = vmatpush.msrb.mxu0 %v2472_v61  ;;  %764 = vmatpush.msra.mxu3 %v2397_v20  ;;  %v2429_v61 = vld [vmem:[%s5040_s3 + $0x200] sm:$0xff]  ;;  %v2450_v5 = vld [vmem:[%s5040_s3 + $0x2a8] sm:$0xff]  ;;  %v2448_v12 = vld [vmem:[%s5040_s3 + $0x298] sm:$0xff] }
  0x41   : > { %808 = vmatpush.msrb.mxu1 %v2428_v32  ;;  %v2447_v15 = vld [vmem:[%s5040_s3 + $0x290] sm:$0xff]  ;;  %v2508_v16 = vld [vmem:[%s5040_s3 + $0x478] sm:$0xff] }
  0x42   : > { %990 = vmatpush.msrb.mxu0 %v2471_v0  ;;  %926 = vmatpush.msrb.mxu3 %v2460_v33  ;;  %v2507_v19 = vld [vmem:[%s5040_s3 + $0x470] sm:$0xff]  ;;  %v2504_v32 = vld [vmem:[%s5040_s3 + $0x458] sm:$0xff] }
  0x43   : > { %809 = vmatpush.msrb.mxu1 %v2427_v36 }
  0x44   : > { %991 = vmatpush.msrb.mxu0 %v2470_v3  ;;  %927 = vmatpush.msrb.mxu3 %v2459_v37 }
  0x45   : > { %810 = vmatpush.msrb.mxu1 %v2426_v40  ;;  %v2502_v40 = vld [vmem:[%s5040_s3 + $0x448] sm:$0xff] }
  0x46   : > { %992 = vmatpush.msrb.mxu0 %v2469_v6 }
  0x47   : > { %590 = vmatmul.f32.gmra.mxu0 %v543_v18  ;;  %v2442_v18 = vld [vmem:[%s5040_s3 + $0x268] sm:$0xff]  ;;  %811 = vmatpush.msrb.mxu1 %v2425_v44 }
  0x48   : > { %993 = vmatpush.msrb.mxu0 %v2468_v9  ;;  %869 = vmatpush.msrb.mxu2 %v2442_v18  ;;  %v2417_v9 = vld [vmem:[%s5040_s3 + $0x1a0] sm:$0xff]  ;;  %v2414_v18 = vld [vmem:[%s5040_s3 + $0x188] sm:$0xff] }
  0x49   : > { %812 = vmatpush.msrb.mxu1 %v2424_v47  ;;  %v2500_v47 = vld [vmem:[%s5040_s3 + $0x438] sm:$0xff] }
  0x4a   : > { %994 = vmatpush.msrb.mxu0 %v2467_v13  ;;  %870 = vmatpush.msrb.mxu2 %v2441_v22  ;;  %v2415_v13 = vld [vmem:[%s5040_s3 + $0x190] sm:$0xff]  ;;  %v2413_v22 = vld [vmem:[%s5040_s3 + $0x180] sm:$0xff] }
  0x4b   : > { %813 = vmatpush.msrb.mxu1 %v2423_v51  ;;  %v2488_v51 = vld [vmem:[%s5040_s3 + $0x3d8] sm:$0xff] }
  0x4c   : > { %995 = vmatpush.msrb.mxu0 %v2466_v17  ;;  %871 = vmatpush.msrb.mxu2 %v2440_v24 }
  0x4d   : > { %814 = vmatpush.msrb.mxu1 %v2422_v55  ;;  %v2498_v55 = vld [vmem:[%s5040_s3 + $0x428] sm:$0xff] }
  0x4e   : > { %996 = vmatpush.msrb.mxu0 %v2465_v21  ;;  %872 = vmatpush.msrb.mxu2 %v2439_v26  ;;  %v2446_v21 = vld [vmem:[%s5040_s3 + $0x288] sm:$0xff] }
  0x4f   : > { %593 = vmatmul.f32.gmra.mxu0 %v544_v29  ;;  %v2461_v29 = vld [vmem:[%s5040_s3 + $0x300] sm:$0xff]  ;;  %815 = vmatpush.msrb.mxu1 %v2421_v59  ;;  %v2506_v26 = vld [vmem:[%s5040_s3 + $0x468] sm:$0xff] }
  0x50   : > { %997 = vmatpush.msrb.mxu0 %v2464_v23  ;;  %873 = vmatpush.msrb.mxu2 %v2438_v28  ;;  %v2505_v28 = vld [vmem:[%s5040_s3 + $0x460] sm:$0xff] }
  0x51   : > { %816 = vmatpush.msrb.mxu1 %v2420_v62  ;;  %v2497_v59 = vld [vmem:[%s5040_s3 + $0x420] sm:$0xff] }
  0x52   : > { %998 = vmatpush.msrb.mxu0 %v2463_v25  ;;  %874 = vmatpush.msrb.mxu2 %v2437_v30 }
  0x53   : > { %817 = vmatpush.msrb.mxu1 %v2419_v1  ;;  %v2495_v1 = vld [vmem:[%s5040_s3 + $0x410] sm:$0xff] }
  0x54   : > { %999 = vmatpush.msrb.mxu0 %v2462_v27  ;;  %875 = vmatpush.msrb.mxu2 %v2436_v34  ;;  %v2445_v27 = vld [vmem:[%s5040_s3 + $0x280] sm:$0xff]  ;;  %v2503_v34 = vld [vmem:[%s5040_s3 + $0x450] sm:$0xff] }
  0x55   : > { %818 = vmatpush.msrb.mxu1 %v2418_v4  ;;  %v2483_v4 = vld [vmem:[%s5040_s3 + $0x3b0] sm:$0xff] }
  0x56   : > { %1000 = vmatpush.msrb.mxu0 %v2461_v29  ;;  %876 = vmatpush.msrb.mxu2 %v2435_v38  ;;  %v2492_v38 = vld [vmem:[%s5040_s3 + $0x3f8] sm:$0xff] }
  0x57   : > { %596 = vmatmul.f32.gmra.mxu0 %v545_v39  ;;  %819 = vmatpush.msrb.mxu1 %v2417_v9  ;;  %v2481_v9 = vld [vmem:[%s5040_s3 + $0x3a0] sm:$0xff] }
  0x59   : > { %820 = vmatpush.msrb.mxu1 %v2416_v11 }
  0x5b   : > { %821 = vmatpush.msrb.mxu1 %v2415_v13  ;;  %v2478_v13 = vld [vmem:[%s5040_s3 + $0x388] sm:$0xff] }
  0x5d   : > { %822 = vmatpush.msrb.mxu1 %v2414_v18 }
  0x5f   : > { %599 = vmatmul.f32.gmra.mxu0 %v546_v41  ;;  %v2458_v41 = vld [vmem:[%s5040_s3 + $0x2e8] sm:$0xff]  ;;  %823 = vmatpush.msrb.mxu1 %v2413_v22 }
  0x60   : > { %928 = vmatpush.msrb.mxu3 %v2458_v41 }
  0x62   : > { %929 = vmatpush.msrb.mxu3 %v2457_v45 }
  0x64   : > { %930 = vmatpush.msrb.mxu3 %v2456_v48 }
  0x66   : > { %931 = vmatpush.msrb.mxu3 %v2455_v52  ;;  %v2499_v52 = vld [vmem:[%s5040_s3 + $0x430] sm:$0xff] }
  0x67   : > { %602 = vmatmul.f32.gmra.mxu0 %v547_v42  ;;  %v2434_v42 = vld [vmem:[%s5040_s3 + $0x228] sm:$0xff] }
  0x68   : > { %877 = vmatpush.msrb.mxu2 %v2434_v42  ;;  %932 = vmatpush.msrb.mxu3 %v2454_v56  ;;  %v2490_v42 = vld [vmem:[%s5040_s3 + $0x3e8] sm:$0xff] }
  0x6a   : > { %878 = vmatpush.msrb.mxu2 %v2433_v46  ;;  %933 = vmatpush.msrb.mxu3 %v2453_v60  ;;  %v2489_v46 = vld [vmem:[%s5040_s3 + $0x3e0] sm:$0xff] }
  0x6c   : > { %879 = vmatpush.msrb.mxu2 %v2432_v49  ;;  %934 = vmatpush.msrb.mxu3 %v2452_v63  ;;  %v2496_v63 = vld [vmem:[%s5040_s3 + $0x418] sm:$0xff] }
  0x6e   : > { %880 = vmatpush.msrb.mxu2 %v2431_v53  ;;  %935 = vmatpush.msrb.mxu3 %v2451_v2 }
  0x70   : > { %881 = vmatpush.msrb.mxu2 %v2430_v57  ;;  %936 = vmatpush.msrb.mxu3 %v2450_v5  ;;  %v2494_v5 = vld [vmem:[%s5040_s3 + $0x408] sm:$0xff] }
  0x72   : > { %882 = vmatpush.msrb.mxu2 %v2429_v61  ;;  %937 = vmatpush.msrb.mxu3 %v2449_v10  ;;  %v2480_v10 = vld [vmem:[%s5040_s3 + $0x398] sm:$0xff] }
  0x74   : > { %938 = vmatpush.msrb.mxu3 %v2448_v12  ;;  %v2479_v12 = vld [vmem:[%s5040_s3 + $0x390] sm:$0xff] }
  0x76   : > { %939 = vmatpush.msrb.mxu3 %v2447_v15 }
  0x78   : > { %940 = vmatpush.msrb.mxu3 %v2446_v21 }
  0x7a   : > { %941 = vmatpush.msrb.mxu3 %v2445_v27  ;;  %v2523_v27 = vld [vmem:[%s5042_s5 + $0xf0] sm:$0xff] }
  0xb4   : > { %v585_v35 = vpop.f32.mrf.mxu0 }
  0xb5   : > { %v586_v39 = vadd.f32 %v3463_v31, %v585_v35 }
  0xb7   : > { %v606_v43 = vmax.f32 %v586_v39, 0.0  ;;  %v2491_v39 = vld [vmem:[%s5040_s3 + $0x3f0] sm:$0xff] }
  0xb9   : > { %613 = vst [vmem:[#allocation2] sm:$0xff] %v606_v43  ;;  %711 = vmatmul.f32.vlgmr.msra.gmra.mxu2 %v606_v43  ;;  %v2501_v43 = vld [vmem:[%s5040_s3 + $0x440] sm:$0xff] }
  0xba   : > { %1103 = vmatpush.msra.mxu2 %v2508_v16 }
  0xbc   : > { %v588_v50 = vpop.f32.mrf.mxu0  ;;  %1104 = vmatpush.msra.mxu2 %v2507_v19 }
  0xbd   : > { %v589_v54 = vadd.f32 %v3463_v31, %v588_v50 }
  0xbe   : > { %1105 = vmatpush.msra.mxu2 %v2506_v26  ;;  %v2572_v26 = vld [vmem:[%s5042_s5 + $0x278] sm:$0xff] }
  0xbf   : > { %v3530_v58 = vmax.f32 %v589_v54, 0.0  ;;  %v2487_v54 = vld [vmem:[%s5040_s3 + $0x3d0] sm:$0xff] }
  0xc0   : > { %1106 = vmatpush.msra.mxu2 %v2505_v28  ;;  %v1174_v28 = vld [vmem:[%s5042_s5 + $0x70] sm:$0xff] }
  0xc1   : > { %614 = vst [vmem:[#allocation2 + $0x8] sm:$0xff] %v3530_v58  ;;  %714 = vmatmul.f32.gmra.mxu2 %v3530_v58 }
  0xc2   : > { %1107 = vmatpush.msra.mxu2 %v2504_v32 }
  0xc4   : > { %v591_v0 = vpop.f32.mrf.mxu0  ;;  %1108 = vmatpush.msra.mxu2 %v2503_v34  ;;  %v1173_v34 = vld [vmem:[%s5042_s5 + $0x68] sm:$0xff] }
  0xc5   : > { %v592_v3 = vadd.f32 %v3463_v31, %v591_v0  ;;  %v2484_v0 = vld [vmem:[%s5040_s3 + $0x3b8] sm:$0xff] }
  0xc6   : > { %1109 = vmatpush.msra.mxu2 %v2502_v40  ;;  %v1172_v40 = vld [vmem:[%s5042_s5 + $0x60] sm:$0xff] }
  0xc7   : > { %v3562_v6 = vmax.f32 %v592_v3, 0.0 }
  0xc8   : > { %v641_v7 = vld [vmem:[#allocation2 + $0x1] sm:$0xff]  ;;  %1110 = vmatpush.msra.mxu2 %v2501_v43  ;;  %v2520_v43 = vld [vmem:[%s5042_s5 + $0xd8] sm:$0xff] }
  0xc9   : > { %v727_v8 = vld [vmem:[#allocation2 + $0x2] sm:$0xff]  ;;  %615 = vst [vmem:[#allocation2 + $0x10] sm:$0xff] %v3562_v6  ;;  %679 = vmatmul.f32.vlgmr.msra.gmra.mxu1 %v641_v7  ;;  %717 = vmatmul.f32.gmra.mxu2 %v3562_v6 }
  0xca   : > { %765 = vmatmul.f32.vlgmr.msra.gmra.mxu3 %v727_v8  ;;  %1044 = vmatpush.msra.mxu1 %v2492_v38  ;;  %v786_v2 = vld [vmem:[#allocation2 + $0x7] sm:$0xff] }
  0xcb   : > { %1111 = vmatpush.msra.mxu2 %v2500_v47  ;;  %v2482_v7 = vld [vmem:[%s5040_s3 + $0x3a8] sm:$0xff]  ;;  %v2493_v8 = vld [vmem:[%s5040_s3 + $0x400] sm:$0xff]  ;;  %v2519_v47 = vld [vmem:[%s5042_s5 + $0xd0] sm:$0xff] }
  0xcc   : > { %v594_v14 = vpop.f32.mrf.mxu0  ;;  %1045 = vmatpush.msra.mxu1 %v2491_v39  ;;  %v2521_v39 = vld [vmem:[%s5042_s5 + $0xe0] sm:$0xff] }
  0xcd   : > { %v595_v17 = vadd.f32 %v3463_v31, %v594_v14  ;;  %1112 = vmatpush.msra.mxu2 %v2499_v52  ;;  %v2477_v14 = vld [vmem:[%s5040_s3 + $0x380] sm:$0xff] }
  0xce   : > { %1046 = vmatpush.msra.mxu1 %v2490_v42  ;;  %v2569_v42 = vld [vmem:[%s5042_s5 + $0x260] sm:$0xff] }
  0xcf   : > { %v3594_v20 = vmax.f32 %v595_v17, 0.0  ;;  %1113 = vmatpush.msra.mxu2 %v2498_v55  ;;  %v2550_v55 = vld [vmem:[%s5042_s5 + $0x1c8] sm:$0xff] }
  0xd0   : > { %v3602_v23 = vld [vmem:[#allocation2 + $0x9] sm:$0xff]  ;;  %1047 = vmatpush.msra.mxu1 %v2489_v46  ;;  %v2568_v46 = vld [vmem:[%s5042_s5 + $0x258] sm:$0xff] }
  0xd1   : > { %v728_v24 = vld [vmem:[#allocation2 + $0xa] sm:$0xff]  ;;  %616 = vst [vmem:[#allocation2 + $0x18] sm:$0xff] %v3594_v20  ;;  %682 = vmatmul.f32.gmra.mxu1 %v3602_v23  ;;  %720 = vmatmul.f32.gmra.mxu2 %v3594_v20 }
  0xd2   : > { %v963_v25 = vld [vmem:[#allocation2 + $0xe] sm:$0xff]  ;;  %768 = vmatmul.f32.gmra.mxu3 %v728_v24  ;;  %1048 = vmatpush.msra.mxu1 %v2488_v51  ;;  %v1175_v24 = vld [vmem:[%s5042_s5 + $0x78] sm:$0xff] }
  0xd3   : > { %1001 = vmatmul.f32.vlgmr.msrb.gmra.mxu0 %v963_v25  ;;  %1114 = vmatpush.msra.mxu2 %v2497_v59  ;;  %v787_v11 = vld [vmem:[#allocation2 + $0xf] sm:$0xff]  ;;  %v2556_v25 = vld [vmem:[%s5042_s5 + $0x1f8] sm:$0xff]  ;;  %v2517_v59 = vld [vmem:[%s5042_s5 + $0xc0] sm:$0xff] }
  0xd4   : > { %v597_v29 = vpop.f32.mrf.mxu0  ;;  %1049 = vmatpush.msra.mxu1 %v2487_v54  ;;  %1214 = vmatpush.msra.mxu0 %v1175_v24  ;;  %v1169_v54 = vld [vmem:[%s5042_s5 + $0x48] sm:$0xff]  ;;  %v1162_v24 = vld [vmem:[%s5042_s5 + $0x10] sm:$0xff] }
  0xd5   : > { %v598_v30 = vadd.f32 %v3463_v31, %v597_v29  ;;  %1115 = vmatpush.msra.mxu2 %v2496_v63  ;;  %v2555_v29 = vld [vmem:[%s5042_s5 + $0x1f0] sm:$0xff]  ;;  %v1167_v63 = vld [vmem:[%s5042_s5 + $0x38] sm:$0xff] }
  0xd6   : > { %1215 = vmatpush.msra.mxu0 %v1174_v28  ;;  %v2510_v28 = vld [vmem:[%s5042_s5 + $0x88] sm:$0xff] }
  0xd7   : > { %v3620_v33 = vmax.f32 %v598_v30, 0.0  ;;  %1116 = vmatpush.msra.mxu2 %v2495_v1  ;;  %v2571_v30 = vld [vmem:[%s5042_s5 + $0x270] sm:$0xff]  ;;  %v2564_v1 = vld [vmem:[%s5042_s5 + $0x238] sm:$0xff] }
  0xd8   : > { %v3625_v35 = vld [vmem:[#allocation2 + $0x11] sm:$0xff]  ;;  %1216 = vmatpush.msra.mxu0 %v1173_v34 }
  0xd9   : > { %v729_v36 = vld [vmem:[#allocation2 + $0x12] sm:$0xff]  ;;  %617 = vst [vmem:[#allocation2 + $0x20] sm:$0xff] %v3620_v33  ;;  %685 = vmatmul.f32.gmra.mxu1 %v3625_v35  ;;  %723 = vmatmul.f32.gmra.mxu2 %v3620_v33 }
  0xda   : > { %v964_v37 = vld [vmem:[#allocation2 + $0x16] sm:$0xff]  ;;  %771 = vmatmul.f32.gmra.mxu3 %v729_v36  ;;  %1117 = vmatpush.msra.mxu2 %v2494_v5 }
  0xdb   : > { %1004 = vmatmul.f32.gmra.mxu0 %v964_v37  ;;  %v788_v15 = vld [vmem:[#allocation2 + $0x17] sm:$0xff]  ;;  %v2570_v37 = vld [vmem:[%s5042_s5 + $0x268] sm:$0xff] }
  0xdc   : > { %v600_v41 = vpop.f32.mrf.mxu0  ;;  %1118 = vmatpush.msra.mxu2 %v2493_v8  ;;  %1217 = vmatpush.msra.mxu0 %v1172_v40  ;;  %v2563_v5 = vld [vmem:[%s5042_s5 + $0x230] sm:$0xff]  ;;  %v2557_v40 = vld [vmem:[%s5042_s5 + $0x200] sm:$0xff] }
  0xdd   : > { %v601_v44 = vadd.f32 %v3463_v31, %v600_v41  ;;  %v2553_v41 = vld [vmem:[%s5042_s5 + $0x1e0] sm:$0xff] }
  0xdf   : > { %v3646_v45 = vmax.f32 %v601_v44, 0.0  ;;  %v1171_v44 = vld [vmem:[%s5042_s5 + $0x58] sm:$0xff] }
  0xe0   : > { %v3654_v48 = vld [vmem:[#allocation2 + $0x19] sm:$0xff]  ;;  %1218 = vmatpush.msra.mxu0 %v1171_v44 }
  0xe1   : > { %v730_v49 = vld [vmem:[#allocation2 + $0x1a] sm:$0xff]  ;;  %618 = vst [vmem:[#allocation2 + $0x28] sm:$0xff] %v3646_v45  ;;  %688 = vmatmul.f32.gmra.mxu1 %v3654_v48  ;;  %883 = vmatmul.f32.vlgmr.msrb.gmra.mxu2 %v3530_v58  ;;  %v2486_v58 = vld [vmem:[%s5040_s3 + $0x3c8] sm:$0xff] }
  0xe2   : > { %v965_v50 = vld [vmem:[#allocation2 + $0x1e] sm:$0xff]  ;;  %774 = vmatmul.f32.gmra.mxu3 %v730_v49  ;;  %1050 = vmatpush.msra.mxu1 %v2486_v58  ;;  %v2551_v49 = vld [vmem:[%s5042_s5 + $0x1d0] sm:$0xff] }
  0xe3   : > { %1007 = vmatmul.f32.gmra.mxu0 %v965_v50  ;;  %v789_v16 = vld [vmem:[#allocation2 + $0x1f] sm:$0xff]  ;;  %1330 = vmatpush.msrb.mxu2 %v2572_v26  ;;  %v2567_v50 = vld [vmem:[%s5042_s5 + $0x250] sm:$0xff] }
  0xe4   : > { %v603_v53 = vpop.f32.mrf.mxu0  ;;  %v2559_v26 = vld [vmem:[%s5042_s5 + $0x210] sm:$0xff]  ;;  %v2636_v44 = vld [vmem:[%s5042_s5 + $0x478] sm:$0xff] }
  0xe5   : > { %v3672_v56 = vadd.f32 %v3463_v31, %v603_v53  ;;  %v2485_v31 = vld [vmem:[%s5040_s3 + $0x3c0] sm:$0xff]  ;;  %1331 = vmatpush.msrb.mxu2 %v2571_v30  ;;  %v2518_v53 = vld [vmem:[%s5042_s5 + $0xc8] sm:$0xff] }
  0xe6   : > { %1051 = vmatpush.msra.mxu1 %v2485_v31  ;;  %v2516_v31 = vld [vmem:[%s5042_s5 + $0xb8] sm:$0xff]  ;;  %v2542_v30 = vld [vmem:[%s5042_s5 + $0x188] sm:$0xff] }
  0xe7   : > { %v612_v57 = vmax.f32 %v3672_v56, 0.0  ;;  %1332 = vmatpush.msrb.mxu2 %v2570_v37  ;;  %v1160_v37 = vld [vmem:[%s5042_s5] sm:$0xff] }
  0xe8   : > { %v645_v60 = vld [vmem:[#allocation2 + $0x21] sm:$0xff]  ;;  %1052 = vmatpush.msra.mxu1 %v2484_v0  ;;  %v2548_v0 = vld [vmem:[%s5042_s5 + $0x1b8] sm:$0xff] }
  0xe9   : > { %v731_v61 = vld [vmem:[#allocation2 + $0x22] sm:$0xff]  ;;  %619 = vst [vmem:[#allocation2 + $0x30] sm:$0xff] %v612_v57  ;;  %691 = vmatmul.f32.gmra.mxu1 %v645_v60  ;;  %886 = vmatmul.f32.gmra.mxu2 %v3562_v6 }
  0xea   : > { %v966_v62 = vld [vmem:[#allocation2 + $0x26] sm:$0xff]  ;;  %777 = vmatmul.f32.gmra.mxu3 %v731_v61  ;;  %1053 = vmatpush.msra.mxu1 %v2483_v4  ;;  %v2547_v4 = vld [vmem:[%s5042_s5 + $0x1b0] sm:$0xff] }
  0xeb   : > { %1010 = vmatmul.f32.gmra.mxu0 %v966_v62  ;;  %v790_v17 = vld [vmem:[#allocation2 + $0x27] sm:$0xff]  ;;  %1333 = vmatpush.msrb.mxu2 %v2569_v42  ;;  %v2588_v42 = vld [vmem:[%s5042_s5 + $0x2f8] sm:$0xff] }
  0xec   : > { %1054 = vmatpush.msra.mxu1 %v2482_v7  ;;  %v2549_v61 = vld [vmem:[%s5042_s5 + $0x1c0] sm:$0xff] }
  0xed   : > { %1334 = vmatpush.msrb.mxu2 %v2568_v46  ;;  %v2565_v62 = vld [vmem:[%s5042_s5 + $0x240] sm:$0xff]  ;;  %v2587_v46 = vld [vmem:[%s5042_s5 + $0x2f0] sm:$0xff] }
  0xee   : > { %1055 = vmatpush.msra.mxu1 %v2481_v9  ;;  %v2514_v9 = vld [vmem:[%s5042_s5 + $0xa8] sm:$0xff] }
  0xef   : > { %1335 = vmatpush.msrb.mxu2 %v2567_v50  ;;  %v2538_v50 = vld [vmem:[%s5042_s5 + $0x168] sm:$0xff] }
  0xf0   : > { %v967_v3 = vld [vmem:[#allocation2 + $0x2e] sm:$0xff]  ;;  %1056 = vmatpush.msra.mxu1 %v2480_v10 }
  0xf1   : > { %824 = vmatmul.f32.vlgmr.msrb.gmra.mxu1 %v786_v2  ;;  %889 = vmatmul.f32.gmra.mxu2 %v3594_v20  ;;  %v908_v18 = vld [vmem:[#allocation2 + $0x29] sm:$0xff] }
  0xf2   : > { %942 = vmatmul.f32.vlgmr.msrb.gmra.mxu3 %v3602_v23  ;;  %1057 = vmatpush.msra.mxu1 %v2479_v12  ;;  %v1026_v19 = vld [vmem:[#allocation2 + $0x2f] sm:$0xff] }
  0xf3   : > { %1013 = vmatmul.f32.gmra.mxu0 %v967_v3  ;;  %v2515_v2 = vld [vmem:[%s5042_s5 + $0xb0] sm:$0xff]  ;;  %v1165_v10 = vld [vmem:[%s5042_s5 + $0x28] sm:$0xff] }
  0xf4   : > { %1058 = vmatpush.msra.mxu1 %v2478_v13  ;;  %v1166_v3 = vld [vmem:[%s5042_s5 + $0x30] sm:$0xff]  ;;  %v2562_v13 = vld [vmem:[%s5042_s5 + $0x228] sm:$0xff] }
  0xf6   : > { %1059 = vmatpush.msra.mxu1 %v2477_v14 }
  0xf8   : > { %1291 = vmatpush.msrb.mxu1 %v2556_v25  ;;  %v2543_v25 = vld [vmem:[%s5042_s5 + $0x190] sm:$0xff] }
  0xf9   : > { %827 = vmatmul.f32.gmra.mxu1 %v787_v11  ;;  %892 = vmatmul.f32.gmra.mxu2 %v3620_v33 }
  0xfa   : > { %945 = vmatmul.f32.gmra.mxu3 %v3625_v35  ;;  %1292 = vmatpush.msrb.mxu1 %v2555_v29  ;;  %v2554_v35 = vld [vmem:[%s5042_s5 + $0x1e8] sm:$0xff] }
  0xfb   : > { %v1161_v29 = vld [vmem:[%s5042_s5 + $0x8] sm:$0xff] }
  0xfc   : > { %1293 = vmatpush.msrb.mxu1 %v2554_v35 }
  0xfe   : > { %1294 = vmatpush.msrb.mxu1 %v2553_v41  ;;  %v2540_v41 = vld [vmem:[%s5042_s5 + $0x178] sm:$0xff] }
 0x101   : > { %830 = vmatmul.f32.gmra.mxu1 %v788_v15  ;;  %895 = vmatmul.f32.gmra.mxu2 %v3646_v45 }
 0x102   : > { %948 = vmatmul.f32.gmra.mxu3 %v3654_v48  ;;  %v1170_v48 = vld [vmem:[%s5042_s5 + $0x50] sm:$0xff] }
 0x103   : > { %1219 = vmatpush.msra.mxu0 %v1170_v48  ;;  %v2635_v48 = vld [vmem:[%s5042_s5 + $0x470] sm:$0xff] }
 0x105   : > { %1220 = vmatpush.msra.mxu0 %v1169_v54 }
 0x109   : > { %833 = vmatmul.f32.gmra.mxu1 %v789_v16  ;;  %1119 = vmatmul.f32.vlgmr.msra.gmra.mxu2 %v3562_v6 }
 0x10a   : > { %951 = vmatmul.f32.gmra.mxu3 %v645_v60  ;;  %v1168_v60 = vld [vmem:[%s5042_s5 + $0x40] sm:$0xff] }
 0x10b   : > { %1221 = vmatpush.msra.mxu0 %v1168_v60  ;;  %v2633_v60 = vld [vmem:[%s5042_s5 + $0x460] sm:$0xff] }
 0x10d   : > { %1222 = vmatpush.msra.mxu0 %v1167_v63  ;;  %v2616_v63 = vld [vmem:[%s5042_s5 + $0x3d8] sm:$0xff] }
 0x10f   : > { %1223 = vmatpush.msra.mxu0 %v1166_v3  ;;  %v2615_v3 = vld [vmem:[%s5042_s5 + $0x3d0] sm:$0xff] }
 0x111   : > { %836 = vmatmul.f32.gmra.mxu1 %v790_v17  ;;  %1122 = vmatmul.f32.gmra.mxu2 %v3594_v20  ;;  %v2524_v20 = vld [vmem:[%s5042_s5 + $0xf8] sm:$0xff] }
 0x112   : > { %954 = vmatmul.f32.gmra.mxu3 %v908_v18  ;;  %1224 = vmatpush.msra.mxu0 %v1165_v10  ;;  %v2561_v18 = vld [vmem:[%s5042_s5 + $0x220] sm:$0xff]  ;;  %v2614_v10 = vld [vmem:[%s5042_s5 + $0x3c8] sm:$0xff] }
 0x113   : > { %1194 = vmatpush.msra.mxu3 %v2524_v20  ;;  %v2511_v20 = vld [vmem:[%s5042_s5 + $0x90] sm:$0xff] }
 0x115   : > { %1195 = vmatpush.msra.mxu3 %v2523_v27 }
 0x119   : > { %1060 = vmatmul.f32.vlgmr.msra.gmra.mxu1 %v787_v11  ;;  %1125 = vmatmul.f32.gmra.mxu2 %v3620_v33  ;;  %v2522_v33 = vld [vmem:[%s5042_s5 + $0xe8] sm:$0xff] }
 0x11a   : > { %1196 = vmatpush.msra.mxu3 %v2522_v33  ;;  %v2546_v11 = vld [vmem:[%s5042_s5 + $0x1a8] sm:$0xff] }
 0x11b   : > { %v2558_v33 = vld [vmem:[%s5042_s5 + $0x208] sm:$0xff] }
 0x11c   : > { %1197 = vmatpush.msra.mxu3 %v2521_v39  ;;  %v2541_v39 = vld [vmem:[%s5042_s5 + $0x180] sm:$0xff] }
 0x11e   : > { %1198 = vmatpush.msra.mxu3 %v2520_v43  ;;  %v2620_v43 = vld [vmem:[%s5042_s5 + $0x3f8] sm:$0xff] }
 0x120   : > { %1199 = vmatpush.msra.mxu3 %v2519_v47  ;;  %v2619_v47 = vld [vmem:[%s5042_s5 + $0x3f0] sm:$0xff] }
 0x121   : > { %1063 = vmatmul.f32.gmra.mxu1 %v788_v15  ;;  %1128 = vmatmul.f32.gmra.mxu2 %v3646_v45  ;;  %v2552_v45 = vld [vmem:[%s5042_s5 + $0x1d8] sm:$0xff]  ;;  %v2513_v15 = vld [vmem:[%s5042_s5 + $0xa0] sm:$0xff] }
 0x122   : > { %1295 = vmatpush.msrb.mxu1 %v2552_v45  ;;  %1200 = vmatpush.msra.mxu3 %v2518_v53  ;;  %v2539_v45 = vld [vmem:[%s5042_s5 + $0x170] sm:$0xff]  ;;  %v2618_v53 = vld [vmem:[%s5042_s5 + $0x3e8] sm:$0xff] }
 0x124   : > { %1296 = vmatpush.msrb.mxu1 %v2551_v49  ;;  %1201 = vmatpush.msra.mxu3 %v2517_v59  ;;  %v2617_v59 = vld [vmem:[%s5042_s5 + $0x3e0] sm:$0xff] }
 0x126   : > { %1297 = vmatpush.msrb.mxu1 %v2550_v55  ;;  %1202 = vmatpush.msra.mxu3 %v2516_v31  ;;  %v2634_v55 = vld [vmem:[%s5042_s5 + $0x468] sm:$0xff] }
 0x128   : > { %1298 = vmatpush.msrb.mxu1 %v2549_v61  ;;  %1203 = vmatpush.msra.mxu3 %v2515_v2  ;;  %v2536_v61 = vld [vmem:[%s5042_s5 + $0x158] sm:$0xff]  ;;  %v2583_v2 = vld [vmem:[%s5042_s5 + $0x2d0] sm:$0xff] }
 0x129   : > { %1066 = vmatmul.f32.gmra.mxu1 %v789_v16  ;;  %1131 = vmatmul.f32.gmra.mxu2 %v612_v57  ;;  %v2566_v57 = vld [vmem:[%s5042_s5 + $0x248] sm:$0xff]  ;;  %v1164_v16 = vld [vmem:[%s5042_s5 + $0x20] sm:$0xff] }
 0x12a   : > { %1336 = vmatpush.msrb.mxu2 %v2566_v57  ;;  %1299 = vmatpush.msrb.mxu1 %v2548_v0  ;;  %v2585_v57 = vld [vmem:[%s5042_s5 + $0x2e0] sm:$0xff]  ;;  %v2632_v0 = vld [vmem:[%s5042_s5 + $0x458] sm:$0xff] }
 0x12b   : > { %1204 = vmatpush.msra.mxu3 %v2514_v9  ;;  %1225 = vmatpush.msra.mxu0 %v1164_v16  ;;  %v2582_v9 = vld [vmem:[%s5042_s5 + $0x2c8] sm:$0xff]  ;;  %v2613_v16 = vld [vmem:[%s5042_s5 + $0x3c0] sm:$0xff] }
 0x12c   : > { %1337 = vmatpush.msrb.mxu2 %v2565_v62  ;;  %1300 = vmatpush.msrb.mxu1 %v2547_v4  ;;  %v2584_v62 = vld [vmem:[%s5042_s5 + $0x2d8] sm:$0xff]  ;;  %v2631_v4 = vld [vmem:[%s5042_s5 + $0x450] sm:$0xff] }
 0x12d   : > { %1205 = vmatpush.msra.mxu3 %v2513_v15  ;;  %v2581_v15 = vld [vmem:[%s5042_s5 + $0x2c0] sm:$0xff] }
 0x12e   : > { %1338 = vmatpush.msrb.mxu2 %v2564_v1  ;;  %1301 = vmatpush.msrb.mxu1 %v2546_v11  ;;  %v2535_v1 = vld [vmem:[%s5042_s5 + $0x150] sm:$0xff] }
 0x130   : > { %1339 = vmatpush.msrb.mxu2 %v2563_v5 }
 0x131   : > { %1069 = vmatmul.f32.gmra.mxu1 %v790_v17  ;;  %v2545_v17 = vld [vmem:[%s5042_s5 + $0x1a0] sm:$0xff] }
 0x132   : > { %1340 = vmatpush.msrb.mxu2 %v2562_v13  ;;  %1302 = vmatpush.msrb.mxu1 %v2545_v17  ;;  %v2533_v13 = vld [vmem:[%s5042_s5 + $0x140] sm:$0xff] }
 0x133   : > { %v2629_v17 = vld [vmem:[%s5042_s5 + $0x440] sm:$0xff] }
 0x134   : > { %1341 = vmatpush.msrb.mxu2 %v2561_v18  ;;  %v2532_v18 = vld [vmem:[%s5042_s5 + $0x138] sm:$0xff] }
 0x139   : > { %1072 = vmatmul.f32.gmra.mxu1 %v1026_v19  ;;  %v2512_v19 = vld [vmem:[%s5042_s5 + $0x98] sm:$0xff] }
 0x13a   : > { %1206 = vmatpush.msra.mxu3 %v2512_v19  ;;  %v2580_v19 = vld [vmem:[%s5042_s5 + $0x2b8] sm:$0xff] }
 0x13c   : > { %v712_v6 = vpop.f32.mrf.mxu2  ;;  %1207 = vmatpush.msra.mxu3 %v2511_v20  ;;  %v2531_v20 = vld [vmem:[%s5042_s5 + $0x130] sm:$0xff] }
 0x13e   : > { %1208 = vmatpush.msra.mxu3 %v2510_v28 }
 0x144   : > { %v715_v21 = vpop.f32.mrf.mxu2 }
 0x146   : > { %v680_v22 = vpop.f32.mrf.mxu1 }
 0x147   : > { %v3735_v23 = vadd.f32 %v712_v6, %v680_v22  ;;  %v1163_v6 = vld [vmem:[%s5042_s5 + $0x18] sm:$0xff] }
 0x148   : > { %v2560_v22 = vld [vmem:[%s5042_s5 + $0x218] sm:$0xff]  ;;  %1226 = vmatpush.msra.mxu0 %v1163_v6 }
 0x149   : > { %1342 = vmatpush.msrb.mxu2 %v2560_v22  ;;  %v2612_v6 = vld [vmem:[%s5042_s5 + $0x3b8] sm:$0xff] }
 0x14a   : > { %1227 = vmatpush.msra.mxu0 %v1162_v24  ;;  %v2579_v24 = vld [vmem:[%s5042_s5 + $0x2b0] sm:$0xff] }
 0x14b   : > { %1343 = vmatpush.msrb.mxu2 %v2559_v26  ;;  %v2627_v26 = vld [vmem:[%s5042_s5 + $0x430] sm:$0xff] }
 0x14c   : > { %v718_v32 = vpop.f32.mrf.mxu2  ;;  %1228 = vmatpush.msra.mxu0 %v1161_v29  ;;  %v2530_v29 = vld [vmem:[%s5042_s5 + $0x128] sm:$0xff] }
 0x14d   : > { %v3811_v51 = vpop.f32.mrf.mxu3  ;;  %1344 = vmatpush.msrb.mxu2 %v2558_v33 }
 0x14e   : > { %v683_v36 = vpop.f32.mrf.mxu1  ;;  %1229 = vmatpush.msra.mxu0 %v1160_v37  ;;  %v2529_v37 = vld [vmem:[%s5042_s5 + $0x120] sm:$0xff] }
 0x14f   : > { %v3773_v38 = vadd.f32 %v715_v21, %v683_v36  ;;  %v2544_v21 = vld [vmem:[%s5042_s5 + $0x198] sm:$0xff]  ;;  %v2509_v36 = vld [vmem:[%s5042_s5 + $0x80] sm:$0xff]  ;;  %1345 = vmatpush.msrb.mxu2 %v2557_v40 }
 0x150   : > { %1303 = vmatpush.msrb.mxu1 %v2544_v21  ;;  %1209 = vmatpush.msra.mxu3 %v2509_v36  ;;  %v2628_v21 = vld [vmem:[%s5042_s5 + $0x438] sm:$0xff]  ;;  %v2626_v36 = vld [vmem:[%s5042_s5 + $0x428] sm:$0xff]  ;;  %v2609_v40 = vld [vmem:[%s5042_s5 + $0x3a0] sm:$0xff] }
 0x151   : > { %1369 = vmatpush.msrb.mxu0 %v2588_v42  ;;  %1486 = vmatpush.msra.mxu2 %v2636_v44  ;;  %v2528_v42 = vld [vmem:[%s5042_s5 + $0x118] sm:$0xff] }
 0x152   : > { %1304 = vmatpush.msrb.mxu1 %v2543_v25  ;;  %1252 = vmatpush.msrb.mxu3 %v2540_v41  ;;  %v2611_v25 = vld [vmem:[%s5042_s5 + $0x3b0] sm:$0xff]  ;;  %v2625_v41 = vld [vmem:[%s5042_s5 + $0x420] sm:$0xff]  ;;  %v2608_v44 = vld [vmem:[%s5042_s5 + $0x398] sm:$0xff] }
 0x153   : > { %1370 = vmatpush.msrb.mxu0 %v2587_v46  ;;  %1487 = vmatpush.msra.mxu2 %v2635_v48  ;;  %v2527_v46 = vld [vmem:[%s5042_s5 + $0x110] sm:$0xff] }
 0x154   : > { %v721_v52 = vpop.f32.mrf.mxu2  ;;  %1305 = vmatpush.msrb.mxu1 %v2542_v30  ;;  %1253 = vmatpush.msrb.mxu3 %v2539_v45  ;;  %v2578_v30 = vld [vmem:[%s5042_s5 + $0x2a8] sm:$0xff]  ;;  %v2624_v45 = vld [vmem:[%s5042_s5 + $0x418] sm:$0xff]  ;;  %v2607_v48 = vld [vmem:[%s5042_s5 + $0x390] sm:$0xff] }
 0x155   : > { %v3863_v7 = vpop.f32.mrf.mxu3  ;;  %1488 = vmatpush.msra.mxu2 %v2634_v55  ;;  %v2574_v55 = vld [vmem:[%s5042_s5 + $0x288] sm:$0xff] }
 0x156   : > { %v686_v56 = vpop.f32.mrf.mxu1  ;;  %1306 = vmatpush.msrb.mxu1 %v2541_v39  ;;  %1254 = vmatpush.msrb.mxu3 %v2538_v50  ;;  %v2577_v39 = vld [vmem:[%s5042_s5 + $0x2a0] sm:$0xff]  ;;  %v2623_v50 = vld [vmem:[%s5042_s5 + $0x410] sm:$0xff] }
 0x157   : > { %v3825_v58 = vadd.f32 %v718_v32, %v686_v56  ;;  %v2537_v56 = vld [vmem:[%s5042_s5 + $0x160] sm:$0xff]  ;;  %1489 = vmatpush.msra.mxu2 %v2633_v60  ;;  %v2622_v60 = vld [vmem:[%s5042_s5 + $0x408] sm:$0xff] }
 0x158   : > { %1447 = vmatpush.msra.mxu1 %v2620_v43  ;;  %1255 = vmatpush.msrb.mxu3 %v2537_v56  ;;  %v2576_v43 = vld [vmem:[%s5042_s5 + $0x298] sm:$0xff]  ;;  %v2606_v56 = vld [vmem:[%s5042_s5 + $0x388] sm:$0xff] }
 0x159   : > { %1490 = vmatpush.msra.mxu2 %v2632_v0  ;;  %v2621_v0 = vld [vmem:[%s5042_s5 + $0x400] sm:$0xff] }
 0x15a   : > { %1448 = vmatpush.msra.mxu1 %v2619_v47  ;;  %1256 = vmatpush.msrb.mxu3 %v2536_v61  ;;  %v2575_v47 = vld [vmem:[%s5042_s5 + $0x290] sm:$0xff]  ;;  %v2525_v61 = vld [vmem:[%s5042_s5 + $0x100] sm:$0xff] }
 0x15b   : > { %1491 = vmatpush.msra.mxu2 %v2631_v4 }
 0x15c   : > { %v724_v8 = vpop.f32.mrf.mxu2  ;;  %1449 = vmatpush.msra.mxu1 %v2618_v53  ;;  %1257 = vmatpush.msrb.mxu3 %v2535_v1  ;;  %v2526_v53 = vld [vmem:[%s5042_s5 + $0x108] sm:$0xff]  ;;  %v781_v1 = vadd.f32 %v3811_v51, %v3735_v23 }
 0x15d   : > { %v3929_v34 = vpop.f32.mrf.mxu3 }
 0x15e   : > { %v689_v12 = vpop.f32.mrf.mxu1  ;;  %1450 = vmatpush.msra.mxu1 %v2617_v59 }
 0x15f   : > { %v3877_v14 = vadd.f32 %v721_v52, %v689_v12  ;;  %v2586_v52 = vld [vmem:[%s5042_s5 + $0x2e8] sm:$0xff] }
 0x160   : > { %1371 = vmatpush.msrb.mxu0 %v2586_v52  ;;  %1451 = vmatpush.msra.mxu1 %v2616_v63  ;;  %v2630_v12 = vld [vmem:[%s5042_s5 + $0x448] sm:$0xff]  ;;  %v2605_v63 = vld [vmem:[%s5042_s5 + $0x380] sm:$0xff] }
 0x161   : > { %1492 = vmatpush.msra.mxu2 %v2630_v12  ;;  %v782_v12 = vadd.f32 %v3863_v7, %v3773_v38 }
 0x162   : > { %1372 = vmatpush.msrb.mxu0 %v2585_v57  ;;  %1452 = vmatpush.msra.mxu1 %v2615_v3  ;;  %v1002_v3 = vpop.f32.mrf.mxu0 }
 0x163   : > { %1493 = vmatpush.msra.mxu2 %v2629_v17 }
 0x164   : > { %v3915_v27 = vpop.f32.mrf.mxu2  ;;  %1373 = vmatpush.msrb.mxu0 %v2584_v62  ;;  %1453 = vmatpush.msra.mxu1 %v2614_v10  ;;  %v2573_v62 = vld [vmem:[%s5042_s5 + $0x280] sm:$0xff] }
 0x165   : > { %v4003_v31 = vpop.f32.mrf.mxu3  ;;  %1494 = vmatpush.msra.mxu2 %v2628_v21 }
 0x166   : > { %v692_v32 = vpop.f32.mrf.mxu1  ;;  %1374 = vmatpush.msrb.mxu0 %v2583_v2  ;;  %1454 = vmatpush.msra.mxu1 %v2613_v16 }
 0x167   : > { %v3931_v35 = vadd.f32 %v724_v8, %v692_v32  ;;  %v2534_v8 = vld [vmem:[%s5042_s5 + $0x148] sm:$0xff]  ;;  %1495 = vmatpush.msra.mxu2 %v2627_v26 }
 0x168   : > { %1258 = vmatpush.msrb.mxu3 %v2534_v8  ;;  %1375 = vmatpush.msrb.mxu0 %v2582_v9  ;;  %v2610_v32 = vld [vmem:[%s5042_s5 + $0x3a8] sm:$0xff] }
 0x169   : > { %1455 = vmatpush.msra.mxu1 %v2612_v6  ;;  %1496 = vmatpush.msra.mxu2 %v2626_v36 }
 0x16a   : > { %1259 = vmatpush.msrb.mxu3 %v2533_v13  ;;  %1376 = vmatpush.msrb.mxu0 %v2581_v15  ;;  %v1005_v17 = vpop.f32.mrf.mxu0 }
 0x16b   : > { %1456 = vmatpush.msra.mxu1 %v2611_v25  ;;  %1497 = vmatpush.msra.mxu2 %v2625_v41  ;;  %v2604_v41 = vld [vmem:[%s5042_s5 + $0x378] sm:$0xff] }
 0x16c   : > { %v3969_v49 = vpop.f32.mrf.mxu2  ;;  %1260 = vmatpush.msrb.mxu3 %v2532_v18  ;;  %1377 = vmatpush.msrb.mxu0 %v2580_v19 }
 0x16d   : > { %v4063_v22 = vpop.f32.mrf.mxu3  ;;  %1457 = vmatpush.msra.mxu1 %v2610_v32  ;;  %1498 = vmatpush.msra.mxu2 %v2624_v45 }
 0x16e   : > { %v3980_v54 = vpop.f32.mrf.mxu1  ;;  %1261 = vmatpush.msrb.mxu3 %v2531_v20  ;;  %1378 = vmatpush.msrb.mxu0 %v2579_v24 }
 0x16f   : > { %1458 = vmatpush.msra.mxu1 %v2609_v40  ;;  %1499 = vmatpush.msra.mxu2 %v2623_v50  ;;  %v840_v2 = vadd.f32 %v3980_v54, %v781_v1  ;;  %v4168_v54 = vld [vmem:[%s5041_s4] ss:$0 sm:$0xff]  ;;  %v2603_v50 = vld [vmem:[%s5042_s5 + $0x370] sm:$0xff] }
 0x170   : > { %1262 = vmatpush.msrb.mxu3 %v2530_v29  ;;  %1379 = vmatpush.msrb.mxu0 %v2578_v30  ;;  %v784_v30 = vadd.f32 %v4003_v31, %v3877_v14  ;;  %v2601_v1 = vld [vmem:[%s5042_s5 + $0x360] sm:$0xff] }
 0x171   : > { %1459 = vmatpush.msra.mxu1 %v2608_v44  ;;  %1500 = vmatpush.msra.mxu2 %v2622_v60  ;;  %v899_v8 = vadd.f32 %v3915_v27, %v840_v2  ;;  %v783_v27 = vadd.f32 %v3929_v34, %v3825_v58  ;;  %v2649_v2 = vld [vmem:[%s5042_s5 + $0x4e0] sm:$0xff] }
 0x172   : > { %1263 = vmatpush.msrb.mxu3 %v2529_v37  ;;  %1380 = vmatpush.msrb.mxu0 %v2577_v39  ;;  %v1008_v29 = vpop.f32.mrf.mxu0 }
 0x173   : > { %1460 = vmatpush.msra.mxu1 %v2607_v48  ;;  %1501 = vmatpush.msra.mxu2 %v2621_v0  ;;  %v2700_v48 = vld [vmem:[%s5042_s5 + $0x678] sm:$0xff]  ;;  %v2698_v0 = vld [vmem:[%s5042_s5 + $0x668] sm:$0xff] }
 0x174   : > { %v4023_v5 = vpop.f32.mrf.mxu2  ;;  %1264 = vmatpush.msrb.mxu3 %v2528_v42  ;;  %1381 = vmatpush.msrb.mxu0 %v2576_v43 }
 0x175   : > { %v943_v52 = vpop.f32.mrf.mxu3  ;;  %1461 = vmatpush.msra.mxu1 %v2606_v56  ;;  %v2683_v56 = vld [vmem:[%s5042_s5 + $0x5f0] sm:$0xff] }
 0x176   : > { %v4034_v11 = vpop.f32.mrf.mxu1  ;;  %1265 = vmatpush.msrb.mxu3 %v2527_v46  ;;  %1382 = vmatpush.msrb.mxu0 %v2575_v47  ;;  %v958_v13 = vadd.f32 %v943_v52, %v899_v8  ;;  %v2684_v47 = vld [vmem:[%s5042_s5 + $0x5f8] sm:$0xff]  ;;  %v785_v52 = vadd.f32 %v4063_v22, %v3931_v35  ;;  %v2650_v35 = vld [vmem:[%s5042_s5 + $0x4e8] sm:$0xff]  ;;  %v2681_v8 = vld [vmem:[%s5042_s5 + $0x5e0] sm:$0xff] }
 0x177   : > { %1462 = vmatpush.msra.mxu1 %v2605_v63  ;;  %v841_v15 = vadd.f32 %v4034_v11, %v782_v12  ;;  %v2682_v63 = vld [vmem:[%s5042_s5 + $0x5e8] sm:$0xff] }
 0x178   : > { %1266 = vmatpush.msrb.mxu3 %v2526_v53  ;;  %1383 = vmatpush.msrb.mxu0 %v2574_v55  ;;  %v1017_v16 = vadd.f32 %v1002_v3, %v958_v13 }
 0x179   : > { %v900_v51 = vadd.f32 %v3969_v49, %v841_v15 }
 0x17a   : > { %1267 = vmatpush.msrb.mxu3 %v2525_v61  ;;  %1384 = vmatpush.msrb.mxu0 %v2573_v62  ;;  %v1011_v60 = vpop.f32.mrf.mxu0  ;;  %v2602_v61 = vld [vmem:[%s5042_s5 + $0x368] sm:$0xff] }
 0x17c   : > { %v4077_v28 = vpop.f32.mrf.mxu2 }
 0x17d   : > { %v946_v9 = vpop.f32.mrf.mxu3 }
 0x17e   : > { %v4088_v33 = vpop.f32.mrf.mxu1  ;;  %v959_v19 = vadd.f32 %v946_v9, %v900_v51  ;;  %v2697_v9 = vld [vmem:[%s5042_s5 + $0x660] sm:$0xff]  ;;  %v2648_v51 = vld [vmem:[%s5042_s5 + $0x4d8] sm:$0xff] }
 0x17f   : > { %v842_v11 = vadd.f32 %v4088_v33, %v783_v27 }
 0x180   : > { %v1018_v24 = vadd.f32 %v1005_v17, %v959_v19  ;;  %v2600_v17 = vld [vmem:[%s5042_s5 + $0x358] sm:$0xff] }
 0x181   : > { %v901_v25 = vadd.f32 %v4023_v5, %v842_v11  ;;  %v2652_v5 = vld [vmem:[%s5042_s5 + $0x4f8] sm:$0xff]  ;;  %v2599_v11 = vld [vmem:[%s5042_s5 + $0x350] sm:$0xff] }
 0x184   : > { %v4138_v59 = vpop.f32.mrf.mxu2 }
 0x185   : > { %v949_v6 = vpop.f32.mrf.mxu3 }
 0x186   : > { %v834_v57 = vpop.f32.mrf.mxu1  ;;  %v960_v58 = vadd.f32 %v949_v6, %v901_v25  ;;  %v1014_v25 = vpop.f32.mrf.mxu0 }
 0x187   : > { %v843_v32 = vadd.f32 %v834_v57, %v784_v30  ;;  %v2699_v57 = vld [vmem:[%s5042_s5 + $0x670] sm:$0xff] }
 0x188   : > { %v1019_v40 = vadd.f32 %v1008_v29, %v960_v58  ;;  %v2646_v29 = vld [vmem:[%s5042_s5 + $0x4c8] sm:$0xff] }
 0x189   : > { %v902_v44 = vadd.f32 %v4077_v28, %v843_v32  ;;  %v2651_v28 = vld [vmem:[%s5042_s5 + $0x4f0] sm:$0xff]  ;;  %v2678_v58 = vld [vmem:[%s5042_s5 + $0x5c8] sm:$0xff] }
 0x18c   : > { %v1120_v10 = vpop.f32.mrf.mxu2 }
 0x18d   : > { %v952_v36 = vpop.f32.mrf.mxu3 }
 0x18e   : > { %v4158_v4 = vpop.f32.mrf.mxu1  ;;  %v961_v53 = vadd.f32 %v952_v36, %v902_v44  ;;  %v2597_v36 = vld [vmem:[%s5042_s5 + $0x340] sm:$0xff] }
 0x18f   : > { %v844_v22 = vadd.f32 %v4158_v4, %v785_v52  ;;  %v2642_v52 = vld [vmem:[%s5042_s5 + $0x4a8] sm:$0xff] }
 0x191   : > { %v903_v15 = vadd.f32 %v4138_v59, %v844_v22  ;;  %v2640_v22 = vld [vmem:[%s5042_s5 + $0x498] sm:$0xff] }
 0x194   : > { %v1123_v7 = vpop.f32.mrf.mxu2 }
 0x195   : > { %v955_v3 = vpop.f32.mrf.mxu3 }
 0x196   : > { %v1061_v23 = vpop.f32.mrf.mxu1  ;;  %v962_v6 = vadd.f32 %v955_v3, %v903_v15  ;;  %v2687_v3 = vld [vmem:[%s5042_s5 + $0x610] sm:$0xff]  ;;  %v2669_v15 = vld [vmem:[%s5042_s5 + $0x580] sm:$0xff] }
 0x197   : > { %v1076_v18 = vadd.f32 %v1061_v23, %v1017_v16 }
 0x198   : > { %v1021_v32 = vadd.f32 %v1014_v25, %v962_v6  ;;  %v2764_v6 = vld [vmem:[%s5042_s5 + $0x878] sm:$0xff]  ;;  %v2762_v25 = vld [vmem:[%s5042_s5 + $0x868] sm:$0xff] }
 0x199   : > { %v1135_v38 = vadd.f32 %v1120_v10, %v1076_v18  ;;  %v1020_v10 = vadd.f32 %v1011_v60, %v961_v53  ;;  %v2673_v60 = vld [vmem:[%s5042_s5 + $0x5a0] sm:$0xff] }
 0x19b   : > { %v1144_v21 = vadd.f32 %v4168_v54, %v1135_v38  ;;  %v2680_v38 = vld [vmem:[%s5042_s5 + $0x5d8] sm:$0xff] }
 0x19c   : > { %v1126_v33 = vpop.f32.mrf.mxu2 }
 0x19d   : > { %v1149_v20 = vmax.f32 %v1144_v21, 0.0  ;;  %v2647_v21 = vld [vmem:[%s5042_s5 + $0x4d0] sm:$0xff] }
 0x19e   : > { %v1064_v49 = vpop.f32.mrf.mxu1 }
 0x19f   : > { %1154 = vst [vmem:[#allocation2] sm:$0xff] %v1149_v20  ;;  %v1077_v26 = vadd.f32 %v1064_v49, %v1018_v24  ;;  %v2679_v24 = vld [vmem:[%s5042_s5 + $0x5d0] sm:$0xff] }
 0x1a0   : > { %v2695_v49 = vld [vmem:[%s5042_s5 + $0x650] sm:$0xff] }
 0x1a1   : > { %v1136_v34 = vadd.f32 %v1123_v7, %v1077_v26  ;;  %v2696_v7 = vld [vmem:[%s5042_s5 + $0x658] sm:$0xff]  ;;  %v2598_v26 = vld [vmem:[%s5042_s5 + $0x348] sm:$0xff] }
 0x1a3   : > { %v1145_v37 = vadd.f32 %v4168_v54, %v1136_v34  ;;  %v2694_v34 = vld [vmem:[%s5042_s5 + $0x648] sm:$0xff] }
 0x1a4   : > { %v1129_v12 = vpop.f32.mrf.mxu2 }
 0x1a5   : > { %v1150_v39 = vmax.f32 %v1145_v37, 0.0  ;;  %v2645_v37 = vld [vmem:[%s5042_s5 + $0x4c0] sm:$0xff] }
 0x1a6   : > { %v1067_v42 = vpop.f32.mrf.mxu1  ;;  %v1176_v43 = vld [vmem:[#allocation2 + $0x1] sm:$0x1]  ;;  %v1159_v14 = vld [vmem:[#allocation2] sm:$0x1]  ;;  %v1273_v31 = vld [vmem:[#allocation2 + $0x3] sm:$0x1] }
 0x1a7   : > { %1155 = vst [vmem:[#allocation2 + $0x8] sm:$0xff] %v1150_v39  ;;  %v1078_v45 = vadd.f32 %v1067_v42, %v1019_v40  ;;  %1210 = vmatmul.f32.vlgmr.msra.gmra.mxu3 %v1176_v43  ;;  %1230 = vmatmul.f32.vlgmr.msra.gmra.mxu0 %v1159_v14  ;;  %v1312_v46 = vld [vmem:[#allocation2 + $0x4] sm:$0x1]  ;;  %v1234_v18 = vld [vmem:[#allocation2 + $0x2] sm:$0x1]  ;;  %v2596_v42 = vld [vmem:[%s5042_s5 + $0x338] sm:$0xff] }
 0x1a8   : > { %1307 = vmatmul.f32.vlgmr.msrb.gmra.mxu1 %v1273_v31  ;;  %1346 = vmatmul.f32.vlgmr.msrb.gmra.mxu2 %v1312_v46  ;;  %v1351_v27 = vld [vmem:[#allocation2 + $0x7] sm:$0x1]  ;;  %v2644_v43 = vld [vmem:[%s5042_s5 + $0x4b8] sm:$0xff]  ;;  %v2643_v46 = vld [vmem:[%s5042_s5 + $0x4b0] sm:$0xff] }
 0x1a9   : > { %v1137_v55 = vadd.f32 %v1126_v33, %v1078_v45  ;;  %1408 = vmatpush.msra.mxu3 %v2604_v41  ;;  %1525 = vmatpush.msra.mxu0 %v2652_v5  ;;  %v2677_v40 = vld [vmem:[%s5042_s5 + $0x5c0] sm:$0xff]  ;;  %v2676_v14 = vld [vmem:[%s5042_s5 + $0x5b8] sm:$0xff]  ;;  %v2595_v45 = vld [vmem:[%s5042_s5 + $0x330] sm:$0xff] }
 0x1aa   : > { %1603 = vmatpush.msrb.mxu1 %v2684_v47  ;;  %1642 = vmatpush.msrb.mxu2 %v2700_v48  ;;  %v2693_v41 = vld [vmem:[%s5042_s5 + $0x640] sm:$0xff]  ;;  %v2692_v31 = vld [vmem:[%s5042_s5 + $0x638] sm:$0xff]  ;;  %v2675_v48 = vld [vmem:[%s5042_s5 + $0x5b0] sm:$0xff] }
 0x1ab   : > { %v1146_v62 = vadd.f32 %v4168_v54, %v1137_v55  ;;  %1409 = vmatpush.msra.mxu3 %v2603_v50  ;;  %1526 = vmatpush.msra.mxu0 %v2651_v28  ;;  %v2691_v50 = vld [vmem:[%s5042_s5 + $0x630] sm:$0xff]  ;;  %v2594_v28 = vld [vmem:[%s5042_s5 + $0x328] sm:$0xff] }
 0x1ac   : > { %1604 = vmatpush.msrb.mxu1 %v2683_v56  ;;  %1643 = vmatpush.msrb.mxu2 %v2699_v57  ;;  %v1132_v39 = vpop.f32.mrf.mxu2  ;;  %v2690_v55 = vld [vmem:[%s5042_s5 + $0x628] sm:$0xff]  ;;  %v2593_v56 = vld [vmem:[%s5042_s5 + $0x320] sm:$0xff] }
 0x1ad   : > { %v1151_v4 = vmax.f32 %v1146_v62, 0.0  ;;  %1410 = vmatpush.msra.mxu3 %v2602_v61  ;;  %1527 = vmatpush.msra.mxu0 %v2650_v35  ;;  %v2641_v57 = vld [vmem:[%s5042_s5 + $0x4a0] sm:$0xff]  ;;  %v2592_v35 = vld [vmem:[%s5042_s5 + $0x318] sm:$0xff] }
 0x1ae   : > { %1605 = vmatpush.msrb.mxu1 %v2682_v63  ;;  %1644 = vmatpush.msrb.mxu2 %v2698_v0  ;;  %v1070_v13 = vpop.f32.mrf.mxu1  ;;  %v1429_v23 = vld [vmem:[#allocation2 + $0x9] sm:$0x1]  ;;  %v1468_v19 = vld [vmem:[#allocation2 + $0xa] sm:$0x1]  ;;  %v2689_v61 = vld [vmem:[%s5042_s5 + $0x620] sm:$0xff] }
 0x1af   : > { %1156 = vst [vmem:[#allocation2 + $0x10] sm:$0xff] %v1151_v4  ;;  %1411 = vmatpush.msra.mxu3 %v2601_v1  ;;  %1528 = vmatpush.msra.mxu0 %v2649_v2  ;;  %v1079_v16 = vadd.f32 %v1070_v13, %v1020_v10  ;;  %v2672_v62 = vld [vmem:[%s5042_s5 + $0x598] sm:$0xff]  ;;  %v2591_v0 = vld [vmem:[%s5042_s5 + $0x310] sm:$0xff]  ;;  %v2590_v4 = vld [vmem:[%s5042_s5 + $0x308] sm:$0xff] }
 0x1b0   : > { %1606 = vmatpush.msrb.mxu1 %v2681_v8  ;;  %1645 = vmatpush.msrb.mxu2 %v2697_v9  ;;  %v2688_v63 = vld [vmem:[%s5042_s5 + $0x618] sm:$0xff]  ;;  %v2639_v1 = vld [vmem:[%s5042_s5 + $0x490] sm:$0xff]  ;;  %v2638_v8 = vld [vmem:[%s5042_s5 + $0x488] sm:$0xff] }
 0x1b1   : > { %v1138_v59 = vadd.f32 %v1129_v12, %v1079_v16  ;;  %1268 = vmatmul.f32.vlgmr.msrb.gmra.mxu3 %v1234_v18  ;;  %1385 = vmatmul.f32.vlgmr.msrb.gmra.mxu0 %v1351_v27  ;;  %v2671_v2 = vld [vmem:[%s5042_s5 + $0x590] sm:$0xff]  ;;  %v2670_v9 = vld [vmem:[%s5042_s5 + $0x588] sm:$0xff]  ;;  %v2589_v12 = vld [vmem:[%s5042_s5 + $0x300] sm:$0xff] }
 0x1b2   : > { %1412 = vmatpush.msra.mxu3 %v2600_v17  ;;  %1463 = vmatmul.f32.vlgmr.msra.gmra.mxu1 %v1429_v23  ;;  %v2686_v10 = vld [vmem:[%s5042_s5 + $0x608] sm:$0xff]  ;;  %v2637_v13 = vld [vmem:[%s5042_s5 + $0x480] sm:$0xff]  ;;  %v2668_v17 = vld [vmem:[%s5042_s5 + $0x578] sm:$0xff] }
 0x1b3   : > { %v1147_v20 = vadd.f32 %v4168_v54, %v1138_v59  ;;  %1502 = vmatmul.f32.vlgmr.msra.gmra.mxu2 %v1468_v19  ;;  %1529 = vmatpush.msra.mxu0 %v2648_v51  ;;  %v2685_v16 = vld [vmem:[%s5042_s5 + $0x600] sm:$0xff]  ;;  %v1390_v23 = vld [vmem:[#allocation2 + $0x8] sm:$0x1]  ;;  %v1507_v51 = vld [vmem:[#allocation2 + $0xb] sm:$0x1] }
 0x1b4   : > { %1607 = vmatpush.msrb.mxu1 %v2680_v38  ;;  %1646 = vmatpush.msrb.mxu2 %v2696_v7  ;;  %v2716_v18 = vld [vmem:[%s5042_s5 + $0x6f8] sm:$0xff]  ;;  %v1585_v27 = vld [vmem:[#allocation2 + $0xf] sm:$0x1]  ;;  %v2667_v38 = vld [vmem:[%s5042_s5 + $0x570] sm:$0xff] }
 0x1b5   : > { %v1152_v30 = vmax.f32 %v1147_v20, 0.0  ;;  %1413 = vmatpush.msra.mxu3 %v2599_v11  ;;  %1530 = vmatpush.msra.mxu0 %v2647_v21  ;;  %v2748_v19 = vld [vmem:[%s5042_s5 + $0x7f8] sm:$0xff]  ;;  %v2715_v7 = vld [vmem:[%s5042_s5 + $0x6f0] sm:$0xff]  ;;  %v2666_v20 = vld [vmem:[%s5042_s5 + $0x568] sm:$0xff] }
 0x1b6   : > { %1608 = vmatpush.msrb.mxu1 %v2679_v24  ;;  %1647 = vmatpush.msrb.mxu2 %v2695_v49  ;;  %v1073_v33 = vpop.f32.mrf.mxu1  ;;  %v1624_v59 = vld [vmem:[#allocation2 + $0x10] sm:$0x1]  ;;  %v2714_v24 = vld [vmem:[%s5042_s5 + $0x6e8] sm:$0xff] }
 0x1b7   : > { %1157 = vst [vmem:[#allocation2 + $0x18] sm:$0xff] %v1152_v30  ;;  %1414 = vmatpush.msra.mxu3 %v2598_v26  ;;  %1531 = vmatpush.msra.mxu0 %v2646_v29  ;;  %v1080_v5 = vadd.f32 %v1073_v33, %v1021_v32  ;;  %v2747_v11 = vld [vmem:[%s5042_s5 + $0x7f0] sm:$0xff]  ;;  %v2746_v49 = vld [vmem:[%s5042_s5 + $0x7e8] sm:$0xff]  ;;  %v2665_v26 = vld [vmem:[%s5042_s5 + $0x560] sm:$0xff] }
 0x1b8   : > { %1609 = vmatpush.msrb.mxu1 %v2678_v58  ;;  %1648 = vmatpush.msrb.mxu2 %v2694_v34  ;;  %v2763_v21 = vld [vmem:[%s5042_s5 + $0x870] sm:$0xff]  ;;  %v2713_v29 = vld [vmem:[%s5042_s5 + $0x6e0] sm:$0xff]  ;;  %v2664_v34 = vld [vmem:[%s5042_s5 + $0x558] sm:$0xff] }
 0x1b9   : > { %1415 = vmatpush.msra.mxu3 %v2597_v36  ;;  %1532 = vmatpush.msra.mxu0 %v2645_v37  ;;  %v1139_v44 = vadd.f32 %v1132_v39, %v1080_v5  ;;  %v2745_v30 = vld [vmem:[%s5042_s5 + $0x7e0] sm:$0xff]  ;;  %v2712_v32 = vld [vmem:[%s5042_s5 + $0x6d8] sm:$0xff]  ;;  %v2663_v33 = vld [vmem:[%s5042_s5 + $0x550] sm:$0xff] }
 0x1ba   : > { %1610 = vmatpush.msrb.mxu1 %v2677_v40  ;;  %1649 = vmatpush.msrb.mxu2 %v2693_v41  ;;  %v2761_v58 = vld [vmem:[%s5042_s5 + $0x860] sm:$0xff]  ;;  %v2744_v36 = vld [vmem:[%s5042_s5 + $0x7d8] sm:$0xff]  ;;  %v2711_v39 = vld [vmem:[%s5042_s5 + $0x6d0] sm:$0xff] }
 0x1bb   : > { %1416 = vmatpush.msra.mxu3 %v2596_v42  ;;  %1533 = vmatpush.msra.mxu0 %v2644_v43  ;;  %v1148_v47 = vadd.f32 %v4168_v54, %v1139_v44  ;;  %v2674_v54 = vld [vmem:[%s5042_s5 + $0x5a8] sm:$0xff]  ;;  %v2760_v37 = vld [vmem:[%s5042_s5 + $0x858] sm:$0xff]  ;;  %v2743_v40 = vld [vmem:[%s5042_s5 + $0x7d0] sm:$0xff] }
 0x1bc   : > { %1611 = vmatpush.msrb.mxu1 %v2676_v14  ;;  %1650 = vmatpush.msrb.mxu2 %v2692_v31  ;;  %v2759_v41 = vld [vmem:[%s5042_s5 + $0x850] sm:$0xff]  ;;  %v2662_v5 = vld [vmem:[%s5042_s5 + $0x548] sm:$0xff]  ;;  %v2661_v31 = vld [vmem:[%s5042_s5 + $0x540] sm:$0xff] }
 0x1bd   : > { %v1153_v53 = vmax.f32 %v1148_v47, 0.0  ;;  %1417 = vmatpush.msra.mxu3 %v2595_v45  ;;  %1534 = vmatpush.msra.mxu0 %v2643_v46  ;;  %v2710_v42 = vld [vmem:[%s5042_s5 + $0x6c8] sm:$0xff]  ;;  %v2709_v44 = vld [vmem:[%s5042_s5 + $0x6c0] sm:$0xff]  ;;  %v2660_v47 = vld [vmem:[%s5042_s5 + $0x538] sm:$0xff] }
 0x1be   : > { %1612 = vmatpush.msrb.mxu1 %v2675_v48  ;;  %1651 = vmatpush.msrb.mxu2 %v2691_v50  ;;  %v2742_v43 = vld [vmem:[%s5042_s5 + $0x7c8] sm:$0xff]  ;;  %v2741_v45 = vld [vmem:[%s5042_s5 + $0x7c0] sm:$0xff]  ;;  %v2708_v48 = vld [vmem:[%s5042_s5 + $0x6b8] sm:$0xff] }
 0x1bf   : > { %1158 = vst [vmem:[#allocation2 + $0x20] sm:$0xff] %v1153_v53  ;;  %1418 = vmatpush.msra.mxu3 %v2594_v28  ;;  %1535 = vmatpush.msra.mxu0 %v2642_v52  ;;  %v2758_v14 = vld [vmem:[%s5042_s5 + $0x848] sm:$0xff]  ;;  %v2757_v46 = vld [vmem:[%s5042_s5 + $0x840] sm:$0xff]  ;;  %v2740_v50 = vld [vmem:[%s5042_s5 + $0x7b8] sm:$0xff] }
 0x1c0   : > { %1613 = vmatpush.msrb.mxu1 %v2674_v54  ;;  %1652 = vmatpush.msrb.mxu2 %v2690_v55  ;;  %v2756_v28 = vld [vmem:[%s5042_s5 + $0x838] sm:$0xff]  ;;  %v2659_v52 = vld [vmem:[%s5042_s5 + $0x530] sm:$0xff] }
 0x1c1   : > { %1419 = vmatpush.msra.mxu3 %v2593_v56  ;;  %1536 = vmatpush.msra.mxu0 %v2641_v57  ;;  %v2707_v53 = vld [vmem:[%s5042_s5 + $0x6b0] sm:$0xff]  ;;  %v2658_v56 = vld [vmem:[%s5042_s5 + $0x528] sm:$0xff] }
 0x1c2   : > { %1614 = vmatpush.msrb.mxu1 %v2673_v60  ;;  %1653 = vmatpush.msrb.mxu2 %v2689_v61  ;;  %v2739_v54 = vld [vmem:[%s5042_s5 + $0x7b0] sm:$0xff]  ;;  %v2706_v57 = vld [vmem:[%s5042_s5 + $0x6a8] sm:$0xff] }
 0x1c3   : > { %1420 = vmatpush.msra.mxu3 %v2592_v35  ;;  %1537 = vmatpush.msra.mxu0 %v2640_v22  ;;  %v2755_v55 = vld [vmem:[%s5042_s5 + $0x830] sm:$0xff]  ;;  %v2738_v60 = vld [vmem:[%s5042_s5 + $0x7a8] sm:$0xff]  ;;  %v2657_v35 = vld [vmem:[%s5042_s5 + $0x520] sm:$0xff] }
 0x1c4   : > { %1615 = vmatpush.msrb.mxu1 %v2672_v62  ;;  %1654 = vmatpush.msrb.mxu2 %v2688_v63  ;;  %v2754_v61 = vld [vmem:[%s5042_s5 + $0x828] sm:$0xff]  ;;  %v2705_v22 = vld [vmem:[%s5042_s5 + $0x6a0] sm:$0xff] }
 0x1c5   : > { %1421 = vmatpush.msra.mxu3 %v2591_v0  ;;  %1538 = vmatpush.msra.mxu0 %v2639_v1  ;;  %v2737_v62 = vld [vmem:[%s5042_s5 + $0x7a0] sm:$0xff]  ;;  %v2656_v0 = vld [vmem:[%s5042_s5 + $0x518] sm:$0xff] }
 0x1c6   : > { %1616 = vmatpush.msrb.mxu1 %v2671_v2  ;;  %1655 = vmatpush.msrb.mxu2 %v2687_v3  ;;  %v2753_v63 = vld [vmem:[%s5042_s5 + $0x820] sm:$0xff]  ;;  %v2704_v1 = vld [vmem:[%s5042_s5 + $0x698] sm:$0xff] }
 0x1c7   : > { %1422 = vmatpush.msra.mxu3 %v2590_v4  ;;  %1539 = vmatpush.msra.mxu0 %v2638_v8  ;;  %v2736_v2 = vld [vmem:[%s5042_s5 + $0x798] sm:$0xff]  ;;  %v2655_v4 = vld [vmem:[%s5042_s5 + $0x510] sm:$0xff] }
 0x1c8   : > { %1617 = vmatpush.msrb.mxu1 %v2670_v9  ;;  %1656 = vmatpush.msrb.mxu2 %v2686_v10  ;;  %v2752_v3 = vld [vmem:[%s5042_s5 + $0x818] sm:$0xff]  ;;  %v2703_v8 = vld [vmem:[%s5042_s5 + $0x690] sm:$0xff] }
 0x1c9   : > { %1423 = vmatpush.msra.mxu3 %v2589_v12  ;;  %1540 = vmatpush.msra.mxu0 %v2637_v13  ;;  %v2735_v9 = vld [vmem:[%s5042_s5 + $0x790] sm:$0xff]  ;;  %v2654_v12 = vld [vmem:[%s5042_s5 + $0x508] sm:$0xff] }
 0x1ca   : > { %1618 = vmatpush.msrb.mxu1 %v2669_v15  ;;  %1657 = vmatpush.msrb.mxu2 %v2685_v16  ;;  %v2751_v10 = vld [vmem:[%s5042_s5 + $0x810] sm:$0xff]  ;;  %v2702_v13 = vld [vmem:[%s5042_s5 + $0x688] sm:$0xff] }
 0x1cb   : > { %1424 = vmatmul.f32.vlgmr.msra.gmra.mxu3 %v1390_v23  ;;  %1541 = vmatmul.f32.vlgmr.msra.gmra.mxu0 %v1507_v51  ;;  %v2734_v15 = vld [vmem:[%s5042_s5 + $0x788] sm:$0xff]  ;;  %v2701_v23 = vld [vmem:[%s5042_s5 + $0x680] sm:$0xff] }
 0x1cc   : > { %1564 = vmatpush.msrb.mxu3 %v2668_v17  ;;  %1619 = vmatmul.f32.vlgmr.msrb.gmra.mxu1 %v1585_v27  ;;  %v2750_v16 = vld [vmem:[%s5042_s5 + $0x808] sm:$0xff]  ;;  %v2653_v17 = vld [vmem:[%s5042_s5 + $0x500] sm:$0xff]  ;;  %v2732_v27 = vld [vmem:[%s5042_s5 + $0x778] sm:$0xff] }
 0x1cd   : > { %1658 = vmatmul.f32.vlgmr.msrb.gmra.mxu2 %v1624_v59  ;;  %1681 = vmatpush.msrb.mxu0 %v2716_v18  ;;  %v2733_v51 = vld [vmem:[%s5042_s5 + $0x780] sm:$0xff]  ;;  %v2780_v59 = vld [vmem:[%s5042_s5 + $0x8f8] sm:$0xff] }
 0x1ce   : > { %1759 = vmatpush.msra.mxu1 %v2748_v19  ;;  %1798 = vmatpush.msra.mxu2 %v2764_v6  ;;  %v2749_v18 = vld [vmem:[%s5042_s5 + $0x800] sm:$0xff]  ;;  %v1546_v19 = vld [vmem:[#allocation2 + $0xe] sm:$0x1]  ;;  %v1663_v6 = vld [vmem:[#allocation2 + $0x11] sm:$0x1] }
 0x1cf   : > { %1565 = vmatpush.msrb.mxu3 %v2667_v38  ;;  %1682 = vmatpush.msrb.mxu0 %v2715_v7  ;;  %v1741_v38 = vld [vmem:[#allocation2 + $0x15] sm:$0x1]  ;;  %v2812_v7 = vld [vmem:[%s5042_s5 + $0x9f8] sm:$0xff] }
 0x1d0   : > { %1760 = vmatpush.msra.mxu1 %v2747_v11  ;;  %1799 = vmatpush.msra.mxu2 %v2763_v21  ;;  %v2828_v11 = vld [vmem:[%s5042_s5 + $0xa78] sm:$0xff]  ;;  %v1780_v21 = vld [vmem:[#allocation2 + $0x16] sm:$0x1] }
 0x1d1   : > { %1566 = vmatpush.msrb.mxu3 %v2666_v20  ;;  %1683 = vmatpush.msrb.mxu0 %v2714_v24  ;;  %v2731_v20 = vld [vmem:[%s5042_s5 + $0x770] sm:$0xff] }
 0x1d2   : > { %1761 = vmatpush.msra.mxu1 %v2746_v49  ;;  %1800 = vmatpush.msra.mxu2 %v2762_v25  ;;  %v2779_v24 = vld [vmem:[%s5042_s5 + $0x8f0] sm:$0xff] }
 0x1d3   : > { %1567 = vmatpush.msrb.mxu3 %v2665_v26  ;;  %1684 = vmatpush.msrb.mxu0 %v2713_v29  ;;  %v2811_v49 = vld [vmem:[%s5042_s5 + $0x9f0] sm:$0xff]  ;;  %v2730_v26 = vld [vmem:[%s5042_s5 + $0x768] sm:$0xff] }
 0x1d4   : > { %1762 = vmatpush.msra.mxu1 %v2745_v30  ;;  %1801 = vmatpush.msra.mxu2 %v2761_v58  ;;  %v2827_v25 = vld [vmem:[%s5042_s5 + $0xa70] sm:$0xff]  ;;  %v2778_v29 = vld [vmem:[%s5042_s5 + $0x8e8] sm:$0xff] }
 0x1d5   : > { %1568 = vmatpush.msrb.mxu3 %v2664_v34  ;;  %1685 = vmatpush.msrb.mxu0 %v2712_v32  ;;  %v2810_v30 = vld [vmem:[%s5042_s5 + $0x9e8] sm:$0xff]  ;;  %v2729_v34 = vld [vmem:[%s5042_s5 + $0x760] sm:$0xff] }
 0x1d6   : > { %1763 = vmatpush.msra.mxu1 %v2744_v36  ;;  %1802 = vmatpush.msra.mxu2 %v2760_v37  ;;  %v2826_v58 = vld [vmem:[%s5042_s5 + $0xa68] sm:$0xff]  ;;  %v2777_v32 = vld [vmem:[%s5042_s5 + $0x8e0] sm:$0xff] }
 0x1d7   : > { %1569 = vmatpush.msrb.mxu3 %v2663_v33  ;;  %1686 = vmatpush.msrb.mxu0 %v2711_v39  ;;  %v2809_v36 = vld [vmem:[%s5042_s5 + $0x9e0] sm:$0xff]  ;;  %v2728_v33 = vld [vmem:[%s5042_s5 + $0x758] sm:$0xff] }
 0x1d8   : > { %1764 = vmatpush.msra.mxu1 %v2743_v40  ;;  %1803 = vmatpush.msra.mxu2 %v2759_v41  ;;  %v2825_v37 = vld [vmem:[%s5042_s5 + $0xa60] sm:$0xff]  ;;  %v2776_v39 = vld [vmem:[%s5042_s5 + $0x8d8] sm:$0xff] }
 0x1d9   : > { %1570 = vmatpush.msrb.mxu3 %v2662_v5  ;;  %1687 = vmatpush.msrb.mxu0 %v2710_v42  ;;  %v2808_v40 = vld [vmem:[%s5042_s5 + $0x9d8] sm:$0xff]  ;;  %v2727_v5 = vld [vmem:[%s5042_s5 + $0x750] sm:$0xff] }
 0x1da   : > { %1765 = vmatpush.msra.mxu1 %v2742_v43  ;;  %1804 = vmatpush.msra.mxu2 %v2758_v14  ;;  %v2824_v41 = vld [vmem:[%s5042_s5 + $0xa58] sm:$0xff]  ;;  %v2775_v42 = vld [vmem:[%s5042_s5 + $0x8d0] sm:$0xff] }
 0x1db   : > { %1571 = vmatpush.msrb.mxu3 %v2661_v31  ;;  %1688 = vmatpush.msrb.mxu0 %v2709_v44  ;;  %v2807_v43 = vld [vmem:[%s5042_s5 + $0x9d0] sm:$0xff]  ;;  %v2726_v31 = vld [vmem:[%s5042_s5 + $0x748] sm:$0xff] }
 0x1dc   : > { %1766 = vmatpush.msra.mxu1 %v2741_v45  ;;  %1805 = vmatpush.msra.mxu2 %v2757_v46  ;;  %v2823_v14 = vld [vmem:[%s5042_s5 + $0xa50] sm:$0xff]  ;;  %v2774_v44 = vld [vmem:[%s5042_s5 + $0x8c8] sm:$0xff] }
 0x1dd   : > { %1572 = vmatpush.msrb.mxu3 %v2660_v47  ;;  %1689 = vmatpush.msrb.mxu0 %v2708_v48  ;;  %v2806_v45 = vld [vmem:[%s5042_s5 + $0x9c8] sm:$0xff]  ;;  %v2725_v47 = vld [vmem:[%s5042_s5 + $0x740] sm:$0xff] }
 0x1de   : > { %1767 = vmatpush.msra.mxu1 %v2740_v50  ;;  %1806 = vmatpush.msra.mxu2 %v2756_v28  ;;  %v2822_v46 = vld [vmem:[%s5042_s5 + $0xa48] sm:$0xff]  ;;  %v2773_v48 = vld [vmem:[%s5042_s5 + $0x8c0] sm:$0xff] }
 0x1df   : > { %1573 = vmatpush.msrb.mxu3 %v2659_v52  ;;  %1690 = vmatpush.msrb.mxu0 %v2707_v53  ;;  %v2805_v50 = vld [vmem:[%s5042_s5 + $0x9c0] sm:$0xff]  ;;  %v2724_v52 = vld [vmem:[%s5042_s5 + $0x738] sm:$0xff] }
 0x1e0   : > { %1768 = vmatpush.msra.mxu1 %v2739_v54  ;;  %1807 = vmatpush.msra.mxu2 %v2755_v55  ;;  %v2821_v28 = vld [vmem:[%s5042_s5 + $0xa40] sm:$0xff]  ;;  %v2772_v53 = vld [vmem:[%s5042_s5 + $0x8b8] sm:$0xff] }
 0x1e1   : > { %1574 = vmatpush.msrb.mxu3 %v2658_v56  ;;  %1691 = vmatpush.msrb.mxu0 %v2706_v57  ;;  %v2804_v54 = vld [vmem:[%s5042_s5 + $0x9b8] sm:$0xff]  ;;  %v2723_v56 = vld [vmem:[%s5042_s5 + $0x730] sm:$0xff] }
 0x1e2   : > { %1769 = vmatpush.msra.mxu1 %v2738_v60  ;;  %1808 = vmatpush.msra.mxu2 %v2754_v61  ;;  %v2820_v55 = vld [vmem:[%s5042_s5 + $0xa38] sm:$0xff]  ;;  %v2771_v57 = vld [vmem:[%s5042_s5 + $0x8b0] sm:$0xff] }
 0x1e3   : > { %1575 = vmatpush.msrb.mxu3 %v2657_v35  ;;  %1692 = vmatpush.msrb.mxu0 %v2705_v22  ;;  %v2803_v60 = vld [vmem:[%s5042_s5 + $0x9b0] sm:$0xff]  ;;  %v2722_v35 = vld [vmem:[%s5042_s5 + $0x728] sm:$0xff] }
 0x1e4   : > { %1770 = vmatpush.msra.mxu1 %v2737_v62  ;;  %1809 = vmatpush.msra.mxu2 %v2753_v63  ;;  %v2819_v61 = vld [vmem:[%s5042_s5 + $0xa30] sm:$0xff]  ;;  %v2770_v22 = vld [vmem:[%s5042_s5 + $0x8a8] sm:$0xff] }
 0x1e5   : > { %1576 = vmatpush.msrb.mxu3 %v2656_v0  ;;  %1693 = vmatpush.msrb.mxu0 %v2704_v1  ;;  %v2802_v62 = vld [vmem:[%s5042_s5 + $0x9a8] sm:$0xff]  ;;  %v2721_v0 = vld [vmem:[%s5042_s5 + $0x720] sm:$0xff] }
 0x1e6   : > { %1771 = vmatpush.msra.mxu1 %v2736_v2  ;;  %1810 = vmatpush.msra.mxu2 %v2752_v3  ;;  %v2818_v63 = vld [vmem:[%s5042_s5 + $0xa28] sm:$0xff]  ;;  %v2769_v1 = vld [vmem:[%s5042_s5 + $0x8a0] sm:$0xff] }
 0x1e7   : > { %1577 = vmatpush.msrb.mxu3 %v2655_v4  ;;  %1694 = vmatpush.msrb.mxu0 %v2703_v8  ;;  %v2801_v2 = vld [vmem:[%s5042_s5 + $0x9a0] sm:$0xff]  ;;  %v2720_v4 = vld [vmem:[%s5042_s5 + $0x718] sm:$0xff] }
 0x1e8   : > { %1772 = vmatpush.msra.mxu1 %v2735_v9  ;;  %1811 = vmatpush.msra.mxu2 %v2751_v10  ;;  %v2817_v3 = vld [vmem:[%s5042_s5 + $0xa20] sm:$0xff]  ;;  %v2768_v8 = vld [vmem:[%s5042_s5 + $0x898] sm:$0xff] }
 0x1e9   : > { %1578 = vmatpush.msrb.mxu3 %v2654_v12  ;;  %1695 = vmatpush.msrb.mxu0 %v2702_v13  ;;  %v2800_v9 = vld [vmem:[%s5042_s5 + $0x998] sm:$0xff]  ;;  %v2719_v12 = vld [vmem:[%s5042_s5 + $0x710] sm:$0xff] }
 0x1ea   : > { %1773 = vmatpush.msra.mxu1 %v2734_v15  ;;  %1812 = vmatpush.msra.mxu2 %v2750_v16  ;;  %v2816_v10 = vld [vmem:[%s5042_s5 + $0xa18] sm:$0xff]  ;;  %v2767_v13 = vld [vmem:[%s5042_s5 + $0x890] sm:$0xff] }
 0x1eb   : > { %1579 = vmatpush.msrb.mxu3 %v2653_v17  ;;  %1696 = vmatpush.msrb.mxu0 %v2701_v23  ;;  %v2799_v15 = vld [vmem:[%s5042_s5 + $0x990] sm:$0xff]  ;;  %v2718_v17 = vld [vmem:[%s5042_s5 + $0x708] sm:$0xff] }
 0x1ec   : > { %1774 = vmatpush.msra.mxu1 %v2733_v51  ;;  %1813 = vmatpush.msra.mxu2 %v2749_v18  ;;  %v2815_v16 = vld [vmem:[%s5042_s5 + $0xa10] sm:$0xff]  ;;  %v2766_v23 = vld [vmem:[%s5042_s5 + $0x888] sm:$0xff] }
 0x1ed   : > { %1580 = vmatmul.f32.vlgmr.msrb.gmra.mxu3 %v1546_v19  ;;  %1697 = vmatmul.f32.vlgmr.msrb.gmra.mxu0 %v1663_v6  ;;  %v2798_v51 = vld [vmem:[%s5042_s5 + $0x988] sm:$0xff]  ;;  %v2765_v19 = vld [vmem:[%s5042_s5 + $0x880] sm:$0xff] }
 0x1ee   : > { %1720 = vmatpush.msra.mxu3 %v2732_v27  ;;  %1775 = vmatmul.f32.vlgmr.msra.gmra.mxu1 %v1741_v38  ;;  %v2814_v18 = vld [vmem:[%s5042_s5 + $0xa08] sm:$0xff]  ;;  %v2717_v27 = vld [vmem:[%s5042_s5 + $0x700] sm:$0xff]  ;;  %v2796_v38 = vld [vmem:[%s5042_s5 + $0x978] sm:$0xff] }
 0x1ef   : > { %1814 = vmatmul.f32.vlgmr.msra.gmra.mxu2 %v1780_v21  ;;  %1837 = vmatpush.msra.mxu0 %v2780_v59  ;;  %v2797_v6 = vld [vmem:[%s5042_s5 + $0x980] sm:$0xff]  ;;  %v2844_v21 = vld [vmem:[%s5042_s5 + $0xaf8] sm:$0xff] }
 0x1f0   : > { %1915 = vmatpush.msrb.mxu1 %v2812_v7  ;;  %1954 = vmatpush.msrb.mxu2 %v2828_v11  ;;  %v2813_v59 = vld [vmem:[%s5042_s5 + $0xa00] sm:$0xff]  ;;  %v1702_v7 = vld [vmem:[#allocation2 + $0x12] sm:$0x1]  ;;  %v1819_v11 = vld [vmem:[#allocation2 + $0x17] sm:$0x1] }
 0x1f1   : > { %1721 = vmatpush.msra.mxu3 %v2731_v20  ;;  %1838 = vmatpush.msra.mxu0 %v2779_v24  ;;  %v1897_v20 = vld [vmem:[#allocation2 + $0x19] sm:$0x1] }
 0x1f2   : > { %1916 = vmatpush.msrb.mxu1 %v2811_v49  ;;  %1955 = vmatpush.msrb.mxu2 %v2827_v25  ;;  %v2876_v24 = vld [vmem:[%s5042_s5 + $0xbf8] sm:$0xff] }
 0x1f3   : > { %1722 = vmatpush.msra.mxu3 %v2730_v26  ;;  %1839 = vmatpush.msra.mxu0 %v2778_v29  ;;  %v2892_v49 = vld [vmem:[%s5042_s5 + $0xc78] sm:$0xff]  ;;  %v2795_v26 = vld [vmem:[%s5042_s5 + $0x970] sm:$0xff] }
 0x1f4   : > { %1917 = vmatpush.msrb.mxu1 %v2810_v30  ;;  %1956 = vmatpush.msrb.mxu2 %v2826_v58  ;;  %v1936_v25 = vld [vmem:[#allocation2 + $0x1c] sm:$0x1]  ;;  %v2843_v29 = vld [vmem:[%s5042_s5 + $0xaf0] sm:$0xff] }
 0x1f5   : > { %1723 = vmatpush.msra.mxu3 %v2729_v34  ;;  %1840 = vmatpush.msra.mxu0 %v2777_v32  ;;  %v2875_v30 = vld [vmem:[%s5042_s5 + $0xbf0] sm:$0xff]  ;;  %v2794_v34 = vld [vmem:[%s5042_s5 + $0x968] sm:$0xff] }
 0x1f6   : > { %1918 = vmatpush.msrb.mxu1 %v2809_v36  ;;  %1957 = vmatpush.msrb.mxu2 %v2825_v37  ;;  %v2891_v58 = vld [vmem:[%s5042_s5 + $0xc70] sm:$0xff]  ;;  %v2842_v32 = vld [vmem:[%s5042_s5 + $0xae8] sm:$0xff] }
 0x1f7   : > { %1724 = vmatpush.msra.mxu3 %v2728_v33  ;;  %1841 = vmatpush.msra.mxu0 %v2776_v39  ;;  %v2874_v36 = vld [vmem:[%s5042_s5 + $0xbe8] sm:$0xff]  ;;  %v2793_v33 = vld [vmem:[%s5042_s5 + $0x960] sm:$0xff] }
 0x1f8   : > { %1919 = vmatpush.msrb.mxu1 %v2808_v40  ;;  %1958 = vmatpush.msrb.mxu2 %v2824_v41  ;;  %v2890_v37 = vld [vmem:[%s5042_s5 + $0xc68] sm:$0xff]  ;;  %v2841_v39 = vld [vmem:[%s5042_s5 + $0xae0] sm:$0xff] }
 0x1f9   : > { %1725 = vmatpush.msra.mxu3 %v2727_v5  ;;  %1842 = vmatpush.msra.mxu0 %v2775_v42  ;;  %v2873_v40 = vld [vmem:[%s5042_s5 + $0xbe0] sm:$0xff]  ;;  %v2792_v5 = vld [vmem:[%s5042_s5 + $0x958] sm:$0xff] }
 0x1fa   : > { %1920 = vmatpush.msrb.mxu1 %v2807_v43  ;;  %1959 = vmatpush.msrb.mxu2 %v2823_v14  ;;  %v2889_v41 = vld [vmem:[%s5042_s5 + $0xc60] sm:$0xff]  ;;  %v2840_v42 = vld [vmem:[%s5042_s5 + $0xad8] sm:$0xff] }
 0x1fb   : > { %1726 = vmatpush.msra.mxu3 %v2726_v31  ;;  %1843 = vmatpush.msra.mxu0 %v2774_v44  ;;  %v2872_v43 = vld [vmem:[%s5042_s5 + $0xbd8] sm:$0xff]  ;;  %v2791_v31 = vld [vmem:[%s5042_s5 + $0x950] sm:$0xff] }
 0x1fc   : > { %1921 = vmatpush.msrb.mxu1 %v2806_v45  ;;  %1960 = vmatpush.msrb.mxu2 %v2822_v46  ;;  %v2888_v14 = vld [vmem:[%s5042_s5 + $0xc58] sm:$0xff]  ;;  %v2839_v44 = vld [vmem:[%s5042_s5 + $0xad0] sm:$0xff] }
 0x1fd   : > { %1727 = vmatpush.msra.mxu3 %v2725_v47  ;;  %1844 = vmatpush.msra.mxu0 %v2773_v48  ;;  %v2871_v45 = vld [vmem:[%s5042_s5 + $0xbd0] sm:$0xff]  ;;  %v2790_v47 = vld [vmem:[%s5042_s5 + $0x948] sm:$0xff] }
 0x1fe   : > { %1922 = vmatpush.msrb.mxu1 %v2805_v50  ;;  %1961 = vmatpush.msrb.mxu2 %v2821_v28  ;;  %v2887_v46 = vld [vmem:[%s5042_s5 + $0xc50] sm:$0xff]  ;;  %v2838_v48 = vld [vmem:[%s5042_s5 + $0xac8] sm:$0xff] }
 0x1ff   : > { %1728 = vmatpush.msra.mxu3 %v2724_v52  ;;  %1845 = vmatpush.msra.mxu0 %v2772_v53  ;;  %v2870_v50 = vld [vmem:[%s5042_s5 + $0xbc8] sm:$0xff]  ;;  %v2789_v52 = vld [vmem:[%s5042_s5 + $0x940] sm:$0xff] }
 0x200   : > { %1923 = vmatpush.msrb.mxu1 %v2804_v54  ;;  %1962 = vmatpush.msrb.mxu2 %v2820_v55  ;;  %v2886_v28 = vld [vmem:[%s5042_s5 + $0xc48] sm:$0xff]  ;;  %v2837_v53 = vld [vmem:[%s5042_s5 + $0xac0] sm:$0xff] }
 0x201   : > { %1729 = vmatpush.msra.mxu3 %v2723_v56  ;;  %1846 = vmatpush.msra.mxu0 %v2771_v57  ;;  %v2869_v54 = vld [vmem:[%s5042_s5 + $0xbc0] sm:$0xff]  ;;  %v2788_v56 = vld [vmem:[%s5042_s5 + $0x938] sm:$0xff] }
 0x202   : > { %1924 = vmatpush.msrb.mxu1 %v2803_v60  ;;  %1963 = vmatpush.msrb.mxu2 %v2819_v61  ;;  %v2885_v55 = vld [vmem:[%s5042_s5 + $0xc40] sm:$0xff]  ;;  %v2836_v57 = vld [vmem:[%s5042_s5 + $0xab8] sm:$0xff] }
 0x203   : > { %1730 = vmatpush.msra.mxu3 %v2722_v35  ;;  %1847 = vmatpush.msra.mxu0 %v2770_v22  ;;  %v2868_v60 = vld [vmem:[%s5042_s5 + $0xbb8] sm:$0xff]  ;;  %v2787_v35 = vld [vmem:[%s5042_s5 + $0x930] sm:$0xff] }
 0x204   : > { %1925 = vmatpush.msrb.mxu1 %v2802_v62  ;;  %1964 = vmatpush.msrb.mxu2 %v2818_v63  ;;  %v2884_v61 = vld [vmem:[%s5042_s5 + $0xc38] sm:$0xff]  ;;  %v2835_v22 = vld [vmem:[%s5042_s5 + $0xab0] sm:$0xff] }
 0x205   : > { %1731 = vmatpush.msra.mxu3 %v2721_v0  ;;  %1848 = vmatpush.msra.mxu0 %v2769_v1  ;;  %v2867_v62 = vld [vmem:[%s5042_s5 + $0xbb0] sm:$0xff]  ;;  %v2786_v0 = vld [vmem:[%s5042_s5 + $0x928] sm:$0xff] }
 0x206   : > { %1926 = vmatpush.msrb.mxu1 %v2801_v2  ;;  %1965 = vmatpush.msrb.mxu2 %v2817_v3  ;;  %v2883_v63 = vld [vmem:[%s5042_s5 + $0xc30] sm:$0xff]  ;;  %v2834_v1 = vld [vmem:[%s5042_s5 + $0xaa8] sm:$0xff] }
 0x207   : > { %1732 = vmatpush.msra.mxu3 %v2720_v4  ;;  %1849 = vmatpush.msra.mxu0 %v2768_v8  ;;  %v2866_v2 = vld [vmem:[%s5042_s5 + $0xba8] sm:$0xff]  ;;  %v2785_v4 = vld [vmem:[%s5042_s5 + $0x920] sm:$0xff] }
 0x208   : > { %1927 = vmatpush.msrb.mxu1 %v2800_v9  ;;  %1966 = vmatpush.msrb.mxu2 %v2816_v10  ;;  %v2882_v3 = vld [vmem:[%s5042_s5 + $0xc28] sm:$0xff]  ;;  %v2833_v8 = vld [vmem:[%s5042_s5 + $0xaa0] sm:$0xff] }
 0x209   : > { %1733 = vmatpush.msra.mxu3 %v2719_v12  ;;  %1850 = vmatpush.msra.mxu0 %v2767_v13  ;;  %v2865_v9 = vld [vmem:[%s5042_s5 + $0xba0] sm:$0xff]  ;;  %v2784_v12 = vld [vmem:[%s5042_s5 + $0x918] sm:$0xff] }
 0x20a   : > { %1928 = vmatpush.msrb.mxu1 %v2799_v15  ;;  %1967 = vmatpush.msrb.mxu2 %v2815_v16  ;;  %v2881_v10 = vld [vmem:[%s5042_s5 + $0xc20] sm:$0xff]  ;;  %v2832_v13 = vld [vmem:[%s5042_s5 + $0xa98] sm:$0xff] }
 0x20b   : > { %1734 = vmatpush.msra.mxu3 %v2718_v17  ;;  %1851 = vmatpush.msra.mxu0 %v2766_v23  ;;  %v2864_v15 = vld [vmem:[%s5042_s5 + $0xb98] sm:$0xff]  ;;  %v2783_v17 = vld [vmem:[%s5042_s5 + $0x910] sm:$0xff] }
 0x20c   : > { %1929 = vmatpush.msrb.mxu1 %v2798_v51  ;;  %1968 = vmatpush.msrb.mxu2 %v2814_v18  ;;  %v2880_v16 = vld [vmem:[%s5042_s5 + $0xc18] sm:$0xff]  ;;  %v2831_v23 = vld [vmem:[%s5042_s5 + $0xa90] sm:$0xff] }
 0x20d   : > { %1735 = vmatpush.msra.mxu3 %v2717_v27  ;;  %1852 = vmatpush.msra.mxu0 %v2765_v19  ;;  %v2863_v51 = vld [vmem:[%s5042_s5 + $0xb90] sm:$0xff]  ;;  %v2782_v27 = vld [vmem:[%s5042_s5 + $0x908] sm:$0xff] }
 0x20e   : > { %1930 = vmatpush.msrb.mxu1 %v2797_v6  ;;  %1969 = vmatpush.msrb.mxu2 %v2813_v59  ;;  %v2879_v18 = vld [vmem:[%s5042_s5 + $0xc10] sm:$0xff]  ;;  %v2830_v19 = vld [vmem:[%s5042_s5 + $0xa88] sm:$0xff] }
 0x20f   : > { %1736 = vmatmul.f32.vlgmr.msra.gmra.mxu3 %v1702_v7  ;;  %1853 = vmatmul.f32.vlgmr.msra.gmra.mxu0 %v1819_v11  ;;  %v2862_v6 = vld [vmem:[%s5042_s5 + $0xb88] sm:$0xff]  ;;  %v2829_v7 = vld [vmem:[%s5042_s5 + $0xa80] sm:$0xff] }
 0x210   : > { %1876 = vmatpush.msrb.mxu3 %v2796_v38  ;;  %1931 = vmatmul.f32.vlgmr.msrb.gmra.mxu1 %v1897_v20  ;;  %v2878_v59 = vld [vmem:[%s5042_s5 + $0xc08] sm:$0xff]  ;;  %v2781_v38 = vld [vmem:[%s5042_s5 + $0x900] sm:$0xff]  ;;  %v2860_v20 = vld [vmem:[%s5042_s5 + $0xb78] sm:$0xff] }
 0x211   : > { %1970 = vmatmul.f32.vlgmr.msrb.gmra.mxu2 %v1936_v25  ;;  %1993 = vmatpush.msrb.mxu0 %v2844_v21  ;;  %v2861_v11 = vld [vmem:[%s5042_s5 + $0xb80] sm:$0xff]  ;;  %v2053_v25 = vld [vmem:[#allocation2 + $0x1f] sm:$0x1] }
 0x212   : > { %2071 = vmatpush.msra.mxu1 %v2876_v24  ;;  %2110 = vmatpush.msra.mxu2 %v2892_v49  ;;  %v2877_v21 = vld [vmem:[%s5042_s5 + $0xc00] sm:$0xff]  ;;  %v1858_v24 = vld [vmem:[#allocation2 + $0x18] sm:$0x1]  ;;  %v1975_v49 = vld [vmem:[#allocation2 + $0x1d] sm:$0x1] }
 0x213   : > { %1877 = vmatpush.msrb.mxu3 %v2795_v26  ;;  %1994 = vmatpush.msrb.mxu0 %v2843_v29  ;;  %v2859_v26 = vld [vmem:[%s5042_s5 + $0xb70] sm:$0xff]  ;;  %v2092_v29 = vld [vmem:[#allocation2 + $0x20] sm:$0x1] }
 0x214   : > { %2072 = vmatpush.msra.mxu1 %v2875_v30  ;;  %2111 = vmatpush.msra.mxu2 %v2891_v58  ;;  %v2858_v30 = vld [vmem:[%s5042_s5 + $0xb68] sm:$0xff]  ;;  %v2857_v58 = vld [vmem:[%s5042_s5 + $0xb60] sm:$0xff] }
 0x215   : > { %1878 = vmatpush.msrb.mxu3 %v2794_v34  ;;  %1995 = vmatpush.msrb.mxu0 %v2842_v32  ;;  %v2856_v34 = vld [vmem:[%s5042_s5 + $0xb58] sm:$0xff]  ;;  %v2855_v32 = vld [vmem:[%s5042_s5 + $0xb50] sm:$0xff] }
 0x216   : > { %2073 = vmatpush.msra.mxu1 %v2874_v36  ;;  %2112 = vmatpush.msra.mxu2 %v2890_v37  ;;  %v2854_v36 = vld [vmem:[%s5042_s5 + $0xb48] sm:$0xff]  ;;  %v2853_v37 = vld [vmem:[%s5042_s5 + $0xb40] sm:$0xff] }
 0x217   : > { %1879 = vmatpush.msrb.mxu3 %v2793_v33  ;;  %1996 = vmatpush.msrb.mxu0 %v2841_v39  ;;  %v2852_v33 = vld [vmem:[%s5042_s5 + $0xb38] sm:$0xff]  ;;  %v2851_v39 = vld [vmem:[%s5042_s5 + $0xb30] sm:$0xff] }
 0x218   : > { %2074 = vmatpush.msra.mxu1 %v2873_v40  ;;  %2113 = vmatpush.msra.mxu2 %v2889_v41  ;;  %v2850_v40 = vld [vmem:[%s5042_s5 + $0xb28] sm:$0xff]  ;;  %v2849_v41 = vld [vmem:[%s5042_s5 + $0xb20] sm:$0xff] }
 0x219   : > { %1880 = vmatpush.msrb.mxu3 %v2792_v5  ;;  %1997 = vmatpush.msrb.mxu0 %v2840_v42  ;;  %v2848_v5 = vld [vmem:[%s5042_s5 + $0xb18] sm:$0xff]  ;;  %v2847_v42 = vld [vmem:[%s5042_s5 + $0xb10] sm:$0xff] }
 0x21a   : > { %2075 = vmatpush.msra.mxu1 %v2872_v43  ;;  %2114 = vmatpush.msra.mxu2 %v2888_v14  ;;  %v2846_v43 = vld [vmem:[%s5042_s5 + $0xb08] sm:$0xff]  ;;  %v2845_v14 = vld [vmem:[%s5042_s5 + $0xb00] sm:$0xff] }
 0x21b   : > { %1881 = vmatpush.msrb.mxu3 %v2791_v31  ;;  %1998 = vmatpush.msrb.mxu0 %v2839_v44  ;;  %v2014_v31 = vld [vmem:[#allocation2 + $0x1e] sm:$0x1] }
 0x21c   : > { %2076 = vmatpush.msra.mxu1 %v2871_v45  ;;  %2115 = vmatpush.msra.mxu2 %v2887_v46 }
 0x21d   : > { %1882 = vmatpush.msrb.mxu3 %v2790_v47  ;;  %1999 = vmatpush.msrb.mxu0 %v2838_v48 }
 0x21e   : > { %2077 = vmatpush.msra.mxu1 %v2870_v50  ;;  %2116 = vmatpush.msra.mxu2 %v2886_v28 }
 0x21f   : > { %1883 = vmatpush.msrb.mxu3 %v2789_v52  ;;  %2000 = vmatpush.msrb.mxu0 %v2837_v53 }
 0x220   : > { %2078 = vmatpush.msra.mxu1 %v2869_v54  ;;  %2117 = vmatpush.msra.mxu2 %v2885_v55 }
 0x221   : > { %1884 = vmatpush.msrb.mxu3 %v2788_v56  ;;  %2001 = vmatpush.msrb.mxu0 %v2836_v57 }
 0x222   : > { %2079 = vmatpush.msra.mxu1 %v2868_v60  ;;  %2118 = vmatpush.msra.mxu2 %v2884_v61 }
 0x223   : > { %1885 = vmatpush.msrb.mxu3 %v2787_v35  ;;  %2002 = vmatpush.msrb.mxu0 %v2835_v22 }
 0x224   : > { %2080 = vmatpush.msra.mxu1 %v2867_v62  ;;  %2119 = vmatpush.msra.mxu2 %v2883_v63  ;;  %v1231_v45 = vpop.f32.mrf.mxu0 }
 0x225   : > { %1886 = vmatpush.msrb.mxu3 %v2786_v0  ;;  %2003 = vmatpush.msrb.mxu0 %v2834_v1  ;;  %v1308_v50 = vpop.f32.mrf.mxu1 }
 0x226   : > { %2081 = vmatpush.msra.mxu1 %v2866_v2  ;;  %2120 = vmatpush.msra.mxu2 %v2882_v3 }
 0x227   : > { %1887 = vmatpush.msrb.mxu3 %v2785_v4  ;;  %2004 = vmatpush.msrb.mxu0 %v2833_v8 }
 0x228   : > { %2082 = vmatpush.msra.mxu1 %v2865_v9  ;;  %2121 = vmatpush.msra.mxu2 %v2881_v10 }
 0x229   : > { %1888 = vmatpush.msrb.mxu3 %v2784_v12  ;;  %2005 = vmatpush.msrb.mxu0 %v2832_v13 }
 0x22a   : > { %2083 = vmatpush.msra.mxu1 %v2864_v15  ;;  %2122 = vmatpush.msra.mxu2 %v2880_v16  ;;  %v1211_v44 = vpop.f32.mrf.mxu3 }
 0x22b   : > { %1889 = vmatpush.msrb.mxu3 %v2783_v17  ;;  %2006 = vmatpush.msrb.mxu0 %v2831_v23  ;;  %v1232_v47 = vadd.f32 %v1231_v45, %v1211_v44  ;;  %v1347_v52 = vpop.f32.mrf.mxu2  ;;  %v2180_v44 = vld [vmem:[#allocation3 + $0x68] sm:$0xff]  ;;  %v2179_v45 = vld [vmem:[#allocation3 + $0x60] sm:$0xff] }
 0x22c   : > { %2084 = vmatpush.msra.mxu1 %v2863_v51  ;;  %2123 = vmatpush.msra.mxu2 %v2879_v18 }
 0x22d   : > { %1890 = vmatpush.msrb.mxu3 %v2782_v27  ;;  %2007 = vmatpush.msrb.mxu0 %v2830_v19 }
 0x22e   : > { %2085 = vmatpush.msra.mxu1 %v2862_v6  ;;  %2124 = vmatpush.msra.mxu2 %v2878_v59  ;;  %v1386_v54 = vpop.f32.mrf.mxu0 }
 0x22f   : > { %1891 = vmatpush.msrb.mxu3 %v2781_v38  ;;  %2008 = vmatpush.msrb.mxu0 %v2829_v7  ;;  %v1464_v60 = vpop.f32.mrf.mxu1 }
 0x230   : > { %2086 = vmatpush.msra.mxu1 %v2861_v11  ;;  %2125 = vmatpush.msra.mxu2 %v2877_v21 }
 0x231   : > { %1892 = vmatmul.f32.vlgmr.msrb.gmra.mxu3 %v1858_v24  ;;  %2009 = vmatmul.f32.vlgmr.msrb.gmra.mxu0 %v1975_v49 }
 0x232   : > { %2032 = vmatpush.msra.mxu3 %v2860_v20  ;;  %2087 = vmatmul.f32.vlgmr.msra.gmra.mxu1 %v2053_v25 }
 0x233   : > { %2126 = vmatmul.f32.vlgmr.msra.gmra.mxu2 %v2092_v29  ;;  %v2131_v29 = vld [vmem:[%s5043_s6] sm:$0x1] }
 0x234   : > { %2033 = vmatpush.msra.mxu3 %v2859_v26  ;;  %v1269_v46 = vpop.f32.mrf.mxu3 }
 0x235   : > { %v1272_v48 = vadd.f32 %v1269_v46, %v1232_v47  ;;  %v2178_v46 = vld [vmem:[#allocation3 + $0x58] sm:$0xff]  ;;  %v2177_v47 = vld [vmem:[#allocation3 + $0x50] sm:$0xff] }
 0x236   : > { %2034 = vmatpush.msra.mxu3 %v2858_v30  ;;  %v1503_v35 = vpop.f32.mrf.mxu2 }
 0x237   : > { %v1311_v28 = vadd.f32 %v1308_v50, %v1272_v48  ;;  %v2176_v48 = vld [vmem:[#allocation3 + $0x48] sm:$0xff]  ;;  %v2175_v50 = vld [vmem:[#allocation3 + $0x40] sm:$0xff] }
 0x238   : > { %2035 = vmatpush.msra.mxu3 %v2857_v58 }
 0x239   : > { %v1350_v53 = vadd.f32 %v1347_v52, %v1311_v28  ;;  %v2174_v28 = vld [vmem:[#allocation3 + $0x38] sm:$0xff]  ;;  %v2173_v52 = vld [vmem:[#allocation3 + $0x30] sm:$0xff] }
 0x23a   : > { %2036 = vmatpush.msra.mxu3 %v2856_v34 }
 0x23b   : > { %v1389_v56 = vadd.f32 %v1386_v54, %v1350_v53  ;;  %v2172_v53 = vld [vmem:[#allocation3 + $0x28] sm:$0xff]  ;;  %v2171_v54 = vld [vmem:[#allocation3 + $0x20] sm:$0xff] }
 0x23c   : > { %2037 = vmatpush.msra.mxu3 %v2855_v32  ;;  %v2133_v32 = vlaneseq }
 0x23e   : > { %2038 = vmatpush.msra.mxu3 %v2854_v36  ;;  %v5005_v36 = vand.u32 127, %v2133_v32  ;;  %v2252_v32 = vld [vmem:[#allocation7 + $0x48] sm:$0xff] }
 0x240   : > { %2039 = vmatpush.msra.mxu3 %v2853_v37  ;;  %vm2135_vm1 = vcmp.lt.s32.totalorder %v5005_v36, 32  ;;  %vm2287_vm5 = vcmp.lt.s32.totalorder %v5005_v36, 8  ;;  %vm2286_vm6 = vcmp.lt.s32.totalorder %v5005_v36, 4 }
 0x242   : > { %2040 = vmatpush.msra.mxu3 %v2852_v33 }
 0x244   : > { %2041 = vmatpush.msra.mxu3 %v2851_v39  ;;  %v3060_v39 = vmov 0.0  }
 0x246   : > { %2042 = vmatpush.msra.mxu3 %v2850_v40  ;;  %v2893_v40 = vsel %vm2135_vm1, 1.0, %v3060_v39  ;;  %v2249_v39 = vld [vmem:[#allocation7 + $0x30] sm:$0xff] }
 0x248   : > { %2043 = vmatpush.msra.mxu3 %v2849_v41  ;;  %v1542_v62 = vpop.f32.mrf.mxu0 }
 0x249   : > { %v1620_v2 = vpop.f32.mrf.mxu1 }
 0x24a   : > { %2044 = vmatpush.msra.mxu3 %v2848_v5 }
 0x24c   : > { %2045 = vmatpush.msra.mxu3 %v2847_v42 }
 0x24e   : > { %2046 = vmatpush.msra.mxu3 %v2846_v43  ;;  %v1425_v55 = vpop.f32.mrf.mxu3 }
 0x24f   : > { %v1428_v57 = vadd.f32 %v1425_v55, %v1389_v56  ;;  %v2170_v55 = vld [vmem:[#allocation3 + $0x18] sm:$0xff]  ;;  %v2169_v56 = vld [vmem:[#allocation3 + $0x10] sm:$0xff] }
 0x250   : > { %2047 = vmatpush.msra.mxu3 %v2845_v14  ;;  %v1659_v4 = vpop.f32.mrf.mxu2  ;;  %v2182_v14 = vld [vmem:[#allocation3 + $0x78] sm:$0xff] }
 0x251   : > { %2048 = vmatmul.f32.vlgmr.msra.gmra.mxu3 %v2014_v31  ;;  %v1467_v61 = vadd.f32 %v1464_v60, %v1428_v57  ;;  %2184 = vmatpush.msra.mxu0 %v2182_v14  ;;  %v2181_v31 = vld [vmem:[#allocation3 + $0x70] sm:$0xff]  ;;  %v2168_v57 = vld [vmem:[#allocation3 + $0x8] sm:$0xff] }
 0x253   : > { %v1506_v22 = vadd.f32 %v1503_v35, %v1467_v61  ;;  %2185 = vmatpush.msra.mxu0 %v2181_v31  ;;  %v2167_v35 = vld [vmem:[#allocation3] sm:$0xff] }
 0x255   : > { %v1545_v0 = vadd.f32 %v1542_v62, %v1506_v22  ;;  %2186 = vmatpush.msra.mxu0 %v2180_v44  ;;  %v2220_v62 = vld [vmem:[#allocation5 + $0x78] sm:$0xff]  ;;  %v2245_v44 = vld [vmem:[#allocation7 + $0x10] sm:$0xff] }
 0x256   : > { %2222 = vmatpush.msrb.mxu3 %v2220_v62 }
 0x257   : > { %2187 = vmatpush.msra.mxu0 %v2179_v45  ;;  %v2244_v45 = vld [vmem:[#allocation7 + $0x8] sm:$0xff] }
 0x259   : > { %2188 = vmatpush.msra.mxu0 %v2178_v46  ;;  %v2243_v46 = vld [vmem:[#allocation7] sm:$0xff] }
 0x25b   : > { %2189 = vmatpush.msra.mxu0 %v2177_v47  ;;  %v2221_v47 = vld [vmem:[%s5049_s12] sm:$0x1] }
 0x25d   : > { %2190 = vmatpush.msra.mxu0 %v2176_v48 }
 0x25f   : > { %2191 = vmatpush.msra.mxu0 %v2175_v50 }
 0x261   : > { %2192 = vmatpush.msra.mxu0 %v2174_v28 }
 0x263   : > { %2193 = vmatpush.msra.mxu0 %v2173_v52  ;;  %v2259_v52 = vld [vmem:[%s5051_s14] sm:$0x1] }
 0x265   : > { %2194 = vmatpush.msra.mxu0 %v2172_v53 }
 0x267   : > { %2195 = vmatpush.msra.mxu0 %v2171_v54 }
 0x269   : > { %2196 = vmatpush.msra.mxu0 %v2170_v55 }
 0x26a   : > { %v1698_v9 = vpop.f32.mrf.mxu0 }
 0x26b   : > { %v1776_v15 = vpop.f32.mrf.mxu1  ;;  %2197 = vmatpush.msra.mxu0 %v2169_v56 }
 0x26d   : > { %2198 = vmatpush.msra.mxu0 %v2168_v57 }
 0x26f   : > { %2199 = vmatpush.msra.mxu0 %v2167_v35 }
 0x270   : > { %v1581_v63 = vpop.f32.mrf.mxu3 }
 0x271   : > { %v1584_v1 = vadd.f32 %v1581_v63, %v1545_v0  ;;  %v2219_v63 = vld [vmem:[#allocation5 + $0x70] sm:$0xff]  ;;  %v2218_v0 = vld [vmem:[#allocation5 + $0x68] sm:$0xff] }
 0x272   : > { %v1815_v17 = vpop.f32.mrf.mxu2  ;;  %2223 = vmatpush.msrb.mxu3 %v2219_v63 }
 0x273   : > { %v1623_v3 = vadd.f32 %v1620_v2, %v1584_v1  ;;  %v2217_v1 = vld [vmem:[#allocation5 + $0x60] sm:$0xff]  ;;  %v2216_v2 = vld [vmem:[#allocation5 + $0x58] sm:$0xff] }
 0x274   : > { %2224 = vmatpush.msrb.mxu3 %v2218_v0 }
 0x275   : > { %v1662_v8 = vadd.f32 %v1659_v4, %v1623_v3 }
 0x276   : > { %2225 = vmatpush.msrb.mxu3 %v2217_v1 }
 0x277   : > { %v1701_v12 = vadd.f32 %v1698_v9, %v1662_v8  ;;  %v2215_v8 = vld [vmem:[#allocation5 + $0x50] sm:$0xff] }
 0x278   : > { %2226 = vmatpush.msrb.mxu3 %v2216_v2 }
 0x27a   : > { %2227 = vmatpush.msrb.mxu3 %v2215_v8 }
 0x28c   : > { %v1854_v51 = vpop.f32.mrf.mxu0 }
 0x28d   : > { %v1932_v6 = vpop.f32.mrf.mxu1 }
 0x292   : > { %v1737_v10 = vpop.f32.mrf.mxu3 }
 0x293   : > { %v1740_v13 = vadd.f32 %v1737_v10, %v1701_v12  ;;  %v2214_v10 = vld [vmem:[#allocation5 + $0x48] sm:$0xff] }
 0x294   : > { %v1971_v38 = vpop.f32.mrf.mxu2  ;;  %2228 = vmatpush.msrb.mxu3 %v2214_v10 }
 0x295   : > { %v1779_v16 = vadd.f32 %v1776_v15, %v1740_v13  ;;  %v2213_v13 = vld [vmem:[#allocation5 + $0x40] sm:$0xff] }
 0x296   : > { %2229 = vmatpush.msrb.mxu3 %v2213_v13 }
 0x297   : > { %v1818_v23 = vadd.f32 %v1815_v17, %v1779_v16  ;;  %v2212_v16 = vld [vmem:[#allocation5 + $0x38] sm:$0xff] }
 0x298   : > { %2230 = vmatpush.msrb.mxu3 %v2212_v16 }
 0x299   : > { %v1857_v27 = vadd.f32 %v1854_v51, %v1818_v23  ;;  %v2211_v23 = vld [vmem:[#allocation5 + $0x30] sm:$0xff]  ;;  %v2162_v51 = vld [vmem:[%s5044_s7] sm:$0x1] }
 0x29a   : > { %2231 = vmatpush.msrb.mxu3 %v2211_v23 }
 0x2ae   : > { %v2010_v11 = vpop.f32.mrf.mxu0 }
 0x2af   : > { %v2088_v49 = vpop.f32.mrf.mxu1 }
 0x2b4   : > { %v1893_v18 = vpop.f32.mrf.mxu3 }
 0x2b5   : > { %v1896_v19 = vadd.f32 %v1893_v18, %v1857_v27  ;;  %v2210_v27 = vld [vmem:[#allocation5 + $0x28] sm:$0xff] }
 0x2b6   : > { %v2127_v26 = vpop.f32.mrf.mxu2  ;;  %2232 = vmatpush.msrb.mxu3 %v2210_v27 }
 0x2b7   : > { %v1935_v59 = vadd.f32 %v1932_v6, %v1896_v19  ;;  %v2164_v6 = vld [vmem:[%s5045_s8] sm:$0x1] }
 0x2b9   : > { %v1974_v7 = vadd.f32 %v1971_v38, %v1935_v59  ;;  %v2209_v59 = vld [vmem:[#allocation5 + $0x20] sm:$0xff] }
 0x2ba   : > { %2233 = vmatpush.msrb.mxu3 %v2209_v59 }
 0x2bb   : > { %v2013_v21 = vadd.f32 %v2010_v11, %v1974_v7  ;;  %v2208_v7 = vld [vmem:[#allocation5 + $0x18] sm:$0xff] }
 0x2bc   : > { %2234 = vmatpush.msrb.mxu3 %v2208_v7 }
 0x2d4   : > { %v2049_v20 = vpop.f32.mrf.mxu3 }
 0x2d5   : > { %v2052_v24 = vadd.f32 %v2049_v20, %v2013_v21  ;;  %v2207_v20 = vld [vmem:[#allocation5 + $0x10] sm:$0xff] }
 0x2d6   : > { %2235 = vmatpush.msrb.mxu3 %v2207_v20 }
 0x2d7   : > { %v2091_v25 = vadd.f32 %v2088_v49, %v2052_v24  ;;  %v2206_v24 = vld [vmem:[#allocation5 + $0x8] sm:$0xff]  ;;  %v2205_v49 = vld [vmem:[#allocation5] sm:$0xff] }
 0x2d8   : > { %2236 = vmatpush.msrb.mxu3 %v2206_v24 }
 0x2d9   : > { %v2130_v30 = vadd.f32 %v2127_v26, %v2091_v25  ;;  %v2258_v25 = vld [vmem:[#allocation7 + $0x78] sm:$0xff]  ;;  %v2257_v26 = vld [vmem:[#allocation7 + $0x70] sm:$0xff] }
 0x2da   : > { %2237 = vmatpush.msrb.mxu3 %v2205_v49  ;;  %2260 = vmatpush.msrb.mxu1 %v2258_v25 }
 0x2db   : > { %v2132_v58 = vadd.f32 %v2131_v29, %v2130_v30  ;;  %v2256_v29 = vld [vmem:[#allocation7 + $0x68] sm:$0xff]  ;;  %v2255_v30 = vld [vmem:[#allocation7 + $0x60] sm:$0xff] }
 0x2dc   : > { %2261 = vmatpush.msrb.mxu1 %v2257_v26 }
 0x2dd   : > { %v2139_v34 = vsel %vm2138_vm0, %v2132_v58, 0.0 }
 0x2de   : > { %2140 = vadd.xlane.f32.xlu0 %v2139_v34  ;;  %2262 = vmatpush.msrb.mxu1 %v2256_v29  ;;  %v2253_v34 = vld [vmem:[#allocation7 + $0x50] sm:$0xff] }
 0x2e0   : > { %2263 = vmatpush.msrb.mxu1 %v2255_v30 }
 0x351   : > { %v2141_v37 = vpop.xlane.xlu0 %2140 }
 0x352   : > { %v2142_v33 = vmul.f32 0.03125, %v2141_v37  ;;  %v2251_v37 = vld [vmem:[#allocation7 + $0x40] sm:$0xff] }
 0x354   : > { %v2143_v41 = vsub.f32 %v2132_v58, %v2142_v33  ;;  %v2254_v58 = vld [vmem:[#allocation7 + $0x58] sm:$0xff] }
 0x355   : > { %2264 = vmatpush.msrb.mxu1 %v2254_v58  ;;  %v2250_v33 = vld [vmem:[#allocation7 + $0x38] sm:$0xff] }
 0x356   : > { %v5008_v5 = vmul.f32 %v2893_v40, %v2143_v41  ;;  %v2248_v40 = vld [vmem:[#allocation7 + $0x28] sm:$0xff]  ;;  %v2247_v41 = vld [vmem:[#allocation7 + $0x20] sm:$0xff] }
 0x357   : > { %2265 = vmatpush.msrb.mxu1 %v2253_v34 }
 0x358   : > { %v2145_v42 = vmul.f32 %v5008_v5, %v5008_v5 }
 0x359   : > { %2266 = vmatpush.msrb.mxu1 %v2252_v32 }
 0x35a   : > { %v2146_v43 = vsel %vm2138_vm0, %v2145_v42, 0.0  ;;  %v2183_v42 = vld [vmem:[%s5047_s10] sm:$0x1] }
 0x35b   : > { %2147 = vadd.xlane.f32.xlu0 %v2146_v43  ;;  %2267 = vmatpush.msrb.mxu1 %v2251_v37 }
 0x35d   : > { %2268 = vmatpush.msrb.mxu1 %v2250_v33 }
 0x35f   : > { %2269 = vmatpush.msrb.mxu1 %v2249_v39 }
 0x361   : > { %2270 = vmatpush.msrb.mxu1 %v2248_v40 }
 0x363   : > { %2271 = vmatpush.msrb.mxu1 %v2247_v41 }
 0x3ce   : > { %v2148_v60 = vpop.xlane.xlu0 %2147 }
 0x3cf   : > { %v2149_v61 = vmul.f32 0.03125, %v2148_v60 }
 0x3d1   : > { %v2150_v22 = vadd.f32 1e-05, %v2149_v61 }
 0x3d3   : > { %2941 = vrsqrt.f32 %v2150_v22  ;;  %vm2157_vm3 = vweird.f32 %v2150_v22 }
 0x3d9   : > { %v2942_v3 = vpop.eup %2941 }
 0x3da   : > { %v2152_v4 = vmul.f32 %v2942_v3, %v2150_v22  ;;  %vm2158_vm2 = vweird.f32 %v2942_v3 }
 0x3db   : > { %vm2159_vm4 = vmor %vm2157_vm3, %vm2158_vm2 }
 0x3dc   : > { %v2153_v9 = vmul.f32 %v2942_v3, %v2152_v4 }
 0x3de   : > { %v2154_v12 = vmul.f32 0.5, %v2153_v9 }
 0x3e0   : > { %v2155_v15 = vsub.f32 1.5, %v2154_v12 }
 0x3e2   : > { %v2156_v17 = vmul.f32 %v2942_v3, %v2155_v15 }
 0x3e4   : > { %v2160_v18 = vsel %vm2159_vm4, %v2942_v3, %v2156_v17 }
 0x3e5   : > { %v2161_v19 = vmul.f32 %v2160_v18, %v5008_v5  ;;  %v2246_v5 = vld [vmem:[#allocation7 + $0x18] sm:$0xff] }
 0x3e6   : > { %2272 = vmatpush.msrb.mxu1 %v2246_v5 }
 0x3e7   : > { %v2163_v38 = vmul.f32 %v2162_v51, %v2161_v19 }
 0x3e8   : > { %2273 = vmatpush.msrb.mxu1 %v2245_v44 }
 0x3e9   : > { %v2165_v11 = vadd.f32 %v2164_v6, %v2163_v38 }
 0x3ea   : > { %2274 = vmatpush.msrb.mxu1 %v2244_v45 }
 0x3eb   : > { %2943 = vtanh.f32 %v2165_v11 }
 0x3ec   : > { %2275 = vmatpush.msrb.mxu1 %v2243_v46 }
 0x3f1   : > { %v2944_v21 = vpop.eup %2943 }
 0x3f2   : > { %2200 = vmatmul.f32.vlgmr.msra.gmra.mxu0 %v2944_v21 }
 0x46f   : > { %v2201_v43 = vpop.f32.mrf.mxu0 }
 0x470   : > { %v2202_v14 = vadd.f32 %v2201_v43, %v2183_v42 }
 0x472   : > { %v2204_v31 = vmax.f32 %v2202_v14, 0.0 }
 0x474   : > { %2238 = vmatmul.f32.vlgmr.msrb.gmra.mxu3 %v2204_v31 }
 0x4f7   : > { %v2239_v48 = vpop.f32.mrf.mxu3 }
 0x4f8   : > { %v2240_v50 = vadd.f32 %v2239_v48, %v2221_v47 }
 0x4fa   : > { %v2242_v28 = vmax.f32 %v2240_v50, 0.0 }
 0x4fc   : > { %2276 = vmatmul.f32.vlgmr.msrb.gmra.mxu1 %v2242_v28 }
 0x579   : > { %v2277_v53 = vpop.f32.mrf.mxu1 }
 0x57a   : > { %v2278_v54 = vadd.f32 %v2277_v53, %v2259_v52 }
 0x57c   : > { %2945 = vtanh.f32 %v2278_v54 }
 0x582   : > { %v2946_v55 = vpop.eup %2945 }
 0x583   : > { %v2281_v56 = vadd.f32 1.0, %v2946_v55 }
 0x585   : > { %v2282_v57 = vmul.f32 6.0, %v2281_v56 }
 0x587   : > { %v2283_v60 = vadd.f32 -10.0, %v2282_v57 }
 0x589   : > { %v2284_v61 = vmul.f32 1.442695, %v2283_v60 }
 0x58b   : > { %2947 = vpow2.f32 %v2284_v61 }
 0x591   : > { %v2948_v35 = vpop.eup %2947 }
 0x592   : > { %v2288_v22 = vsel %vm2287_vm5, %v2948_v35, 0.0 }
 0x593   : > { %v2289_v62 = vsel %vm2286_vm6, %v2278_v54, %v2288_v22 }
 0x594   : > { %2290 = vst [vmem:[%s540_s21] sm:$0x1] %v2289_v62 }
 0x595 PF: > { %s27_s18 = sadd.s32 1, %s3053_s18  }
 0x596   : > { %p24_p7 = scmp.ge.s32.totalorder %s27_s18, 4  }
 0x598   :  { %26 = sbr.rel (!%p24_p7) target bundleno = 4 (0x4), region = 155 }
 0x59d   :  { %2308 = vsyncpa [#allocation4], 1 }
 0x59e   :  { %2310 = vsyncpa [#allocation4 + $0x1], 1 }
 0x59f   :  { %2311 = vsyncpa [#allocation6], 1 }

</bundles_post_ra>
